<compile_context>
chip_gen: v5e
topology: v5e:2x2
jax: 0.10.0
libtpu: 0.0.40
codegen_flags: <defaults>
</compile_context>

<pallas_src>
import functools

import jax
import jax.numpy as jnp
from jax.experimental import pallas as pl
from jax.experimental.pallas import tpu as pltpu


# ----------------------------- helpers --------------------------------------

def _round_up(x, m):
    return ((x + m - 1) // m) * m


def _choose_tm(m, target=1024):
    """Pick an M tile: big (HBM-roofline knee is ~512+), multiple of 8, and
    leaving >=2 grid steps when possible so v7x's two TensorCores both work."""
    tm = min(target, _round_up(m, 8))
    while tm > 128 and pl.cdiv(m, tm) < 2:
        tm = _round_up(tm // 2, 8)
    return tm


def _compiler_params():
    return pltpu.CompilerParams(
        dimension_semantics=("parallel",),
        vmem_limit_bytes=32 * 1024 * 1024,  # safe on v5e/v6e/v7x
    )


# ----------------------------- Pallas kernels -------------------------------

def _matmul_kernel(a_ref, b_ref, o_ref):
    # (tm, K) @ (K, N) -> (tm, N), f32 MXU accumulation.
    o_ref[...] = jnp.dot(a_ref[...], b_ref[...],
                         preferred_element_type=jnp.float32).astype(o_ref.dtype)


def _proj_stats_kernel(a_ref, b_ref, y_ref, sum_ref, ssq_ref):
    # 1x1 projection matmul with fused per-channel partial BN statistics.
    y = jnp.dot(a_ref[...], b_ref[...], preferred_element_type=jnp.float32)
    y_ref[...] = y
    s = jnp.sum(y, axis=0, keepdims=True)        # (1, N)
    q = jnp.sum(y * y, axis=0, keepdims=True)    # (1, N)
    # Stats outputs are (1, 8, N) blocks (8-sublane aligned); broadcast the row.
    sum_ref[...] = jnp.broadcast_to(s[:, None, :], sum_ref.shape)
    ssq_ref[...] = jnp.broadcast_to(q[:, None, :], ssq_ref.shape)


def _bn_kernel(y_ref, s_ref, b_ref, o_ref):
    o_ref[...] = y_ref[...] * s_ref[...] + b_ref[...]


def _bn_res_kernel(y_ref, s_ref, b_ref, r_ref, o_ref):
    o_ref[...] = y_ref[...] * s_ref[...] + b_ref[...] + r_ref[...]


# ----------------------------- Pallas wrappers -------------------------------

def _pallas_matmul(a, b, *, target_tm=1024):
    """(M, K) @ (K, N) -> (M, N) f32, M tiled along a parallel grid axis."""
    m, k = a.shape
    _, n = b.shape
    tm = _choose_tm(m, target_tm)
    mp = _round_up(m, tm)
    if mp != m:
        a = jnp.pad(a, ((0, mp - m), (0, 0)))
    out = pl.pallas_call(
        _matmul_kernel,
        out_shape=jax.ShapeDtypeStruct((mp, n), jnp.float32),
        grid_spec=pltpu.PrefetchScalarGridSpec(
            num_scalar_prefetch=0,
            grid=(mp // tm,),
            in_specs=[pl.BlockSpec((tm, k), lambda i: (i, 0)),
                      pl.BlockSpec((k, n), lambda i: (0, 0))],
            out_specs=pl.BlockSpec((tm, n), lambda i: (i, 0))),
        compiler_params=_compiler_params(),
    )(a, b)
    return out[:m] if mp != m else out


def _pallas_depthwise(h_nhwc, w_dw, *, kernel, pad):
    """Depthwise kxk conv (stride 1) on a channel-last tensor.

    h_nhwc: (N, H, W, C) f32; w_dw: (k*k, C) f32.
    Returns (N, H+2p-k+1, W+2p-k+1, C) f32.  Channels ride the 128-lane axis;
    each grid step handles one image and accumulates k*k shifted VPU FMAs
    directly from the padded input block — no im2col slab.
    """
    n, hgt, wid, c = h_nhwc.shape
    hp, wp = hgt + 2 * pad, wid + 2 * pad
    ho, wo = hp - kernel + 1, wp - kernel + 1
    h_pad = jnp.pad(h_nhwc, ((0, 0), (pad, pad), (pad, pad), (0, 0)))

    def dw_kernel(x_ref, w_ref, o_ref):
        w_all = w_ref[...]                       # (k*k, C)
        o_ref[...] = jnp.zeros_like(o_ref)
        for di in range(kernel):
            for dj in range(kernel):
                o_ref[0] += (x_ref[0, di:di + ho, dj:dj + wo, :]
                             * w_all[di * kernel + dj])

    return pl.pallas_call(
        dw_kernel,
        out_shape=jax.ShapeDtypeStruct((n, ho, wo, c), jnp.float32),
        grid_spec=pltpu.PrefetchScalarGridSpec(
            num_scalar_prefetch=0,
            grid=(n,),
            in_specs=[pl.BlockSpec((1, hp, wp, c), lambda i: (i, 0, 0, 0)),
                      pl.BlockSpec((kernel * kernel, c), lambda i: (0, 0))],
            out_specs=pl.BlockSpec((1, ho, wo, c), lambda i: (i, 0, 0, 0))),
        compiler_params=_compiler_params(),
    )(h_pad, w_dw)


def _pallas_project_stats(a, b, *, target_tm=1024):
    """Projection matmul with fused per-channel sum / sum-of-squares.

    Returns (y_padded (Mp, N) f32, col_sum (N,), col_ssq (N,), tm, Mp).
    Zero-padded M rows contribute 0 to both sums, so the caller divides by the
    true row count.
    """
    m, k = a.shape
    _, n = b.shape
    tm = _choose_tm(m, target_tm)
    mp = _round_up(m, tm)
    if mp != m:
        a = jnp.pad(a, ((0, mp - m), (0, 0)))
    g = mp // tm
    y, sums, ssqs = pl.pallas_call(
        _proj_stats_kernel,
        out_shape=(jax.ShapeDtypeStruct((mp, n), jnp.float32),
                   jax.ShapeDtypeStruct((g, 8, n), jnp.float32),
                   jax.ShapeDtypeStruct((g, 8, n), jnp.float32)),
        grid_spec=pltpu.PrefetchScalarGridSpec(
            num_scalar_prefetch=0,
            grid=(g,),
            in_specs=[pl.BlockSpec((tm, k), lambda i: (i, 0)),
                      pl.BlockSpec((k, n), lambda i: (0, 0))],
            out_specs=(pl.BlockSpec((tm, n), lambda i: (i, 0)),
                       pl.BlockSpec((1, 8, n), lambda i: (i, 0, 0)),
                       pl.BlockSpec((1, 8, n), lambda i: (i, 0, 0)))),
        compiler_params=_compiler_params(),
    )(a, b)
    col_sum = jnp.sum(sums[:, 0, :], axis=0)
    col_ssq = jnp.sum(ssqs[:, 0, :], axis=0)
    return y, col_sum, col_ssq, tm, mp


def _pallas_bn_apply(y, scale, bias, res, *, tm):
    """Fused BN affine (+ optional residual add) on the (Mp, N) slab."""
    mp, n = y.shape
    g = mp // tm
    row_spec = pl.BlockSpec((tm, n), lambda i: (i, 0))
    vec_spec = pl.BlockSpec((1, n), lambda i: (0, 0))
    if res is not None:
        kern = _bn_res_kernel
        in_specs = [row_spec, vec_spec, vec_spec, row_spec]
        args = (y, scale, bias, res)
    else:
        kern = _bn_kernel
        in_specs = [row_spec, vec_spec, vec_spec]
        args = (y, scale, bias)
    return pl.pallas_call(
        kern,
        out_shape=jax.ShapeDtypeStruct((mp, n), jnp.float32),
        grid_spec=pltpu.PrefetchScalarGridSpec(
            num_scalar_prefetch=0,
            grid=(g,),
            in_specs=in_specs,
            out_specs=row_spec),
        compiler_params=_compiler_params(),
    )(*args)


# ----------------------------- forward pass ----------------------------------

@functools.partial(jax.jit, static_argnames=("kernel", "stride", "expand_ratio",
                                             "eps", "matmul_dtype"))
def inverted_residual_head(x, w_exp, w_dw, w_proj, gamma, beta, *,
                           kernel, stride, expand_ratio, eps=1e-5,
                           matmul_dtype=jnp.float32):
    """Forward pass of InvertedResidual_Head.

    x: (N, inp, H, W) f32 (NCHW, PyTorch layout).
    w_exp:  (hidden, inp, 1, 1) or None when expand_ratio == 1.
    w_dw:   (hidden, 1, k, k)   depthwise weights (groups == hidden).
    w_proj: (oup, hidden, 1, 1).
    gamma/beta: (oup,) BatchNorm affine params; BN uses training-mode batch
    statistics (biased variance), matching the freshly-constructed PyTorch
    module's default train() behaviour.
    matmul_dtype: set jnp.bfloat16 on v6e/v7x to halve matmul DMA volume
    (accumulation stays f32 via preferred_element_type).
    """
    assert stride in (1, 2)
    pad = 1 if kernel == 3 else 2
    n, inp, hgt, wid = x.shape
    oup = w_proj.shape[0]
    hidden = int(round(inp * expand_ratio))
    use_res = (stride == 1 and inp == oup)

    # Lane-dense channel padding (feedback: avoid masked vst / 6% MXU columns).
    oup_p = _round_up(oup, 128)
    hidden_p = _round_up(hidden, 128) if expand_ratio != 1 else hidden

    # NCHW -> NHWC once; all Pallas kernels run channel-last so channels ride
    # the 128-lane axis.
    x_nhwc = jnp.transpose(x, (0, 2, 3, 1))                     # (N, H, W, inp)
    x2d = x_nhwc.reshape(n * hgt * wid, inp)

    # ---- 1x1 expand conv (skipped when expand_ratio == 1) ------------------
    if expand_ratio != 1:
        w_exp_mat = jnp.pad(w_exp.reshape(hidden, inp).T,
                            ((0, 0), (0, hidden_p - hidden)))    # (inp, hidden_p)
        h2d = _pallas_matmul(x2d.astype(matmul_dtype),
                             w_exp_mat.astype(matmul_dtype))     # (M0, hidden_p) f32
        h_nhwc = h2d.reshape(n, hgt, wid, hidden_p)
    else:
        h_nhwc = x_nhwc.astype(jnp.float32)                      # hidden == inp

    # ---- depthwise kxk conv (VPU, no im2col) --------------------------------
    w_dw_mat = jnp.transpose(w_dw[:, 0], (1, 2, 0)).reshape(kernel * kernel, hidden)
    w_dw_mat = jnp.pad(w_dw_mat, ((0, 0), (0, hidden_p - hidden)))
    dw = _pallas_depthwise(h_nhwc, w_dw_mat, kernel=kernel, pad=pad)
    if stride > 1:
        # TODO(synk): fold the stride-2 subsampling into the depthwise kernel
        # (strided pl.ds) instead of this XLA slice.
        dw = dw[:, ::stride, ::stride, :]
    _, ho, wo, _ = dw.shape
    m1 = n * ho * wo
    dw2d = dw.reshape(m1, hidden_p)

    # ---- 1x1 project conv + fused BN partial statistics ---------------------
    w_proj_mat = jnp.pad(w_proj.reshape(oup, hidden).T,
                         ((0, hidden_p - hidden), (0, oup_p - oup)))  # (hidden_p, oup_p)
    y_pad, col_sum, col_ssq, tm, mp = _pallas_project_stats(
        dw2d.astype(matmul_dtype), w_proj_mat.astype(matmul_dtype))

    # ---- BatchNorm2d (training-mode batch stats) folded to scale/bias -------
    # Divide by the true row count m1: padded rows are zero and contribute 0.
    mean = col_sum / m1
    var = jnp.maximum(col_ssq / m1 - mean * mean, 0.0)  # guard f32 cancellation
    gamma_p = jnp.pad(gamma, (0, oup_p - oup))
    beta_p = jnp.pad(beta, (0, oup_p - oup))
    inv = gamma_p / jnp.sqrt(var + eps)
    scale = inv.reshape(1, oup_p)
    bias = (beta_p - mean * inv).reshape(1, oup_p)

    # ---- fused BN affine (+ residual add) ------------------------------------
    if use_res:
        res = jnp.pad(x2d, ((0, mp - m1), (0, oup_p - inp)))  # inp == oup here
        out2d = _pallas_bn_apply(y_pad, scale, bias, res, tm=tm)
    else:
        out2d = _pallas_bn_apply(y_pad, scale, bias, None, tm=tm)

    # Boundary layout plumbing back to NCHW (could be folded into the last
    # kernel's out_spec with an in-kernel transpose; kept in XLA for clarity).
    out = out2d[:m1, :oup].reshape(n, ho, wo, oup)
    return jnp.transpose(out, (0, 3, 1, 2))


# ------------------------------ reference ------------------------------------

def _reference(x, w_exp, w_dw, w_proj, gamma, beta, *, kernel, stride,
               expand_ratio, eps=1e-5):
    pad = 1 if kernel == 3 else 2
    inp = x.shape[1]
    oup = w_proj.shape[0]
    hidden = int(round(inp * expand_ratio))
    dn = ("NCHW", "OIHW", "NCHW")
    h = x
    if expand_ratio != 1:
        h = jax.lax.conv_general_dilated(h, w_exp, (1, 1), ((0, 0), (0, 0)),
                                         dimension_numbers=dn)
    h = jax.lax.conv_general_dilated(h, w_dw, (stride, stride),
                                     ((pad, pad), (pad, pad)),
                                     dimension_numbers=dn,
                                     feature_group_count=hidden)
    h = jax.lax.conv_general_dilated(h, w_proj, (1, 1), ((0, 0), (0, 0)),
                                     dimension_numbers=dn)
    mean = h.mean(axis=(0, 2, 3))
    var = h.var(axis=(0, 2, 3))
    h = (h - mean[None, :, None, None]) / jnp.sqrt(var + eps)[None, :, None, None]
    h = h * gamma[None, :, None, None] + beta[None, :, None, None]
    if stride == 1 and inp == oup:
        h = x + h
    return h


# -------------------------------- main ----------------------------------------

if __name__ == "__main__":
    key = jax.random.PRNGKey(0)
    ks = jax.random.split(key, 8)

    N, INP, H, W = 2, 4, 16, 16
    OUP, KERNEL, STRIDE, EXPAND = 4, 3, 1, 6          # residual branch active
    hidden = int(round(INP * EXPAND))                 # 24

    x = jax.random.normal(ks[0], (N, INP, H, W), dtype=jnp.float32)
    w_exp = 0.3 * jax.random.normal(ks[1], (hidden, INP, 1, 1), dtype=jnp.float32)
    w_dw = 0.3 * jax.random.normal(ks[2], (hidden, 1, KERNEL, KERNEL), dtype=jnp.float32)
    w_proj = 0.3 * jax.random.normal(ks[3], (OUP, hidden, 1, 1), dtype=jnp.float32)
    gamma = 1.0 + 0.1 * jax.random.normal(ks[4], (OUP,), dtype=jnp.float32)
    beta = 0.1 * jax.random.normal(ks[5], (OUP,), dtype=jnp.float32)

    # --- main config: expand_ratio=6, stride=1, residual, f32 matmuls --------
    out = inverted_residual_head(x, w_exp, w_dw, w_proj, gamma, beta,
                                 kernel=KERNEL, stride=STRIDE, expand_ratio=EXPAND)
    out = jax.block_until_ready(out)
    ref = _reference(x, w_exp, w_dw, w_proj, gamma, beta,
                     kernel=KERNEL, stride=STRIDE, expand_ratio=EXPAND)
    assert out.shape == (N, OUP, H, W), out.shape
    assert jnp.allclose(out, ref, atol=1e-3, rtol=1e-3), \
        float(jnp.max(jnp.abs(out - ref)))

    # --- bf16 matmul-operand path (v6e/v7x recommendation), looser tolerance --
    out_bf = inverted_residual_head(x, w_exp, w_dw, w_proj, gamma, beta,
                                    kernel=KERNEL, stride=STRIDE,
                                    expand_ratio=EXPAND,
                                    matmul_dtype=jnp.bfloat16)
    out_bf = jax.block_until_ready(out_bf)
    assert jnp.allclose(out_bf, ref, atol=0.25, rtol=0.25), \
        float(jnp.max(jnp.abs(out_bf - ref)))

    # --- expand_ratio == 1 branch (no expand conv), residual active ----------
    w_dw1 = 0.3 * jax.random.normal(ks[6], (INP, 1, KERNEL, KERNEL), dtype=jnp.float32)
    w_proj1 = 0.3 * jax.random.normal(ks[7], (OUP, INP, 1, 1), dtype=jnp.float32)
    out1 = inverted_residual_head(x, None, w_dw1, w_proj1, gamma, beta,
                                  kernel=KERNEL, stride=1, expand_ratio=1)
    out1 = jax.block_until_ready(out1)
    ref1 = _reference(x, None, w_dw1, w_proj1, gamma, beta,
                      kernel=KERNEL, stride=1, expand_ratio=1)
    assert jnp.allclose(out1, ref1, atol=1e-3, rtol=1e-3), \
        float(jnp.max(jnp.abs(out1 - ref1)))

    print("KERNEL_OK")
</pallas_src>

<mosaic_0001>
module attributes {stable_mosaic.version = 11 : i64} {
  func.func @_matmul_kernel(%arg0: i32, %arg1: memref<256x4xf32, #tpu.memory_space<vmem>>, %arg2: memref<4x128xf32, #tpu.memory_space<vmem>>, %arg3: memref<256x128xf32, #tpu.memory_space<vmem>>) attributes {dimension_semantics = [#tpu.dimension_semantics<parallel>], iteration_bounds = array<i64: 2>, scalar_prefetch = 0 : i64, scratch_operands = 0 : i64, tpu.core_type = #tpu.core_type<tc>, window_params = [{transform_indices = @transform_0, window_bounds = array<i64: 256, 4>}, {pipeline_mode = #tpu.pipeline_mode<synchronous>, transform_indices = @transform_1, window_bounds = array<i64: 4, 128>}, {transform_indices = @transform_2, window_bounds = array<i64: 256, 128>}]} {
    %c0 = arith.constant 0 : index
    %c0_0 = arith.constant 0 : index
    %0 = vector.load %arg1[%c0, %c0_0] : memref<256x4xf32, #tpu.memory_space<vmem>>, vector<256x4xf32>
    %c0_1 = arith.constant 0 : index
    %c0_2 = arith.constant 0 : index
    %1 = vector.load %arg2[%c0_1, %c0_2] : memref<4x128xf32, #tpu.memory_space<vmem>>, vector<4x128xf32>
    %cst = arith.constant dense<0.000000e+00> : vector<256x128xf32>
    %2 = tpu.matmul %0, %1, %cst {dimension_numbers = #tpu.dot_dimension_numbers<[1], [0], [0], [1], [0, 0, 1, 1], [], []>} : vector<256x4xf32>, vector<4x128xf32>, vector<256x128xf32> -> vector<256x128xf32>
    %c0_3 = arith.constant 0 : index
    %c0_4 = arith.constant 0 : index
    %3 = vector.load %arg3[%c0_3, %c0_4] : memref<256x128xf32, #tpu.memory_space<vmem>>, vector<256x128xf32>
    tpu.vector_store %arg3[%c0_3, %c0_4], %2 {strides = array<i32>} : memref<256x128xf32, #tpu.memory_space<vmem>>, vector<256x128xf32>,
    return
  }
  func.func @transform_0(%arg0: i32) -> (i32, i32) {
    %c0_i32 = arith.constant 0 : i32
    %c0_i32_0 = arith.constant 0 : i32
    return %arg0, %c0_i32 : i32, i32
  }
  func.func @transform_1(%arg0: i32) -> (i32, i32) {
    %c0_i32 = arith.constant 0 : i32
    %c0_i32_0 = arith.constant 0 : i32
    %c0_i32_1 = arith.constant 0 : i32
    return %c0_i32, %c0_i32_0 : i32, i32
  }
  func.func @transform_2(%arg0: i32) -> (i32, i32) {
    %c0_i32 = arith.constant 0 : i32
    %c0_i32_0 = arith.constant 0 : i32
    return %arg0, %c0_i32 : i32, i32
  }
}

module attributes {stable_mosaic.version = 11 : i64} {
  func.func @dw_kernel(%arg0: i32, %arg1: memref<1x18x18x128xf32, #tpu.memory_space<vmem>>, %arg2: memref<9x128xf32, #tpu.memory_space<vmem>>, %arg3: memref<1x16x16x128xf32, #tpu.memory_space<vmem>>) attributes {dimension_semantics = [#tpu.dimension_semantics<parallel>], iteration_bounds = array<i64: 2>, scalar_prefetch = 0 : i64, scratch_operands = 0 : i64, tpu.core_type = #tpu.core_type<tc>, window_params = [{transform_indices = @transform_0, window_bounds = array<i64: 1, 18, 18, 128>}, {pipeline_mode = #tpu.pipeline_mode<synchronous>, transform_indices = @transform_1, window_bounds = array<i64: 9, 128>}, {transform_indices = @transform_2, window_bounds = array<i64: 1, 16, 16, 128>}]} {
    %c0 = arith.constant 0 : index
    %c0_0 = arith.constant 0 : index
    %0 = vector.load %arg2[%c0, %c0_0] : memref<9x128xf32, #tpu.memory_space<vmem>>, vector<9x128xf32>
    %cst = arith.constant 0.000000e+00 : f32
    %1 = vector.broadcast %cst : f32 to vector<1x16x16x128xf32>
    %c0_1 = arith.constant 0 : index
    %c0_2 = arith.constant 0 : index
    %c0_3 = arith.constant 0 : index
    %c0_4 = arith.constant 0 : index
    %2 = vector.load %arg3[%c0_1, %c0_2, %c0_3, %c0_4] : memref<1x16x16x128xf32, #tpu.memory_space<vmem>>, vector<1x16x16x128xf32>
    tpu.vector_store %arg3[%c0_1, %c0_2, %c0_3, %c0_4], %1 {strides = array<i32>} : memref<1x16x16x128xf32, #tpu.memory_space<vmem>>, vector<1x16x16x128xf32>,
    %c0_5 = arith.constant 0 : index
    %c0_6 = arith.constant 0 : index
    %c0_7 = arith.constant 0 : index
    %c0_8 = arith.constant 0 : index
    %3 = vector.load %arg3[%c0_5, %c0_6, %c0_7, %c0_8] : memref<1x16x16x128xf32, #tpu.memory_space<vmem>>, vector<1x16x16x128xf32>
    %4 = vector.shape_cast %3 : vector<1x16x16x128xf32> to vector<16x16x128xf32>
    %c0_9 = arith.constant 0 : index
    %c0_10 = arith.constant 0 : index
    %c0_11 = arith.constant 0 : index
    %c0_12 = arith.constant 0 : index
    %5 = vector.load %arg1[%c0_9, %c0_10, %c0_11, %c0_12] : memref<1x18x18x128xf32, #tpu.memory_space<vmem>>, vector<1x16x16x128xf32>
    %6 = vector.shape_cast %5 : vector<1x16x16x128xf32> to vector<16x16x128xf32>
    %7 = vector.extract_strided_slice %0 {offsets = [0, 0], sizes = [1, 128], strides = [1, 1]} : vector<9x128xf32> to vector<1x128xf32>
    %8 = vector.shape_cast %7 : vector<1x128xf32> to vector<128xf32>
    %9 = vector.shape_cast %8 : vector<128xf32> to vector<1x1x128xf32>
    %10 = vector.broadcast %9 : vector<1x1x128xf32> to vector<16x16x128xf32>
    %11 = arith.mulf %6, %10 : vector<16x16x128xf32>
    %12 = arith.addf %4, %11 : vector<16x16x128xf32>
    %c0_13 = arith.constant 0 : index
    %c0_14 = arith.constant 0 : index
    %c0_15 = arith.constant 0 : index
    %c0_16 = arith.constant 0 : index
    %13 = vector.load %arg3[%c0_13, %c0_14, %c0_15, %c0_16] : memref<1x16x16x128xf32, #tpu.memory_space<vmem>>, vector<1x16x16x128xf32>
    %14 = vector.shape_cast %13 : vector<1x16x16x128xf32> to vector<16x16x128xf32>
    %15 = vector.shape_cast %12 : vector<16x16x128xf32> to vector<1x16x16x128xf32>
    tpu.vector_store %arg3[%c0_13, %c0_14, %c0_15, %c0_16], %15 {strides = array<i32>} : memref<1x16x16x128xf32, #tpu.memory_space<vmem>>, vector<1x16x16x128xf32>,
    %c0_17 = arith.constant 0 : index
    %c0_18 = arith.constant 0 : index
    %c0_19 = arith.constant 0 : index
    %c0_20 = arith.constant 0 : index
    %16 = vector.load %arg3[%c0_17, %c0_18, %c0_19, %c0_20] : memref<1x16x16x128xf32, #tpu.memory_space<vmem>>, vector<1x16x16x128xf32>
    %17 = vector.shape_cast %16 : vector<1x16x16x128xf32> to vector<16x16x128xf32>
    %c0_21 = arith.constant 0 : index
    %c0_22 = arith.constant 0 : index
    %c1 = arith.constant 1 : index
    %c0_23 = arith.constant 0 : index
    %18 = vector.load %arg1[%c0_21, %c0_22, %c1, %c0_23] : memref<1x18x18x128xf32, #tpu.memory_space<vmem>>, vector<1x16x16x128xf32>
    %19 = vector.shape_cast %18 : vector<1x16x16x128xf32> to vector<16x16x128xf32>
    %20 = vector.extract_strided_slice %0 {offsets = [1, 0], sizes = [1, 128], strides = [1, 1]} : vector<9x128xf32> to vector<1x128xf32>
    %21 = vector.shape_cast %20 : vector<1x128xf32> to vector<128xf32>
    %22 = vector.shape_cast %21 : vector<128xf32> to vector<1x1x128xf32>
    %23 = vector.broadcast %22 : vector<1x1x128xf32> to vector<16x16x128xf32>
    %24 = arith.mulf %19, %23 : vector<16x16x128xf32>
    %25 = arith.addf %17, %24 : vector<16x16x128xf32>
    %c0_24 = arith.constant 0 : index
    %c0_25 = arith.constant 0 : index
    %c0_26 = arith.constant 0 : index
    %c0_27 = arith.constant 0 : index
    %26 = vector.load %arg3[%c0_24, %c0_25, %c0_26, %c0_27] : memref<1x16x16x128xf32, #tpu.memory_space<vmem>>, vector<1x16x16x128xf32>
    %27 = vector.shape_cast %26 : vector<1x16x16x128xf32> to vector<16x16x128xf32>
    %28 = vector.shape_cast %25 : vector<16x16x128xf32> to vector<1x16x16x128xf32>
    tpu.vector_store %arg3[%c0_24, %c0_25, %c0_26, %c0_27], %28 {strides = array<i32>} : memref<1x16x16x128xf32, #tpu.memory_space<vmem>>, vector<1x16x16x128xf32>,
    %c0_28 = arith.constant 0 : index
    %c0_29 = arith.constant 0 : index
    %c0_30 = arith.constant 0 : index
    %c0_31 = arith.constant 0 : index
    %29 = vector.load %arg3[%c0_28, %c0_29, %c0_30, %c0_31] : memref<1x16x16x128xf32, #tpu.memory_space<vmem>>, vector<1x16x16x128xf32>
    %30 = vector.shape_cast %29 : vector<1x16x16x128xf32> to vector<16x16x128xf32>
    %c0_32 = arith.constant 0 : index
    %c0_33 = arith.constant 0 : index
    %c2 = arith.constant 2 : index
    %c0_34 = arith.constant 0 : index
    %31 = vector.load %arg1[%c0_32, %c0_33, %c2, %c0_34] : memref<1x18x18x128xf32, #tpu.memory_space<vmem>>, vector<1x16x16x128xf32>
    %32 = vector.shape_cast %31 : vector<1x16x16x128xf32> to vector<16x16x128xf32>
    %33 = vector.extract_strided_slice %0 {offsets = [2, 0], sizes = [1, 128], strides = [1, 1]} : vector<9x128xf32> to vector<1x128xf32>
    %34 = vector.shape_cast %33 : vector<1x128xf32> to vector<128xf32>
    %35 = vector.shape_cast %34 : vector<128xf32> to vector<1x1x128xf32>
    %36 = vector.broadcast %35 : vector<1x1x128xf32> to vector<16x16x128xf32>
    %37 = arith.mulf %32, %36 : vector<16x16x128xf32>
    %38 = arith.addf %30, %37 : vector<16x16x128xf32>
    %c0_35 = arith.constant 0 : index
    %c0_36 = arith.constant 0 : index
    %c0_37 = arith.constant 0 : index
    %c0_38 = arith.constant 0 : index
    %39 = vector.load %arg3[%c0_35, %c0_36, %c0_37, %c0_38] : memref<1x16x16x128xf32, #tpu.memory_space<vmem>>, vector<1x16x16x128xf32>
    %40 = vector.shape_cast %39 : vector<1x16x16x128xf32> to vector<16x16x128xf32>
    %41 = vector.shape_cast %38 : vector<16x16x128xf32> to vector<1x16x16x128xf32>
    tpu.vector_store %arg3[%c0_35, %c0_36, %c0_37, %c0_38], %41 {strides = array<i32>} : memref<1x16x16x128xf32, #tpu.memory_space<vmem>>, vector<1x16x16x128xf32>,
    %c0_39 = arith.constant 0 : index
    %c0_40 = arith.constant 0 : index
    %c0_41 = arith.constant 0 : index
    %c0_42 = arith.constant 0 : index
    %42 = vector.load %arg3[%c0_39, %c0_40, %c0_41, %c0_42] : memref<1x16x16x128xf32, #tpu.memory_space<vmem>>, vector<1x16x16x128xf32>
    %43 = vector.shape_cast %42 : vector<1x16x16x128xf32> to vector<16x16x128xf32>
    %c0_43 = arith.constant 0 : index
    %c1_44 = arith.constant 1 : index
    %c0_45 = arith.constant 0 : index
    %c0_46 = arith.constant 0 : index
    %44 = vector.load %arg1[%c0_43, %c1_44, %c0_45, %c0_46] : memref<1x18x18x128xf32, #tpu.memory_space<vmem>>, vector<1x16x16x128xf32>
    %45 = vector.shape_cast %44 : vector<1x16x16x128xf32> to vector<16x16x128xf32>
    %46 = vector.extract_strided_slice %0 {offsets = [3, 0], sizes = [1, 128], strides = [1, 1]} : vector<9x128xf32> to vector<1x128xf32>
    %47 = vector.shape_cast %46 : vector<1x128xf32> to vector<128xf32>
    %48 = vector.shape_cast %47 : vector<128xf32> to vector<1x1x128xf32>
    %49 = vector.broadcast %48 : vector<1x1x128xf32> to vector<16x16x128xf32>
    %50 = arith.mulf %45, %49 : vector<16x16x128xf32>
    %51 = arith.addf %43, %50 : vector<16x16x128xf32>
    %c0_47 = arith.constant 0 : index
    %c0_48 = arith.constant 0 : index
    %c0_49 = arith.constant 0 : index
    %c0_50 = arith.constant 0 : index
    %52 = vector.load %arg3[%c0_47, %c0_48, %c0_49, %c0_50] : memref<1x16x16x128xf32, #tpu.memory_space<vmem>>, vector<1x16x16x128xf32>
    %53 = vector.shape_cast %52 : vector<1x16x16x128xf32> to vector<16x16x128xf32>
    %54 = vector.shape_cast %51 : vector<16x16x128xf32> to vector<1x16x16x128xf32>
    tpu.vector_store %arg3[%c0_47, %c0_48, %c0_49, %c0_50], %54 {strides = array<i32>} : memref<1x16x16x128xf32, #tpu.memory_space<vmem>>, vector<1x16x16x128xf32>,
    %c0_51 = arith.constant 0 : index
    %c0_52 = arith.constant 0 : index
    %c0_53 = arith.constant 0 : index
    %c0_54 = arith.constant 0 : index
    %55 = vector.load %arg3[%c0_51, %c0_52, %c0_53, %c0_54] : memref<1x16x16x128xf32, #tpu.memory_space<vmem>>, vector<1x16x16x128xf32>
    %56 = vector.shape_cast %55 : vector<1x16x16x128xf32> to vector<16x16x128xf32>
    %c0_55 = arith.constant 0 : index
    %c1_56 = arith.constant 1 : index
    %c1_57 = arith.constant 1 : index
    %c0_58 = arith.constant 0 : index
    %57 = vector.load %arg1[%c0_55, %c1_56, %c1_57, %c0_58] : memref<1x18x18x128xf32, #tpu.memory_space<vmem>>, vector<1x16x16x128xf32>
    %58 = vector.shape_cast %57 : vector<1x16x16x128xf32> to vector<16x16x128xf32>
    %59 = vector.extract_strided_slice %0 {offsets = [4, 0], sizes = [1, 128], strides = [1, 1]} : vector<9x128xf32> to vector<1x128xf32>
    %60 = vector.shape_cast %59 : vector<1x128xf32> to vector<128xf32>
    %61 = vector.shape_cast %60 : vector<128xf32> to vector<1x1x128xf32>
    %62 = vector.broadcast %61 : vector<1x1x128xf32> to vector<16x16x128xf32>
    %63 = arith.mulf %58, %62 : vector<16x16x128xf32>
    %64 = arith.addf %56, %63 : vector<16x16x128xf32>
    %c0_59 = arith.constant 0 : index
    %c0_60 = arith.constant 0 : index
    %c0_61 = arith.constant 0 : index
    %c0_62 = arith.constant 0 : index
    %65 = vector.load %arg3[%c0_59, %c0_60, %c0_61, %c0_62] : memref<1x16x16x128xf32, #tpu.memory_space<vmem>>, vector<1x16x16x128xf32>
    %66 = vector.shape_cast %65 : vector<1x16x16x128xf32> to vector<16x16x128xf32>
    %67 = vector.shape_cast %64 : vector<16x16x128xf32> to vector<1x16x16x128xf32>
    tpu.vector_store %arg3[%c0_59, %c0_60, %c0_61, %c0_62], %67 {strides = array<i32>} : memref<1x16x16x128xf32, #tpu.memory_space<vmem>>, vector<1x16x16x128xf32>,
    %c0_63 = arith.constant 0 : index
    %c0_64 = arith.constant 0 : index
    %c0_65 = arith.constant 0 : index
    %c0_66 = arith.constant 0 : index
    %68 = vector.load %arg3[%c0_63, %c0_64, %c0_65, %c0_66] : memref<1x16x16x128xf32, #tpu.memory_space<vmem>>, vector<1x16x16x128xf32>
    %69 = vector.shape_cast %68 : vector<1x16x16x128xf32> to vector<16x16x128xf32>
    %c0_67 = arith.constant 0 : index
    %c1_68 = arith.constant 1 : index
    %c2_69 = arith.constant 2 : index
    %c0_70 = arith.constant 0 : index
    %70 = vector.load %arg1[%c0_67, %c1_68, %c2_69, %c0_70] : memref<1x18x18x128xf32, #tpu.memory_space<vmem>>, vector<1x16x16x128xf32>
    %71 = vector.shape_cast %70 : vector<1x16x16x128xf32> to vector<16x16x128xf32>
    %72 = vector.extract_strided_slice %0 {offsets = [5, 0], sizes = [1, 128], strides = [1, 1]} : vector<9x128xf32> to vector<1x128xf32>
    %73 = vector.shape_cast %72 : vector<1x128xf32> to vector<128xf32>
    %74 = vector.shape_cast %73 : vector<128xf32> to vector<1x1x128xf32>
    %75 = vector.broadcast %74 : vector<1x1x128xf32> to vector<16x16x128xf32>
    %76 = arith.mulf %71, %75 : vector<16x16x128xf32>
    %77 = arith.addf %69, %76 : vector<16x16x128xf32>
    %c0_71 = arith.constant 0 : index
    %c0_72 = arith.constant 0 : index
    %c0_73 = arith.constant 0 : index
    %c0_74 = arith.constant 0 : index
    %78 = vector.load %arg3[%c0_71, %c0_72, %c0_73, %c0_74] : memref<1x16x16x128xf32, #tpu.memory_space<vmem>>, vector<1x16x16x128xf32>
    %79 = vector.shape_cast %78 : vector<1x16x16x128xf32> to vector<16x16x128xf32>
    %80 = vector.shape_cast %77 : vector<16x16x128xf32> to vector<1x16x16x128xf32>
    tpu.vector_store %arg3[%c0_71, %c0_72, %c0_73, %c0_74], %80 {strides = array<i32>} : memref<1x16x16x128xf32, #tpu.memory_space<vmem>>, vector<1x16x16x128xf32>,
    %c0_75 = arith.constant 0 : index
    %c0_76 = arith.constant 0 : index
    %c0_77 = arith.constant 0 : index
    %c0_78 = arith.constant 0 : index
    %81 = vector.load %arg3[%c0_75, %c0_76, %c0_77, %c0_78] : memref<1x16x16x128xf32, #tpu.memory_space<vmem>>, vector<1x16x16x128xf32>
    %82 = vector.shape_cast %81 : vector<1x16x16x128xf32> to vector<16x16x128xf32>
    %c0_79 = arith.constant 0 : index
    %c2_80 = arith.constant 2 : index
    %c0_81 = arith.constant 0 : index
    %c0_82 = arith.constant 0 : index
    %83 = vector.load %arg1[%c0_79, %c2_80, %c0_81, %c0_82] : memref<1x18x18x128xf32, #tpu.memory_space<vmem>>, vector<1x16x16x128xf32>
    %84 = vector.shape_cast %83 : vector<1x16x16x128xf32> to vector<16x16x128xf32>
    %85 = vector.extract_strided_slice %0 {offsets = [6, 0], sizes = [1, 128], strides = [1, 1]} : vector<9x128xf32> to vector<1x128xf32>
    %86 = vector.shape_cast %85 : vector<1x128xf32> to vector<128xf32>
    %87 = vector.shape_cast %86 : vector<128xf32> to vector<1x1x128xf32>
    %88 = vector.broadcast %87 : vector<1x1x128xf32> to vector<16x16x128xf32>
    %89 = arith.mulf %84, %88 : vector<16x16x128xf32>
    %90 = arith.addf %82, %89 : vector<16x16x128xf32>
    %c0_83 = arith.constant 0 : index
    %c0_84 = arith.constant 0 : index
    %c0_85 = arith.constant 0 : index
    %c0_86 = arith.constant 0 : index
    %91 = vector.load %arg3[%c0_83, %c0_84, %c0_85, %c0_86] : memref<1x16x16x128xf32, #tpu.memory_space<vmem>>, vector<1x16x16x128xf32>
    %92 = vector.shape_cast %91 : vector<1x16x16x128xf32> to vector<16x16x128xf32>
    %93 = vector.shape_cast %90 : vector<16x16x128xf32> to vector<1x16x16x128xf32>
    tpu.vector_store %arg3[%c0_83, %c0_84, %c0_85, %c0_86], %93 {strides = array<i32>} : memref<1x16x16x128xf32, #tpu.memory_space<vmem>>, vector<1x16x16x128xf32>,
    %c0_87 = arith.constant 0 : index
    %c0_88 = arith.constant 0 : index
    %c0_89 = arith.constant 0 : index
    %c0_90 = arith.constant 0 : index
    %94 = vector.load %arg3[%c0_87, %c0_88, %c0_89, %c0_90] : memref<1x16x16x128xf32, #tpu.memory_space<vmem>>, vector<1x16x16x128xf32>
    %95 = vector.shape_cast %94 : vector<1x16x16x128xf32> to vector<16x16x128xf32>
    %c0_91 = arith.constant 0 : index
    %c2_92 = arith.constant 2 : index
    %c1_93 = arith.constant 1 : index
    %c0_94 = arith.constant 0 : index
    %96 = vector.load %arg1[%c0_91, %c2_92, %c1_93, %c0_94] : memref<1x18x18x128xf32, #tpu.memory_space<vmem>>, vector<1x16x16x128xf32>
    %97 = vector.shape_cast %96 : vector<1x16x16x128xf32> to vector<16x16x128xf32>
    %98 = vector.extract_strided_slice %0 {offsets = [7, 0], sizes = [1, 128], strides = [1, 1]} : vector<9x128xf32> to vector<1x128xf32>
    %99 = vector.shape_cast %98 : vector<1x128xf32> to vector<128xf32>
    %100 = vector.shape_cast %99 : vector<128xf32> to vector<1x1x128xf32>
    %101 = vector.broadcast %100 : vector<1x1x128xf32> to vector<16x16x128xf32>
    %102 = arith.mulf %97, %101 : vector<16x16x128xf32>
    %103 = arith.addf %95, %102 : vector<16x16x128xf32>
    %c0_95 = arith.constant 0 : index
    %c0_96 = arith.constant 0 : index
    %c0_97 = arith.constant 0 : index
    %c0_98 = arith.constant 0 : index
    %104 = vector.load %arg3[%c0_95, %c0_96, %c0_97, %c0_98] : memref<1x16x16x128xf32, #tpu.memory_space<vmem>>, vector<1x16x16x128xf32>
    %105 = vector.shape_cast %104 : vector<1x16x16x128xf32> to vector<16x16x128xf32>
    %106 = vector.shape_cast %103 : vector<16x16x128xf32> to vector<1x16x16x128xf32>
    tpu.vector_store %arg3[%c0_95, %c0_96, %c0_97, %c0_98], %106 {strides = array<i32>} : memref<1x16x16x128xf32, #tpu.memory_space<vmem>>, vector<1x16x16x128xf32>,
    %c0_99 = arith.constant 0 : index
    %c0_100 = arith.constant 0 : index
    %c0_101 = arith.constant 0 : index
    %c0_102 = arith.constant 0 : index
    %107 = vector.load %arg3[%c0_99, %c0_100, %c0_101, %c0_102] : memref<1x16x16x128xf32, #tpu.memory_space<vmem>>, vector<1x16x16x128xf32>
    %108 = vector.shape_cast %107 : vector<1x16x16x128xf32> to vector<16x16x128xf32>
    %c0_103 = arith.constant 0 : index
    %c2_104 = arith.constant 2 : index
    %c2_105 = arith.constant 2 : index
    %c0_106 = arith.constant 0 : index
    %109 = vector.load %arg1[%c0_103, %c2_104, %c2_105, %c0_106] : memref<1x18x18x128xf32, #tpu.memory_space<vmem>>, vector<1x16x16x128xf32>
    %110 = vector.shape_cast %109 : vector<1x16x16x128xf32> to vector<16x16x128xf32>
    %111 = vector.extract_strided_slice %0 {offsets = [8, 0], sizes = [1, 128], strides = [1, 1]} : vector<9x128xf32> to vector<1x128xf32>
    %112 = vector.shape_cast %111 : vector<1x128xf32> to vector<128xf32>
    %113 = vector.shape_cast %112 : vector<128xf32> to vector<1x1x128xf32>
    %114 = vector.broadcast %113 : vector<1x1x128xf32> to vector<16x16x128xf32>
    %115 = arith.mulf %110, %114 : vector<16x16x128xf32>
    %116 = arith.addf %108, %115 : vector<16x16x128xf32>
    %c0_107 = arith.constant 0 : index
    %c0_108 = arith.constant 0 : index
    %c0_109 = arith.constant 0 : index
    %c0_110 = arith.constant 0 : index
    %117 = vector.load %arg3[%c0_107, %c0_108, %c0_109, %c0_110] : memref<1x16x16x128xf32, #tpu.memory_space<vmem>>, vector<1x16x16x128xf32>
    %118 = vector.shape_cast %117 : vector<1x16x16x128xf32> to vector<16x16x128xf32>
    %119 = vector.shape_cast %116 : vector<16x16x128xf32> to vector<1x16x16x128xf32>
    tpu.vector_store %arg3[%c0_107, %c0_108, %c0_109, %c0_110], %119 {strides = array<i32>} : memref<1x16x16x128xf32, #tpu.memory_space<vmem>>, vector<1x16x16x128xf32>,
    return
  }
  func.func @transform_0(%arg0: i32) -> (i32, i32, i32, i32) {
    %c0_i32 = arith.constant 0 : i32
    %c0_i32_0 = arith.constant 0 : i32
    %c0_i32_1 = arith.constant 0 : i32
    %c0_i32_2 = arith.constant 0 : i32
    return %arg0, %c0_i32, %c0_i32_0, %c0_i32_1 : i32, i32, i32, i32
  }
  func.func @transform_1(%arg0: i32) -> (i32, i32) {
    %c0_i32 = arith.constant 0 : i32
    %c0_i32_0 = arith.constant 0 : i32
    %c0_i32_1 = arith.constant 0 : i32
    return %c0_i32, %c0_i32_0 : i32, i32
  }
  func.func @transform_2(%arg0: i32) -> (i32, i32, i32, i32) {
    %c0_i32 = arith.constant 0 : i32
    %c0_i32_0 = arith.constant 0 : i32
    %c0_i32_1 = arith.constant 0 : i32
    %c0_i32_2 = arith.constant 0 : i32
    return %arg0, %c0_i32, %c0_i32_0, %c0_i32_1 : i32, i32, i32, i32
  }
}

module attributes {stable_mosaic.version = 11 : i64} {
  func.func @_proj_stats_kernel(%arg0: i32, %arg1: memref<256x128xf32, #tpu.memory_space<vmem>>, %arg2: memref<128x128xf32, #tpu.memory_space<vmem>>, %arg3: memref<256x128xf32, #tpu.memory_space<vmem>>, %arg4: memref<1x8x128xf32, #tpu.memory_space<vmem>>, %arg5: memref<1x8x128xf32, #tpu.memory_space<vmem>>) attributes {dimension_semantics = [#tpu.dimension_semantics<parallel>], iteration_bounds = array<i64: 2>, scalar_prefetch = 0 : i64, scratch_operands = 0 : i64, tpu.core_type = #tpu.core_type<tc>, window_params = [{transform_indices = @transform_0, window_bounds = array<i64: 256, 128>}, {pipeline_mode = #tpu.pipeline_mode<synchronous>, transform_indices = @transform_1, window_bounds = array<i64: 128, 128>}, {transform_indices = @transform_2, window_bounds = array<i64: 256, 128>}, {transform_indices = @transform_3, window_bounds = array<i64: 1, 8, 128>}, {transform_indices = @transform_4, window_bounds = array<i64: 1, 8, 128>}]} {
    %c0 = arith.constant 0 : index
    %c0_0 = arith.constant 0 : index
    %0 = vector.load %arg1[%c0, %c0_0] : memref<256x128xf32, #tpu.memory_space<vmem>>, vector<256x128xf32>
    %c0_1 = arith.constant 0 : index
    %c0_2 = arith.constant 0 : index
    %1 = vector.load %arg2[%c0_1, %c0_2] : memref<128x128xf32, #tpu.memory_space<vmem>>, vector<128x128xf32>
    %cst = arith.constant dense<0.000000e+00> : vector<256x128xf32>
    %2 = tpu.matmul %0, %1, %cst {dimension_numbers = #tpu.dot_dimension_numbers<[1], [0], [0], [1], [0, 0, 1, 1], [], []>} : vector<256x128xf32>, vector<128x128xf32>, vector<256x128xf32> -> vector<256x128xf32>
    %c0_3 = arith.constant 0 : index
    %c0_4 = arith.constant 0 : index
    %3 = vector.load %arg3[%c0_3, %c0_4] : memref<256x128xf32, #tpu.memory_space<vmem>>, vector<256x128xf32>
    tpu.vector_store %arg3[%c0_3, %c0_4], %2 {strides = array<i32>} : memref<256x128xf32, #tpu.memory_space<vmem>>, vector<256x128xf32>,
    %cst_5 = arith.constant dense<0.000000e+00> : vector<128xf32>
    %4 = vector.multi_reduction <add>, %2, %cst_5 [0] : vector<256x128xf32> to vector<128xf32>
    %5 = vector.shape_cast %4 : vector<128xf32> to vector<1x128xf32>
    %6 = arith.mulf %2, %2 : vector<256x128xf32>
    %cst_6 = arith.constant dense<0.000000e+00> : vector<128xf32>
    %7 = vector.multi_reduction <add>, %6, %cst_6 [0] : vector<256x128xf32> to vector<128xf32>
    %8 = vector.shape_cast %7 : vector<128xf32> to vector<1x128xf32>
    %9 = vector.shape_cast %5 : vector<1x128xf32> to vector<1x1x128xf32>
    %10 = vector.shape_cast %9 : vector<1x1x128xf32> to vector<1x1x128xf32>
    %11 = vector.broadcast %10 : vector<1x1x128xf32> to vector<1x8x128xf32>
    %c0_7 = arith.constant 0 : index
    %c0_8 = arith.constant 0 : index
    %c0_9 = arith.constant 0 : index
    %12 = vector.load %arg4[%c0_7, %c0_8, %c0_9] : memref<1x8x128xf32, #tpu.memory_space<vmem>>, vector<1x8x128xf32>
    tpu.vector_store %arg4[%c0_7, %c0_8, %c0_9], %11 {strides = array<i32>} : memref<1x8x128xf32, #tpu.memory_space<vmem>>, vector<1x8x128xf32>,
    %13 = vector.shape_cast %8 : vector<1x128xf32> to vector<1x1x128xf32>
    %14 = vector.shape_cast %13 : vector<1x1x128xf32> to vector<1x1x128xf32>
    %15 = vector.broadcast %14 : vector<1x1x128xf32> to vector<1x8x128xf32>
    %c0_10 = arith.constant 0 : index
    %c0_11 = arith.constant 0 : index
    %c0_12 = arith.constant 0 : index
    %16 = vector.load %arg5[%c0_10, %c0_11, %c0_12] : memref<1x8x128xf32, #tpu.memory_space<vmem>>, vector<1x8x128xf32>
    tpu.vector_store %arg5[%c0_10, %c0_11, %c0_12], %15 {strides = array<i32>} : memref<1x8x128xf32, #tpu.memory_space<vmem>>, vector<1x8x128xf32>,
    return
  }
  func.func @transform_0(%arg0: i32) -> (i32, i32) {
    %c0_i32 = arith.constant 0 : i32
    %c0_i32_0 = arith.constant 0 : i32
    return %arg0, %c0_i32 : i32, i32
  }
  func.func @transform_1(%arg0: i32) -> (i32, i32) {
    %c0_i32 = arith.constant 0 : i32
    %c0_i32_0 = arith.constant 0 : i32
    %c0_i32_1 = arith.constant 0 : i32
    return %c0_i32, %c0_i32_0 : i32, i32
  }
  func.func @transform_2(%arg0: i32) -> (i32, i32) {
    %c0_i32 = arith.constant 0 : i32
    %c0_i32_0 = arith.constant 0 : i32
    return %arg0, %c0_i32 : i32, i32
  }
  func.func @transform_3(%arg0: i32) -> (i32, i32, i32) {
    %c0_i32 = arith.constant 0 : i32
    %c0_i32_0 = arith.constant 0 : i32
    %c0_i32_1 = arith.constant 0 : i32
    return %arg0, %c0_i32, %c0_i32_0 : i32, i32, i32
  }
  func.func @transform_4(%arg0: i32) -> (i32, i32, i32) {
    %c0_i32 = arith.constant 0 : i32
    %c0_i32_0 = arith.constant 0 : i32
    %c0_i32_1 = arith.constant 0 : i32
    return %arg0, %c0_i32, %c0_i32_0 : i32, i32, i32
  }
}

module attributes {stable_mosaic.version = 11 : i64} {
  func.func @_bn_res_kernel(%arg0: i32, %arg1: memref<256x128xf32, #tpu.memory_space<vmem>>, %arg2: memref<1x128xf32, #tpu.memory_space<vmem>>, %arg3: memref<1x128xf32, #tpu.memory_space<vmem>>, %arg4: memref<256x128xf32, #tpu.memory_space<vmem>>, %arg5: memref<256x128xf32, #tpu.memory_space<vmem>>) attributes {dimension_semantics = [#tpu.dimension_semantics<parallel>], iteration_bounds = array<i64: 2>, scalar_prefetch = 0 : i64, scratch_operands = 0 : i64, tpu.core_type = #tpu.core_type<tc>, window_params = [{transform_indices = @transform_0, window_bounds = array<i64: 256, 128>}, {pipeline_mode = #tpu.pipeline_mode<synchronous>, transform_indices = @transform_1, window_bounds = array<i64: 1, 128>}, {pipeline_mode = #tpu.pipeline_mode<synchronous>, transform_indices = @transform_2, window_bounds = array<i64: 1, 128>}, {transform_indices = @transform_3, window_bounds = array<i64: 256, 128>}, {transform_indices = @transform_4, window_bounds = array<i64: 256, 128>}]} {
    %c0 = arith.constant 0 : index
    %c0_0 = arith.constant 0 : index
    %0 = vector.load %arg1[%c0, %c0_0] : memref<256x128xf32, #tpu.memory_space<vmem>>, vector<256x128xf32>
    %c0_1 = arith.constant 0 : index
    %c0_2 = arith.constant 0 : index
    %1 = vector.load %arg2[%c0_1, %c0_2] : memref<1x128xf32, #tpu.memory_space<vmem>>, vector<1x128xf32>
    %2 = vector.broadcast %1 : vector<1x128xf32> to vector<256x128xf32>
    %3 = arith.mulf %0, %2 : vector<256x128xf32>
    %c0_3 = arith.constant 0 : index
    %c0_4 = arith.constant 0 : index
    %4 = vector.load %arg3[%c0_3, %c0_4] : memref<1x128xf32, #tpu.memory_space<vmem>>, vector<1x128xf32>
    %5 = vector.broadcast %4 : vector<1x128xf32> to vector<256x128xf32>
    %6 = arith.addf %3, %5 : vector<256x128xf32>
    %c0_5 = arith.constant 0 : index
    %c0_6 = arith.constant 0 : index
    %7 = vector.load %arg4[%c0_5, %c0_6] : memref<256x128xf32, #tpu.memory_space<vmem>>, vector<256x128xf32>
    %8 = arith.addf %6, %7 : vector<256x128xf32>
    %c0_7 = arith.constant 0 : index
    %c0_8 = arith.constant 0 : index
    %9 = vector.load %arg5[%c0_7, %c0_8] : memref<256x128xf32, #tpu.memory_space<vmem>>, vector<256x128xf32>
    tpu.vector_store %arg5[%c0_7, %c0_8], %8 {strides = array<i32>} : memref<256x128xf32, #tpu.memory_space<vmem>>, vector<256x128xf32>,
    return
  }
  func.func @transform_0(%arg0: i32) -> (i32, i32) {
    %c0_i32 = arith.constant 0 : i32
    %c0_i32_0 = arith.constant 0 : i32
    return %arg0, %c0_i32 : i32, i32
  }
  func.func @transform_1(%arg0: i32) -> (i32, i32) {
    %c0_i32 = arith.constant 0 : i32
    %c0_i32_0 = arith.constant 0 : i32
    %c0_i32_1 = arith.constant 0 : i32
    return %c0_i32, %c0_i32_0 : i32, i32
  }
  func.func @transform_2(%arg0: i32) -> (i32, i32) {
    %c0_i32 = arith.constant 0 : i32
    %c0_i32_0 = arith.constant 0 : i32
    %c0_i32_1 = arith.constant 0 : i32
    return %c0_i32, %c0_i32_0 : i32, i32
  }
  func.func @transform_3(%arg0: i32) -> (i32, i32) {
    %c0_i32 = arith.constant 0 : i32
    %c0_i32_0 = arith.constant 0 : i32
    return %arg0, %c0_i32 : i32, i32
  }
  func.func @transform_4(%arg0: i32) -> (i32, i32) {
    %c0_i32 = arith.constant 0 : i32
    %c0_i32_0 = arith.constant 0 : i32
    return %arg0, %c0_i32 : i32, i32
  }
}

</mosaic_0001>

<bundles_post_ra>
// kernel: inverted_residual_head.4
= control target key start
LH: loop header
LB: loop body
LE: loop exit
PB: predicated region body
PF: predicated region fallthrough
CT: control target
= control target key end

     0   :  { %s560_s9 = smov 0   ;;  %s687_s0 = inlined_call_operand.vmem [shape: f32[512,4], index: 0, kind: input, shape index: {}]   ;;  %s688_s1 = inlined_call_operand.vmem [shape: f32[4,128], index: 1, kind: input, shape index: {}]   ;;  %s689_s2 = inlined_call_operand.vmem [shape: f32[512,128], index: 2, kind: output, shape index: {}]  }
   0x1 LB: > { %s482_s10 = sadd.s32 4294967295, %s543_s9   ;;  %p486_p0 = scmp.ge.s32.totalorder %s543_s9, 1  ;;  %s543_s9 = sphi %s560_s9, %s12_s9  }
   0x2   : > { %p113_p1 = scmp.lt.s32.totalorder %s543_s9, 3 }
   0x4   : > { %p114_p2 = pnand %p486_p0, %p113_p1 }
   0x5   : > { %s487_s13 = sshll.u32 (!%p114_p2), %s482_s10, 5 }
   0x6   : > { %117 = sbr.rel (%p114_p2) target bundleno = 205 (0xcd), region = 28  ;;  %p136_p3 = scmp.lt.s32.totalorder (!%p114_p2), %s487_s13, 63 }
   0xb   : > { %v179_v0 = vld [vmem:[%s688_s1] sm:$0xf]  ;;  %vm277_vm0 = vcmask 1043456   ;;  %s691_s13 = smov (!%p136_p3, %s487_s13), 63  ;;  %vm180_vm1 = vcmask 31744  }
   0xc   : > { %527 = vmatpush.msk.msra.mxu2 %vm277_vm0, %v179_v0  ;;  %528 = vmatpush.msk.msra.mxu3 %vm277_vm0, %v179_v0  ;;  %s488_s14 = sshll.u32 %s691_s13, 3 }
   0xd   : > { %491 = vmatpush.msk.msra.mxu0 %vm277_vm0, %v179_v0  ;;  %526 = vmatpush.msk.msra.mxu1 %vm277_vm0, %v179_v0  ;;  %s579_s17 = scalar_lea.vmem %s687_s0, %s488_s14  ;;  %s650_s20 = scalar_lea.vmem %s689_s2, %s488_s14 }
   0xe   : > { %v163_v1 = vld [vmem:[%s579_s17 + $0x80] sm:$0xff]  ;;  %v164_v5 = vld [vmem:[%s579_s17 + $0x88] sm:$0xff]  ;;  %v165_v9 = vld [vmem:[%s579_s17 + $0x90] sm:$0xff] }
   0xf   : > { %v171_v2 = vld [vmem:[%s579_s17 + $0xc0] sm:$0xff]  ;;  %508 = vmatmul.msk.f32.vlgmr.msra.gmra.mxu2 %vm180_vm1, %v163_v1  ;;  %v172_v6 = vld [vmem:[%s579_s17 + $0xc8] sm:$0xff]  ;;  %v173_v10 = vld [vmem:[%s579_s17 + $0xd0] sm:$0xff] }
  0x10   : > { %v147_v3 = vld [vmem:[%s579_s17] sm:$0xff]  ;;  %516 = vmatmul.msk.f32.vlgmr.msra.gmra.mxu3 %vm180_vm1, %v171_v2  ;;  %v148_v7 = vld [vmem:[%s579_s17 + $0x8] sm:$0xff]  ;;  %v149_v11 = vld [vmem:[%s579_s17 + $0x10] sm:$0xff] }
  0x11   : > { %v155_v4 = vld [vmem:[%s579_s17 + $0x40] sm:$0xff]  ;;  %492 = vmatmul.msk.f32.vlgmr.msra.gmra.mxu0 %vm180_vm1, %v147_v3  ;;  %v156_v8 = vld [vmem:[%s579_s17 + $0x48] sm:$0xff]  ;;  %v157_v12 = vld [vmem:[%s579_s17 + $0x50] sm:$0xff] }
  0x12   : > { %500 = vmatmul.msk.f32.vlgmr.msra.gmra.mxu1 %vm180_vm1, %v155_v4  ;;  %v166_v13 = vld [vmem:[%s579_s17 + $0x98] sm:$0xff]  ;;  %v167_v17 = vld [vmem:[%s579_s17 + $0xa0] sm:$0xff]  ;;  %v168_v21 = vld [vmem:[%s579_s17 + $0xa8] sm:$0xff] }
  0x13   : > { %v174_v14 = vld [vmem:[%s579_s17 + $0xd8] sm:$0xff]  ;;  %v175_v18 = vld [vmem:[%s579_s17 + $0xe0] sm:$0xff]  ;;  %v176_v22 = vld [vmem:[%s579_s17 + $0xe8] sm:$0xff] }
  0x14   : > { %v150_v15 = vld [vmem:[%s579_s17 + $0x18] sm:$0xff]  ;;  %v151_v19 = vld [vmem:[%s579_s17 + $0x20] sm:$0xff]  ;;  %v152_v23 = vld [vmem:[%s579_s17 + $0x28] sm:$0xff] }
  0x15   : > { %v158_v16 = vld [vmem:[%s579_s17 + $0x58] sm:$0xff]  ;;  %v159_v20 = vld [vmem:[%s579_s17 + $0x60] sm:$0xff]  ;;  %v160_v24 = vld [vmem:[%s579_s17 + $0x68] sm:$0xff] }
  0x16   : > { %v169_v25 = vld [vmem:[%s579_s17 + $0xb0] sm:$0xff]  ;;  %v170_v29 = vld [vmem:[%s579_s17 + $0xb8] sm:$0xff] }
  0x17   : > { %509 = vmatmul.msk.f32.gmra.mxu2 %vm180_vm1, %v164_v5  ;;  %v177_v26 = vld [vmem:[%s579_s17 + $0xf0] sm:$0xff]  ;;  %v178_v30 = vld [vmem:[%s579_s17 + $0xf8] sm:$0xff] }
  0x18   : > { %517 = vmatmul.msk.f32.gmra.mxu3 %vm180_vm1, %v172_v6  ;;  %v153_v27 = vld [vmem:[%s579_s17 + $0x30] sm:$0xff]  ;;  %v154_v31 = vld [vmem:[%s579_s17 + $0x38] sm:$0xff] }
  0x19   : > { %493 = vmatmul.msk.f32.gmra.mxu0 %vm180_vm1, %v148_v7  ;;  %v161_v28 = vld [vmem:[%s579_s17 + $0x70] sm:$0xff]  ;;  %v162_v32 = vld [vmem:[%s579_s17 + $0x78] sm:$0xff] }
  0x1a   : > { %501 = vmatmul.msk.f32.gmra.mxu1 %vm180_vm1, %v156_v8 }
  0x1f   : > { %510 = vmatmul.msk.f32.gmra.mxu2 %vm180_vm1, %v165_v9 }
  0x20   : > { %518 = vmatmul.msk.f32.gmra.mxu3 %vm180_vm1, %v173_v10 }
  0x21   : > { %494 = vmatmul.msk.f32.gmra.mxu0 %vm180_vm1, %v149_v11 }
  0x22   : > { %502 = vmatmul.msk.f32.gmra.mxu1 %vm180_vm1, %v157_v12 }
  0x27   : > { %511 = vmatmul.msk.f32.gmra.mxu2 %vm180_vm1, %v166_v13 }
  0x28   : > { %519 = vmatmul.msk.f32.gmra.mxu3 %vm180_vm1, %v174_v14 }
  0x29   : > { %495 = vmatmul.msk.f32.gmra.mxu0 %vm180_vm1, %v150_v15 }
  0x2a   : > { %503 = vmatmul.msk.f32.gmra.mxu1 %vm180_vm1, %v158_v16 }
  0x2f   : > { %512 = vmatmul.msk.f32.gmra.mxu2 %vm180_vm1, %v167_v17 }
  0x30   : > { %520 = vmatmul.msk.f32.gmra.mxu3 %vm180_vm1, %v175_v18 }
  0x31   : > { %496 = vmatmul.msk.f32.gmra.mxu0 %vm180_vm1, %v151_v19 }
  0x32   : > { %504 = vmatmul.msk.f32.gmra.mxu1 %vm180_vm1, %v159_v20 }
  0x37   : > { %513 = vmatmul.msk.f32.gmra.mxu2 %vm180_vm1, %v168_v21 }
  0x38   : > { %521 = vmatmul.msk.f32.gmra.mxu3 %vm180_vm1, %v176_v22 }
  0x39   : > { %497 = vmatmul.msk.f32.gmra.mxu0 %vm180_vm1, %v152_v23 }
  0x3a   : > { %505 = vmatmul.msk.f32.gmra.mxu1 %vm180_vm1, %v160_v24 }
  0x3f   : > { %514 = vmatmul.msk.f32.gmra.mxu2 %vm180_vm1, %v169_v25 }
  0x40   : > { %522 = vmatmul.msk.f32.gmra.mxu3 %vm180_vm1, %v177_v26 }
  0x41   : > { %498 = vmatmul.msk.f32.gmra.mxu0 %vm180_vm1, %v153_v27 }
  0x42   : > { %506 = vmatmul.msk.f32.gmra.mxu1 %vm180_vm1, %v161_v28 }
  0x47   : > { %515 = vmatmul.msk.f32.gmra.mxu2 %vm180_vm1, %v170_v29 }
  0x48   : > { %523 = vmatmul.msk.f32.gmra.mxu3 %vm180_vm1, %v178_v30 }
  0x49   : > { %499 = vmatmul.msk.f32.gmra.mxu0 %vm180_vm1, %v154_v31 }
  0x4a   : > { %507 = vmatmul.msk.f32.gmra.mxu1 %vm180_vm1, %v162_v32 }
  0x8e   : > { %v298_v33 = vpop.f32.mrf.mxu0 }
  0x8f   : > { %v322_v34 = vpop.f32.mrf.mxu1  ;;  %394 = vst [vmem:[%s650_s20] sm:$0xff] %v298_v33 }
  0x90   : > { %402 = vst [vmem:[%s650_s20 + $0x40] sm:$0xff] %v322_v34 }
  0x92   : > { %v346_v35 = vpop.f32.mrf.mxu2 }
  0x93   : > { %v370_v36 = vpop.f32.mrf.mxu3  ;;  %410 = vst [vmem:[%s650_s20 + $0x80] sm:$0xff] %v346_v35 }
  0x94   : > { %418 = vst [vmem:[%s650_s20 + $0xc0] sm:$0xff] %v370_v36 }
  0x96   : > { %v301_v37 = vpop.f32.mrf.mxu0 }
  0x97   : > { %v325_v38 = vpop.f32.mrf.mxu1  ;;  %395 = vst [vmem:[%s650_s20 + $0x8] sm:$0xff] %v301_v37 }
  0x98   : > { %403 = vst [vmem:[%s650_s20 + $0x48] sm:$0xff] %v325_v38 }
  0x9a   : > { %v349_v39 = vpop.f32.mrf.mxu2 }
  0x9b   : > { %v373_v40 = vpop.f32.mrf.mxu3  ;;  %411 = vst [vmem:[%s650_s20 + $0x88] sm:$0xff] %v349_v39 }
  0x9c   : > { %419 = vst [vmem:[%s650_s20 + $0xc8] sm:$0xff] %v373_v40 }
  0x9e   : > { %v304_v41 = vpop.f32.mrf.mxu0 }
  0x9f   : > { %v328_v42 = vpop.f32.mrf.mxu1  ;;  %396 = vst [vmem:[%s650_s20 + $0x10] sm:$0xff] %v304_v41 }
  0xa0   : > { %404 = vst [vmem:[%s650_s20 + $0x50] sm:$0xff] %v328_v42 }
  0xa2   : > { %v352_v43 = vpop.f32.mrf.mxu2 }
  0xa3   : > { %v376_v44 = vpop.f32.mrf.mxu3  ;;  %412 = vst [vmem:[%s650_s20 + $0x90] sm:$0xff] %v352_v43 }
  0xa4   : > { %420 = vst [vmem:[%s650_s20 + $0xd0] sm:$0xff] %v376_v44 }
  0xa6   : > { %v307_v45 = vpop.f32.mrf.mxu0 }
  0xa7   : > { %v331_v46 = vpop.f32.mrf.mxu1  ;;  %397 = vst [vmem:[%s650_s20 + $0x18] sm:$0xff] %v307_v45 }
  0xa8   : > { %405 = vst [vmem:[%s650_s20 + $0x58] sm:$0xff] %v331_v46 }
  0xaa   : > { %v355_v47 = vpop.f32.mrf.mxu2 }
  0xab   : > { %v379_v48 = vpop.f32.mrf.mxu3  ;;  %413 = vst [vmem:[%s650_s20 + $0x98] sm:$0xff] %v355_v47 }
  0xac   : > { %421 = vst [vmem:[%s650_s20 + $0xd8] sm:$0xff] %v379_v48 }
  0xae   : > { %v310_v49 = vpop.f32.mrf.mxu0 }
  0xaf   : > { %v334_v50 = vpop.f32.mrf.mxu1  ;;  %398 = vst [vmem:[%s650_s20 + $0x20] sm:$0xff] %v310_v49 }
  0xb0   : > { %406 = vst [vmem:[%s650_s20 + $0x60] sm:$0xff] %v334_v50 }
  0xb2   : > { %v358_v51 = vpop.f32.mrf.mxu2 }
  0xb3   : > { %v382_v52 = vpop.f32.mrf.mxu3  ;;  %414 = vst [vmem:[%s650_s20 + $0xa0] sm:$0xff] %v358_v51 }
  0xb4   : > { %422 = vst [vmem:[%s650_s20 + $0xe0] sm:$0xff] %v382_v52 }
  0xb6   : > { %v313_v53 = vpop.f32.mrf.mxu0 }
  0xb7   : > { %v337_v54 = vpop.f32.mrf.mxu1  ;;  %399 = vst [vmem:[%s650_s20 + $0x28] sm:$0xff] %v313_v53 }
  0xb8   : > { %407 = vst [vmem:[%s650_s20 + $0x68] sm:$0xff] %v337_v54 }
  0xba   : > { %v361_v55 = vpop.f32.mrf.mxu2 }
  0xbb   : > { %v385_v56 = vpop.f32.mrf.mxu3  ;;  %415 = vst [vmem:[%s650_s20 + $0xa8] sm:$0xff] %v361_v55 }
  0xbc   : > { %423 = vst [vmem:[%s650_s20 + $0xe8] sm:$0xff] %v385_v56 }
  0xbe   : > { %v316_v57 = vpop.f32.mrf.mxu0 }
  0xbf   : > { %v340_v58 = vpop.f32.mrf.mxu1  ;;  %400 = vst [vmem:[%s650_s20 + $0x30] sm:$0xff] %v316_v57 }
  0xc0   : > { %408 = vst [vmem:[%s650_s20 + $0x70] sm:$0xff] %v340_v58 }
  0xc2   : > { %v364_v59 = vpop.f32.mrf.mxu2 }
  0xc3   : > { %v388_v60 = vpop.f32.mrf.mxu3  ;;  %416 = vst [vmem:[%s650_s20 + $0xb0] sm:$0xff] %v364_v59 }
  0xc4   : > { %424 = vst [vmem:[%s650_s20 + $0xf0] sm:$0xff] %v388_v60 }
  0xc6   : > { %v319_v61 = vpop.f32.mrf.mxu0 }
  0xc7   : > { %v343_v62 = vpop.f32.mrf.mxu1  ;;  %401 = vst [vmem:[%s650_s20 + $0x38] sm:$0xff] %v319_v61 }
  0xc8   : > { %409 = vst [vmem:[%s650_s20 + $0x78] sm:$0xff] %v343_v62 }
  0xca   : > { %v367_v63 = vpop.f32.mrf.mxu2 }
  0xcb   : > { %v391_v0 = vpop.f32.mrf.mxu3  ;;  %417 = vst [vmem:[%s650_s20 + $0xb8] sm:$0xff] %v367_v63 }
  0xcc   : > { %425 = vst [vmem:[%s650_s20 + $0xf8] sm:$0xff] %v391_v0 }
  0xcd PF: > { %s12_s9 = sadd.s32 1, %s543_s9  }
  0xce   : > { %p9_p4 = scmp.ge.s32.totalorder %s12_s9, 4  }
  0xd0   :  { %11 = sbr.rel (!%p9_p4) target bundleno = 1 (0x1), region = 58 }

// kernel: inverted_residual_head.6
= control target key start
LH: loop header
LB: loop body
LE: loop exit
PB: predicated region body
PF: predicated region fallthrough
CT: control target
= control target key end

     0   :  { %s743_s15 = smov 0   ;;  %s1002_s0 = inlined_call_operand.vmem [shape: f32[512,128], index: 0, kind: input, shape index: {}]   ;;  %s1003_s1 = inlined_call_operand.vmem [shape: f32[128,128], index: 1, kind: input, shape index: {}]   ;;  %s1004_s2 = inlined_call_operand.vmem [shape: f32[512,128], index: 2, kind: output, shape index: {0}]   ;;  %s1005_s3 = inlined_call_operand.vmem [shape: f32[2,8,128], index: 3, kind: output, shape index: {1}]   ;;  %s1006_s4 = inlined_call_operand.vmem [shape: f32[2,8,128], index: 4, kind: output, shape index: {2}]  }
   0x1 LB: > { %s749_s16 = sadd.s32 4294967295, %s716_s15   ;;  %p645_p0 = scmp.ge.s32.totalorder %s716_s15, 1  ;;  %s716_s15 = sphi %s743_s15, %s15_s15  }
   0x2   : > { %p168_p1 = scmp.lt.s32.totalorder %s716_s15, 3 }
   0x4   : > { %p169_p2 = pnand %p645_p0, %p168_p1 }
   0x5   : > { %s646_s7 = sshll.u32 (!%p169_p2), %s749_s16, 5  ;;  %p214_p4 = scmp.lt.s32.totalorder (!%p169_p2), %s749_s16, 1 }
   0x6   : > { %172 = sbr.rel (%p169_p2) target bundleno = 290 (0x122), region = 28  ;;  %p203_p3 = scmp.lt.s32.totalorder (!%p169_p2), %s646_s7, 63 }
   0xb   : > { %v269_v0 = vld [vmem:[%s1003_s1 + $0x78] sm:$0xff]  ;;  %v268_v1 = vld [vmem:[%s1003_s1 + $0x70] sm:$0xff]  ;;  %v267_v2 = vld [vmem:[%s1003_s1 + $0x68] sm:$0xff]  ;;  %s1008_s7 = smov (!%p203_p3, %s646_s7), 63  ;;  %s1010_s16 = smov (!%p214_p4, %s749_s16), 1 }
   0xc   : > { %270 = vmatpush.msra.mxu0 %v269_v0  ;;  %654 = vmatpush.msra.mxu1 %v269_v0  ;;  %v266_v3 = vld [vmem:[%s1003_s1 + $0x60] sm:$0xff]  ;;  %v265_v4 = vld [vmem:[%s1003_s1 + $0x58] sm:$0xff]  ;;  %v264_v5 = vld [vmem:[%s1003_s1 + $0x50] sm:$0xff]  ;;  %s647_s20 = sshll.u32 %s1008_s7, 3  ;;  %s650_s7 = sshll.u32 %s1010_s16, 3 }
   0xd   : > { %655 = vmatpush.msra.mxu2 %v269_v0  ;;  %656 = vmatpush.msra.mxu3 %v269_v0  ;;  %v263_v6 = vld [vmem:[%s1003_s1 + $0x48] sm:$0xff]  ;;  %v262_v7 = vld [vmem:[%s1003_s1 + $0x40] sm:$0xff]  ;;  %v261_v8 = vld [vmem:[%s1003_s1 + $0x38] sm:$0xff]  ;;  %s807_s27 = scalar_lea.vmem %s1002_s0, %s647_s20  ;;  %s849_s6 = scalar_lea.vmem %s1004_s2, %s647_s20 }
   0xe   : > { %271 = vmatpush.msra.mxu0 %v268_v1  ;;  %657 = vmatpush.msra.mxu1 %v268_v1  ;;  %v260_v9 = vld [vmem:[%s1003_s1 + $0x30] sm:$0xff]  ;;  %v259_v10 = vld [vmem:[%s1003_s1 + $0x28] sm:$0xff]  ;;  %v258_v11 = vld [vmem:[%s1003_s1 + $0x20] sm:$0xff]  ;;  %s217_s10 = scalar_lea.vmem %s1005_s3, %s650_s7  ;;  %s221_s13 = scalar_lea.vmem %s1006_s4, %s650_s7 }
   0xf   : > { %658 = vmatpush.msra.mxu2 %v268_v1  ;;  %659 = vmatpush.msra.mxu3 %v268_v1  ;;  %v257_v12 = vld [vmem:[%s1003_s1 + $0x18] sm:$0xff]  ;;  %v256_v13 = vld [vmem:[%s1003_s1 + $0x10] sm:$0xff]  ;;  %v255_v14 = vld [vmem:[%s1003_s1 + $0x8] sm:$0xff] }
  0x10   : > { %272 = vmatpush.msra.mxu0 %v267_v2  ;;  %660 = vmatpush.msra.mxu1 %v267_v2  ;;  %v254_v15 = vld [vmem:[%s1003_s1] sm:$0xff]  ;;  %v223_v19 = vld [vmem:[%s807_s27 + $0x8] sm:$0xff]  ;;  %v224_v23 = vld [vmem:[%s807_s27 + $0x10] sm:$0xff] }
  0x11   : > { %661 = vmatpush.msra.mxu2 %v267_v2  ;;  %662 = vmatpush.msra.mxu3 %v267_v2  ;;  %v222_v16 = vld [vmem:[%s807_s27] sm:$0xff]  ;;  %v231_v20 = vld [vmem:[%s807_s27 + $0x48] sm:$0xff]  ;;  %v232_v24 = vld [vmem:[%s807_s27 + $0x50] sm:$0xff] }
  0x12   : > { %273 = vmatpush.msra.mxu0 %v266_v3  ;;  %663 = vmatpush.msra.mxu1 %v266_v3  ;;  %v230_v17 = vld [vmem:[%s807_s27 + $0x40] sm:$0xff]  ;;  %v239_v21 = vld [vmem:[%s807_s27 + $0x88] sm:$0xff]  ;;  %v240_v25 = vld [vmem:[%s807_s27 + $0x90] sm:$0xff] }
  0x13   : > { %664 = vmatpush.msra.mxu2 %v266_v3  ;;  %665 = vmatpush.msra.mxu3 %v266_v3  ;;  %v238_v18 = vld [vmem:[%s807_s27 + $0x80] sm:$0xff]  ;;  %v247_v26 = vld [vmem:[%s807_s27 + $0xc8] sm:$0xff]  ;;  %v225_v27 = vld [vmem:[%s807_s27 + $0x18] sm:$0xff] }
  0x14   : > { %274 = vmatpush.msra.mxu0 %v265_v4  ;;  %666 = vmatpush.msra.mxu1 %v265_v4  ;;  %v246_v22 = vld [vmem:[%s807_s27 + $0xc0] sm:$0xff]  ;;  %v233_v28 = vld [vmem:[%s807_s27 + $0x58] sm:$0xff]  ;;  %v248_v30 = vld [vmem:[%s807_s27 + $0xd0] sm:$0xff] }
  0x15   : > { %667 = vmatpush.msra.mxu2 %v265_v4  ;;  %668 = vmatpush.msra.mxu3 %v265_v4  ;;  %v241_v29 = vld [vmem:[%s807_s27 + $0x98] sm:$0xff]  ;;  %v226_v31 = vld [vmem:[%s807_s27 + $0x20] sm:$0xff]  ;;  %v227_v35 = vld [vmem:[%s807_s27 + $0x28] sm:$0xff] }
  0x16   : > { %275 = vmatpush.msra.mxu0 %v264_v5  ;;  %669 = vmatpush.msra.mxu1 %v264_v5  ;;  %v234_v32 = vld [vmem:[%s807_s27 + $0x60] sm:$0xff]  ;;  %v249_v33 = vld [vmem:[%s807_s27 + $0xd8] sm:$0xff]  ;;  %v235_v36 = vld [vmem:[%s807_s27 + $0x68] sm:$0xff] }
  0x17   : > { %670 = vmatpush.msra.mxu2 %v264_v5  ;;  %671 = vmatpush.msra.mxu3 %v264_v5  ;;  %v242_v34 = vld [vmem:[%s807_s27 + $0xa0] sm:$0xff]  ;;  %v243_v38 = vld [vmem:[%s807_s27 + $0xa8] sm:$0xff]  ;;  %v228_v39 = vld [vmem:[%s807_s27 + $0x30] sm:$0xff] }
  0x18   : > { %276 = vmatpush.msra.mxu0 %v263_v6  ;;  %672 = vmatpush.msra.mxu1 %v263_v6  ;;  %v250_v37 = vld [vmem:[%s807_s27 + $0xe0] sm:$0xff]  ;;  %v236_v40 = vld [vmem:[%s807_s27 + $0x70] sm:$0xff]  ;;  %v251_v41 = vld [vmem:[%s807_s27 + $0xe8] sm:$0xff] }
  0x19   : > { %673 = vmatpush.msra.mxu2 %v263_v6  ;;  %674 = vmatpush.msra.mxu3 %v263_v6  ;;  %v244_v42 = vld [vmem:[%s807_s27 + $0xb0] sm:$0xff]  ;;  %v229_v43 = vld [vmem:[%s807_s27 + $0x38] sm:$0xff] }
  0x1a   : > { %277 = vmatpush.msra.mxu0 %v262_v7  ;;  %675 = vmatpush.msra.mxu1 %v262_v7  ;;  %v237_v44 = vld [vmem:[%s807_s27 + $0x78] sm:$0xff]  ;;  %v252_v45 = vld [vmem:[%s807_s27 + $0xf0] sm:$0xff] }
  0x1b   : > { %676 = vmatpush.msra.mxu2 %v262_v7  ;;  %677 = vmatpush.msra.mxu3 %v262_v7  ;;  %v245_v46 = vld [vmem:[%s807_s27 + $0xb8] sm:$0xff] }
  0x1c   : > { %278 = vmatpush.msra.mxu0 %v261_v8  ;;  %678 = vmatpush.msra.mxu1 %v261_v8  ;;  %v253_v47 = vld [vmem:[%s807_s27 + $0xf8] sm:$0xff] }
  0x1d   : > { %679 = vmatpush.msra.mxu2 %v261_v8  ;;  %680 = vmatpush.msra.mxu3 %v261_v8 }
  0x1e   : > { %279 = vmatpush.msra.mxu0 %v260_v9  ;;  %681 = vmatpush.msra.mxu1 %v260_v9 }
  0x1f   : > { %682 = vmatpush.msra.mxu2 %v260_v9  ;;  %683 = vmatpush.msra.mxu3 %v260_v9 }
  0x20   : > { %280 = vmatpush.msra.mxu0 %v259_v10  ;;  %684 = vmatpush.msra.mxu1 %v259_v10 }
  0x21   : > { %685 = vmatpush.msra.mxu2 %v259_v10  ;;  %686 = vmatpush.msra.mxu3 %v259_v10 }
  0x22   : > { %281 = vmatpush.msra.mxu0 %v258_v11  ;;  %687 = vmatpush.msra.mxu1 %v258_v11 }
  0x23   : > { %688 = vmatpush.msra.mxu2 %v258_v11  ;;  %689 = vmatpush.msra.mxu3 %v258_v11 }
  0x24   : > { %282 = vmatpush.msra.mxu0 %v257_v12  ;;  %690 = vmatpush.msra.mxu1 %v257_v12 }
  0x25   : > { %691 = vmatpush.msra.mxu2 %v257_v12  ;;  %692 = vmatpush.msra.mxu3 %v257_v12 }
  0x26   : > { %283 = vmatpush.msra.mxu0 %v256_v13  ;;  %693 = vmatpush.msra.mxu1 %v256_v13 }
  0x27   : > { %694 = vmatpush.msra.mxu2 %v256_v13  ;;  %695 = vmatpush.msra.mxu3 %v256_v13 }
  0x28   : > { %284 = vmatpush.msra.mxu0 %v255_v14  ;;  %696 = vmatpush.msra.mxu1 %v255_v14 }
  0x29   : > { %697 = vmatpush.msra.mxu2 %v255_v14  ;;  %698 = vmatpush.msra.mxu3 %v255_v14 }
  0x2a   : > { %285 = vmatpush.msra.mxu0 %v254_v15  ;;  %699 = vmatpush.msra.mxu1 %v254_v15 }
  0x2b   : > { %286 = vmatmul.f32.vlgmr.msra.gmra.mxu0 %v222_v16  ;;  %310 = vmatmul.f32.vlgmr.msra.gmra.mxu1 %v230_v17 }
  0x2c   : > { %700 = vmatpush.msra.mxu2 %v254_v15  ;;  %701 = vmatpush.msra.mxu3 %v254_v15 }
  0x2d   : > { %334 = vmatmul.f32.vlgmr.msra.gmra.mxu2 %v238_v18  ;;  %358 = vmatmul.f32.vlgmr.msra.gmra.mxu3 %v246_v22 }
  0x33   : > { %289 = vmatmul.f32.gmra.mxu0 %v223_v19  ;;  %313 = vmatmul.f32.gmra.mxu1 %v231_v20 }
  0x35   : > { %337 = vmatmul.f32.gmra.mxu2 %v239_v21  ;;  %361 = vmatmul.f32.gmra.mxu3 %v247_v26 }
  0x3b   : > { %292 = vmatmul.f32.gmra.mxu0 %v224_v23  ;;  %316 = vmatmul.f32.gmra.mxu1 %v232_v24 }
  0x3d   : > { %340 = vmatmul.f32.gmra.mxu2 %v240_v25  ;;  %364 = vmatmul.f32.gmra.mxu3 %v248_v30 }
  0x43   : > { %295 = vmatmul.f32.gmra.mxu0 %v225_v27  ;;  %319 = vmatmul.f32.gmra.mxu1 %v233_v28 }
  0x45   : > { %343 = vmatmul.f32.gmra.mxu2 %v241_v29  ;;  %367 = vmatmul.f32.gmra.mxu3 %v249_v33 }
  0x4b   : > { %298 = vmatmul.f32.gmra.mxu0 %v226_v31  ;;  %322 = vmatmul.f32.gmra.mxu1 %v234_v32 }
  0x4d   : > { %346 = vmatmul.f32.gmra.mxu2 %v242_v34  ;;  %370 = vmatmul.f32.gmra.mxu3 %v250_v37 }
  0x53   : > { %301 = vmatmul.f32.gmra.mxu0 %v227_v35  ;;  %325 = vmatmul.f32.gmra.mxu1 %v235_v36 }
  0x55   : > { %349 = vmatmul.f32.gmra.mxu2 %v243_v38  ;;  %373 = vmatmul.f32.gmra.mxu3 %v251_v41 }
  0x5b   : > { %304 = vmatmul.f32.gmra.mxu0 %v228_v39  ;;  %328 = vmatmul.f32.gmra.mxu1 %v236_v40 }
  0x5d   : > { %352 = vmatmul.f32.gmra.mxu2 %v244_v42  ;;  %376 = vmatmul.f32.gmra.mxu3 %v252_v45 }
  0x63   : > { %307 = vmatmul.f32.gmra.mxu0 %v229_v43  ;;  %331 = vmatmul.f32.gmra.mxu1 %v237_v44 }
  0x65   : > { %355 = vmatmul.f32.gmra.mxu2 %v245_v46  ;;  %379 = vmatmul.f32.gmra.mxu3 %v253_v47 }
  0xa8   : > { %v287_v48 = vpop.f32.mrf.mxu0  ;;  %v851_v49 = vpop.f32.mrf.mxu1 }
  0xa9   : > { %383 = vst [vmem:[%s849_s6] sm:$0xff] %v287_v48  ;;  %v452_v6 = vmul.f32 %v287_v48, %v287_v48  ;;  %v460_v34 = vmul.f32 %v851_v49, %v851_v49 }
  0xaa   : > { %391 = vst [vmem:[%s849_s6 + $0x40] sm:$0xff] %v851_v49 }
  0xb0   : > { %v290_v50 = vpop.f32.mrf.mxu0  ;;  %v856_v51 = vpop.f32.mrf.mxu1 }
  0xb1   : > { %384 = vst [vmem:[%s849_s6 + $0x8] sm:$0xff] %v290_v50  ;;  %v859_v52 = vpop.f32.mrf.mxu2  ;;  %v870_v56 = vpop.f32.mrf.mxu3  ;;  %v453_v5 = vmul.f32 %v290_v50, %v290_v50  ;;  %v415_v7 = vadd.f32 %v290_v50, %v287_v48  ;;  %v461_v37 = vmul.f32 %v856_v51, %v856_v51 }
  0xb2   : > { %392 = vst [vmem:[%s849_s6 + $0x48] sm:$0xff] %v856_v51 }
  0xb3   : > { %399 = vst [vmem:[%s849_s6 + $0x80] sm:$0xff] %v859_v52  ;;  %v484_v9 = vadd.f32 %v453_v5, %v452_v6 }
  0xb4   : > { %407 = vst [vmem:[%s849_s6 + $0xc0] sm:$0xff] %v870_v56 }
  0xb8   : > { %v293_v53 = vpop.f32.mrf.mxu0  ;;  %v865_v54 = vpop.f32.mrf.mxu1 }
  0xb9   : > { %385 = vst [vmem:[%s849_s6 + $0x10] sm:$0xff] %v293_v53  ;;  %v868_v55 = vpop.f32.mrf.mxu2  ;;  %v883_v60 = vpop.f32.mrf.mxu3  ;;  %v454_v8 = vmul.f32 %v293_v53, %v293_v53  ;;  %v416_v10 = vadd.f32 %v415_v7, %v293_v53  ;;  %v462_v40 = vmul.f32 %v865_v54, %v865_v54 }
  0xba   : > { %393 = vst [vmem:[%s849_s6 + $0x50] sm:$0xff] %v865_v54 }
  0xbb   : > { %400 = vst [vmem:[%s849_s6 + $0x88] sm:$0xff] %v868_v55  ;;  %v485_v14 = vadd.f32 %v484_v9, %v454_v8  ;;  %v468_v8 = vmul.f32 %v859_v52, %v859_v52 }
  0xbc   : > { %408 = vst [vmem:[%s849_s6 + $0xc8] sm:$0xff] %v883_v60 }
  0xc0   : > { %v296_v57 = vpop.f32.mrf.mxu0  ;;  %v878_v58 = vpop.f32.mrf.mxu1 }
  0xc1   : > { %386 = vst [vmem:[%s849_s6 + $0x18] sm:$0xff] %v296_v57  ;;  %v881_v59 = vpop.f32.mrf.mxu2  ;;  %v896_v0 = vpop.f32.mrf.mxu3  ;;  %v455_v11 = vmul.f32 %v296_v57, %v296_v57  ;;  %v417_v15 = vadd.f32 %v416_v10, %v296_v57  ;;  %v463_v43 = vmul.f32 %v878_v58, %v878_v58  ;;  %v469_v10 = vmul.f32 %v868_v55, %v868_v55 }
  0xc2   : > { %394 = vst [vmem:[%s849_s6 + $0x58] sm:$0xff] %v878_v58 }
  0xc3   : > { %401 = vst [vmem:[%s849_s6 + $0x90] sm:$0xff] %v881_v59  ;;  %v486_v19 = vadd.f32 %v485_v14, %v455_v11 }
  0xc4   : > { %409 = vst [vmem:[%s849_s6 + $0xd0] sm:$0xff] %v896_v0 }
  0xc8   : > { %v299_v61 = vpop.f32.mrf.mxu0  ;;  %v891_v62 = vpop.f32.mrf.mxu1 }
  0xc9   : > { %387 = vst [vmem:[%s849_s6 + $0x20] sm:$0xff] %v299_v61  ;;  %v894_v63 = vpop.f32.mrf.mxu2  ;;  %v909_v4 = vpop.f32.mrf.mxu3  ;;  %v456_v16 = vmul.f32 %v299_v61, %v299_v61  ;;  %v418_v20 = vadd.f32 %v417_v15, %v299_v61  ;;  %v464_v48 = vmul.f32 %v891_v62, %v891_v62 }
  0xca   : > { %395 = vst [vmem:[%s849_s6 + $0x60] sm:$0xff] %v891_v62  ;;  %v471_v15 = vmul.f32 %v894_v63, %v894_v63 }
  0xcb   : > { %402 = vst [vmem:[%s849_s6 + $0x98] sm:$0xff] %v894_v63  ;;  %v487_v22 = vadd.f32 %v486_v19, %v456_v16 }
  0xcc   : > { %410 = vst [vmem:[%s849_s6 + $0xd8] sm:$0xff] %v909_v4 }
  0xd0   : > { %v302_v1 = vpop.f32.mrf.mxu0  ;;  %v904_v2 = vpop.f32.mrf.mxu1 }
  0xd1   : > { %388 = vst [vmem:[%s849_s6 + $0x28] sm:$0xff] %v302_v1  ;;  %v907_v3 = vpop.f32.mrf.mxu2  ;;  %v920_v18 = vpop.f32.mrf.mxu3  ;;  %v457_v21 = vmul.f32 %v302_v1, %v302_v1  ;;  %v419_v23 = vadd.f32 %v418_v20, %v302_v1  ;;  %v465_v53 = vmul.f32 %v904_v2, %v904_v2 }
  0xd2   : > { %396 = vst [vmem:[%s849_s6 + $0x68] sm:$0xff] %v904_v2 }
  0xd3   : > { %403 = vst [vmem:[%s849_s6 + $0xa0] sm:$0xff] %v907_v3  ;;  %v488_v25 = vadd.f32 %v487_v22, %v457_v21 }
  0xd4   : > { %411 = vst [vmem:[%s849_s6 + $0xe0] sm:$0xff] %v920_v18 }
  0xd8   : > { %v305_v12 = vpop.f32.mrf.mxu0  ;;  %v329_v13 = vpop.f32.mrf.mxu1 }
  0xd9   : > { %389 = vst [vmem:[%s849_s6 + $0x30] sm:$0xff] %v305_v12  ;;  %v918_v17 = vpop.f32.mrf.mxu2  ;;  %v458_v24 = vmul.f32 %v305_v12, %v305_v12  ;;  %v420_v26 = vadd.f32 %v419_v23, %v305_v12  ;;  %v928_v33 = vpop.f32.mrf.mxu3  ;;  %v470_v12 = vmul.f32 %v881_v59, %v881_v59 }
  0xda   : > { %397 = vst [vmem:[%s849_s6 + $0x70] sm:$0xff] %v329_v13  ;;  %v473_v22 = vmul.f32 %v918_v17, %v918_v17 }
  0xdb   : > { %404 = vst [vmem:[%s849_s6 + $0xa8] sm:$0xff] %v918_v17  ;;  %v489_v29 = vadd.f32 %v488_v25, %v458_v24 }
  0xdc   : > { %412 = vst [vmem:[%s849_s6 + $0xe8] sm:$0xff] %v928_v33 }
  0xe0   : > { %v308_v27 = vpop.f32.mrf.mxu0  ;;  %v332_v28 = vpop.f32.mrf.mxu1 }
  0xe1   : > { %390 = vst [vmem:[%s849_s6 + $0x38] sm:$0xff] %v308_v27  ;;  %v421_v30 = vadd.f32 %v420_v26, %v308_v27  ;;  %v459_v31 = vmul.f32 %v308_v27, %v308_v27  ;;  %v353_v32 = vpop.f32.mrf.mxu2  ;;  %v377_v47 = vpop.f32.mrf.mxu3  ;;  %v467_v1 = vmul.f32 %v332_v28, %v332_v28 }
  0xe2   : > { %398 = vst [vmem:[%s849_s6 + $0x78] sm:$0xff] %v332_v28  ;;  %v474_v25 = vmul.f32 %v353_v32, %v353_v32 }
  0xe3   : > { %v422_v35 = vadd.f32 %v421_v30, %v851_v49  ;;  %v490_v36 = vadd.f32 %v489_v29, %v459_v31  ;;  %405 = vst [vmem:[%s849_s6 + $0xb0] sm:$0xff] %v353_v32 }
  0xe4   : > { %413 = vst [vmem:[%s849_s6 + $0xf0] sm:$0xff] %v377_v47 }
  0xe5   : > { %v423_v38 = vadd.f32 %v422_v35, %v856_v51  ;;  %v491_v39 = vadd.f32 %v490_v36, %v460_v34  ;;  %v479_v36 = vmul.f32 %v909_v4, %v909_v4 }
  0xe7   : > { %v424_v41 = vadd.f32 %v423_v38, %v865_v54  ;;  %v492_v42 = vadd.f32 %v491_v39, %v461_v37  ;;  %v480_v38 = vmul.f32 %v920_v18, %v920_v18 }
  0xe9   : > { %v493_v44 = vadd.f32 %v492_v42, %v462_v40  ;;  %v425_v45 = vadd.f32 %v424_v41, %v878_v58  ;;  %v356_v46 = vpop.f32.mrf.mxu2  ;;  %v466_v58 = vmul.f32 %v329_v13, %v329_v13  ;;  %v380_v7 = vpop.f32.mrf.mxu3 }
  0xea   : > { %406 = vst [vmem:[%s849_s6 + $0xb8] sm:$0xff] %v356_v46  ;;  %v475_v26 = vmul.f32 %v356_v46, %v356_v46 }
  0xeb   : > { %v426_v49 = vadd.f32 %v425_v45, %v891_v62  ;;  %v494_v50 = vadd.f32 %v493_v44, %v463_v43  ;;  %414 = vst [vmem:[%s849_s6 + $0xf8] sm:$0xff] %v380_v7  ;;  %v482_v44 = vmul.f32 %v377_v47, %v377_v47  ;;  %v483_v45 = vmul.f32 %v380_v7, %v380_v7 }
  0xed   : > { %v427_v51 = vadd.f32 %v426_v49, %v904_v2  ;;  %v495_v54 = vadd.f32 %v494_v50, %v464_v48 }
  0xef   : > { %v496_v57 = vadd.f32 %v495_v54, %v465_v53  ;;  %v428_v61 = vadd.f32 %v427_v51, %v329_v13 }
  0xf1   : > { %v497_v5 = vadd.f32 %v496_v57, %v466_v58  ;;  %v429_v6 = vadd.f32 %v428_v61, %v332_v28 }
  0xf3   : > { %v430_v62 = vadd.f32 %v429_v6, %v859_v52  ;;  %v498_v9 = vadd.f32 %v497_v5, %v467_v1  ;;  %v472_v52 = vmul.f32 %v907_v3, %v907_v3 }
  0xf5   : > { %v431_v2 = vadd.f32 %v430_v62, %v868_v55  ;;  %v499_v11 = vadd.f32 %v498_v9, %v468_v8 }
  0xf7   : > { %v432_v13 = vadd.f32 %v431_v2, %v881_v59  ;;  %v500_v14 = vadd.f32 %v499_v11, %v469_v10 }
  0xf9   : > { %v501_v16 = vadd.f32 %v500_v14, %v470_v12  ;;  %v433_v19 = vadd.f32 %v432_v13, %v894_v63  ;;  %v476_v63 = vmul.f32 %v870_v56, %v870_v56 }
  0xfb   : > { %v434_v20 = vadd.f32 %v433_v19, %v907_v3  ;;  %v502_v21 = vadd.f32 %v501_v16, %v471_v15  ;;  %v477_v3 = vmul.f32 %v883_v60, %v883_v60 }
  0xfd   : > { %v435_v55 = vadd.f32 %v434_v20, %v918_v17  ;;  %v503_v23 = vadd.f32 %v502_v21, %v472_v52  ;;  %v478_v17 = vmul.f32 %v896_v0, %v896_v0 }
  0xff   : > { %v504_v59 = vadd.f32 %v503_v23, %v473_v22  ;;  %v436_v24 = vadd.f32 %v435_v55, %v353_v32 }
 0x101   : > { %v505_v27 = vadd.f32 %v504_v59, %v474_v25  ;;  %v437_v28 = vadd.f32 %v436_v24, %v356_v46 }
 0x103   : > { %v438_v29 = vadd.f32 %v437_v28, %v870_v56  ;;  %v506_v30 = vadd.f32 %v505_v27, %v475_v26 }
 0x105   : > { %v439_v31 = vadd.f32 %v438_v29, %v883_v60  ;;  %v507_v34 = vadd.f32 %v506_v30, %v476_v63 }
 0x107   : > { %v440_v32 = vadd.f32 %v439_v31, %v896_v0  ;;  %v508_v35 = vadd.f32 %v507_v34, %v477_v3  ;;  %v481_v0 = vmul.f32 %v928_v33, %v928_v33 }
 0x109   : > { %v509_v37 = vadd.f32 %v508_v35, %v478_v17  ;;  %v441_v56 = vadd.f32 %v440_v32, %v909_v4 }
 0x10b   : > { %v442_v60 = vadd.f32 %v441_v56, %v920_v18  ;;  %v510_v39 = vadd.f32 %v509_v37, %v479_v36 }
 0x10d   : > { %v443_v40 = vadd.f32 %v442_v60, %v928_v33  ;;  %v511_v41 = vadd.f32 %v510_v39, %v480_v38 }
 0x10f   : > { %v512_v42 = vadd.f32 %v511_v41, %v481_v0  ;;  %v444_v43 = vadd.f32 %v443_v40, %v377_v47 }
 0x111   : > { %v513_v46 = vadd.f32 %v512_v42, %v482_v44  ;;  %v445_v4 = vadd.f32 %v444_v43, %v380_v7 }
 0x113   : > { %v446_v48 = vrot.slane %v445_v4, 4  ;;  %v514_v49 = vadd.f32 %v513_v46, %v483_v45 }
 0x115   : > { %v447_v50 = vadd.f32 %v446_v48, %v445_v4  ;;  %v515_v51 = vrot.slane %v514_v49, 4 }
 0x117   : > { %v448_v18 = vrot.slane %v447_v50, 2  ;;  %v516_v53 = vadd.f32 %v515_v51, %v514_v49 }
 0x119   : > { %v449_v54 = vadd.f32 %v448_v18, %v447_v50  ;;  %v517_v57 = vrot.slane %v516_v53, 2 }
 0x11b   : > { %v450_v61 = vrot.slane %v449_v54, 1  ;;  %v518_v33 = vadd.f32 %v517_v57, %v516_v53 }
 0x11d   : > { %v451_v47 = vadd.f32 %v450_v61, %v449_v54  ;;  %v519_v58 = vrot.slane %v518_v33, 1 }
 0x11f   : > { %v520_v1 = vadd.f32 %v519_v58, %v518_v33  ;;  %521 = vst [vmem:[%s217_s10] sm:$0xff] %v451_v47 }
 0x121   : > { %522 = vst [vmem:[%s221_s13] sm:$0xff] %v520_v1 }
 0x122 PF: > { %s15_s15 = sadd.s32 1, %s716_s15  }
 0x123   : > { %p12_p5 = scmp.ge.s32.totalorder %s15_s15, 4  }
 0x125   :  { %14 = sbr.rel (!%p12_p5) target bundleno = 1 (0x1), region = 82 }

// kernel: inverted_residual_head.7
= control target key start
LH: loop header
LB: loop body
LE: loop exit
PB: predicated region body
PF: predicated region fallthrough
CT: control target
= control target key end

     0   :  { %s547_s15 = smov 0   ;;  %s743_s0 = inlined_call_operand.vmem [shape: f32[512,128], index: 0, kind: input, shape index: {}]   ;;  %s744_s1 = inlined_call_operand.vmem [shape: f32[1,128], index: 1, kind: input, shape index: {}]   ;;  %s745_s2 = inlined_call_operand.vmem [shape: f32[1,128], index: 2, kind: input, shape index: {}]   ;;  %s746_s3 = inlined_call_operand.vmem [shape: f32[512,128], index: 3, kind: input, shape index: {}]   ;;  %s747_s4 = inlined_call_operand.vmem [shape: f32[512,128], index: 4, kind: output, shape index: {}]  }
   0x1 LB: > { %s491_s16 = sadd.s32 4294967295, %s520_s15   ;;  %p495_p0 = scmp.ge.s32.totalorder %s520_s15, 1  ;;  %s520_s15 = sphi %s547_s15, %s14_s15  }
   0x2   : > { %p174_p1 = scmp.lt.s32.totalorder %s520_s15, 3 }
   0x4   : > { %p175_p2 = pnand %p495_p0, %p174_p1 }
   0x5   : > { %s496_s17 = sshll.u32 (!%p175_p2), %s491_s16, 5 }
   0x6   : > { %178 = sbr.rel (%p175_p2) target bundleno = 53 (0x35), region = 36  ;;  %p206_p3 = scmp.lt.s32.totalorder (!%p175_p2), %s496_s17, 63 }
   0xb   : > { %s749_s17 = smov (!%p206_p3, %s496_s17), 63  ;;  %v558_v0 = vld [vmem:[%s744_s1] ss:$0 sm:$0xff] }
   0xc   : > { %s497_s20 = sshll.u32 %s749_s17, 3  ;;  %v573_v1 = vld [vmem:[%s745_s2] ss:$0 sm:$0xff] }
   0xd   : > { %s563_s23 = scalar_lea.vmem %s743_s0, %s497_s20  ;;  %s568_s26 = scalar_lea.vmem %s746_s3, %s497_s20 }
   0xe   : > { %v223_v2 = vld [vmem:[%s563_s23] sm:$0xff]  ;;  %v224_v3 = vld [vmem:[%s563_s23 + $0x8] sm:$0xff]  ;;  %v225_v7 = vld [vmem:[%s563_s23 + $0x10] sm:$0xff]  ;;  %s595_s5 = scalar_lea.vmem %s747_s4, %s497_s20 }
   0xf   : > { %v259_v4 = vmul.f32 %v558_v0, %v223_v2  ;;  %v327_v5 = vld [vmem:[%s568_s26] sm:$0xff]  ;;  %v260_v6 = vmul.f32 %v558_v0, %v224_v3  ;;  %v328_v8 = vld [vmem:[%s568_s26 + $0x8] sm:$0xff]  ;;  %v261_v9 = vmul.f32 %v558_v0, %v225_v7  ;;  %v226_v10 = vld [vmem:[%s563_s23 + $0x18] sm:$0xff] }
  0x10   : > { %v227_v11 = vld [vmem:[%s563_s23 + $0x20] sm:$0xff]  ;;  %v329_v14 = vld [vmem:[%s568_s26 + $0x10] sm:$0xff]  ;;  %v262_v15 = vmul.f32 %v558_v0, %v226_v10  ;;  %v330_v16 = vld [vmem:[%s568_s26 + $0x18] sm:$0xff] }
  0x11   : > { %v295_v12 = vadd.f32 %v573_v1, %v259_v4  ;;  %v296_v13 = vadd.f32 %v573_v1, %v260_v6  ;;  %v263_v17 = vmul.f32 %v558_v0, %v227_v11  ;;  %v228_v18 = vld [vmem:[%s563_s23 + $0x28] sm:$0xff]  ;;  %v297_v19 = vadd.f32 %v573_v1, %v261_v9  ;;  %v331_v20 = vld [vmem:[%s568_s26 + $0x20] sm:$0xff]  ;;  %v229_v22 = vld [vmem:[%s563_s23 + $0x30] sm:$0xff] }
  0x12   : > { %v264_v21 = vmul.f32 %v558_v0, %v228_v18  ;;  %v230_v23 = vld [vmem:[%s563_s23 + $0x38] sm:$0xff]  ;;  %v298_v26 = vadd.f32 %v573_v1, %v262_v15  ;;  %v332_v28 = vld [vmem:[%s568_s26 + $0x28] sm:$0xff]  ;;  %v231_v29 = vld [vmem:[%s563_s23 + $0x40] sm:$0xff]  ;;  %v265_v32 = vmul.f32 %v558_v0, %v229_v22 }
  0x13   : > { %v359_v24 = vadd.f32 %v327_v5, %v295_v12  ;;  %v360_v25 = vadd.f32 %v328_v8, %v296_v13  ;;  %v299_v27 = vadd.f32 %v573_v1, %v263_v17  ;;  %v361_v30 = vadd.f32 %v329_v14, %v297_v19  ;;  %v232_v34 = vld [vmem:[%s563_s23 + $0x48] sm:$0xff]  ;;  %v233_v35 = vld [vmem:[%s563_s23 + $0x50] sm:$0xff]  ;;  %v334_v39 = vld [vmem:[%s568_s26 + $0x38] sm:$0xff] }
  0x14   : > { %v300_v31 = vadd.f32 %v573_v1, %v264_v21  ;;  %v266_v33 = vmul.f32 %v558_v0, %v230_v23  ;;  %v362_v36 = vadd.f32 %v330_v16, %v298_v26  ;;  %v333_v38 = vld [vmem:[%s568_s26 + $0x30] sm:$0xff]  ;;  %v267_v40 = vmul.f32 %v558_v0, %v231_v29  ;;  %v234_v42 = vld [vmem:[%s563_s23 + $0x58] sm:$0xff]  ;;  %v335_v46 = vld [vmem:[%s568_s26 + $0x40] sm:$0xff] }
  0x15   : > { %391 = vst [vmem:[%s595_s5] sm:$0xff] %v359_v24  ;;  %v363_v37 = vadd.f32 %v331_v20, %v299_v27  ;;  %v268_v41 = vmul.f32 %v558_v0, %v232_v34  ;;  %v301_v44 = vadd.f32 %v573_v1, %v265_v32  ;;  %v269_v47 = vmul.f32 %v558_v0, %v233_v35  ;;  %v235_v48 = vld [vmem:[%s563_s23 + $0x60] sm:$0xff]  ;;  %v236_v49 = vld [vmem:[%s563_s23 + $0x68] sm:$0xff]  ;;  %v237_v55 = vld [vmem:[%s563_s23 + $0x70] sm:$0xff] }
  0x16   : > { %392 = vst [vmem:[%s595_s5 + $0x8] sm:$0xff] %v360_v25  ;;  %v364_v43 = vadd.f32 %v332_v28, %v300_v31  ;;  %v302_v45 = vadd.f32 %v573_v1, %v266_v33  ;;  %v303_v50 = vadd.f32 %v573_v1, %v267_v40  ;;  %v336_v52 = vld [vmem:[%s568_s26 + $0x48] sm:$0xff]  ;;  %v270_v53 = vmul.f32 %v558_v0, %v234_v42  ;;  %v337_v59 = vld [vmem:[%s568_s26 + $0x50] sm:$0xff]  ;;  %v238_v61 = vld [vmem:[%s563_s23 + $0x78] sm:$0xff] }
  0x17   : > { %393 = vst [vmem:[%s595_s5 + $0x10] sm:$0xff] %v361_v30  ;;  %v304_v51 = vadd.f32 %v573_v1, %v268_v41  ;;  %v271_v54 = vmul.f32 %v558_v0, %v235_v48  ;;  %v365_v56 = vadd.f32 %v333_v38, %v301_v44  ;;  %v305_v58 = vadd.f32 %v573_v1, %v269_v47  ;;  %v239_v62 = vld [vmem:[%s563_s23 + $0x80] sm:$0xff]  ;;  %v338_v3 = vld [vmem:[%s568_s26 + $0x58] sm:$0xff]  ;;  %v240_v5 = vld [vmem:[%s563_s23 + $0x88] sm:$0xff] }
  0x18   : > { %394 = vst [vmem:[%s595_s5 + $0x18] sm:$0xff] %v362_v36  ;;  %v366_v57 = vadd.f32 %v334_v39, %v302_v45  ;;  %v272_v60 = vmul.f32 %v558_v0, %v236_v49  ;;  %v367_v63 = vadd.f32 %v335_v46, %v303_v50  ;;  %v306_v2 = vadd.f32 %v573_v1, %v270_v53  ;;  %v339_v7 = vld [vmem:[%s568_s26 + $0x60] sm:$0xff]  ;;  %v241_v11 = vld [vmem:[%s563_s23 + $0x90] sm:$0xff]  ;;  %v242_v12 = vld [vmem:[%s563_s23 + $0x98] sm:$0xff] }
  0x19   : > { %395 = vst [vmem:[%s595_s5 + $0x20] sm:$0xff] %v363_v37  ;;  %v307_v4 = vadd.f32 %v573_v1, %v271_v54  ;;  %v368_v6 = vadd.f32 %v336_v52, %v304_v51  ;;  %v273_v9 = vmul.f32 %v558_v0, %v237_v55  ;;  %v274_v10 = vmul.f32 %v558_v0, %v238_v61  ;;  %v340_v14 = vld [vmem:[%s568_s26 + $0x68] sm:$0xff]  ;;  %v243_v17 = vld [vmem:[%s563_s23 + $0xa0] sm:$0xff]  ;;  %v341_v20 = vld [vmem:[%s568_s26 + $0x70] sm:$0xff] }
  0x1a   : > { %396 = vst [vmem:[%s595_s5 + $0x28] sm:$0xff] %v364_v43  ;;  %v308_v8 = vadd.f32 %v573_v1, %v272_v60  ;;  %v369_v13 = vadd.f32 %v337_v59, %v305_v58  ;;  %v275_v15 = vmul.f32 %v558_v0, %v239_v62  ;;  %v276_v16 = vmul.f32 %v558_v0, %v240_v5  ;;  %v244_v23 = vld [vmem:[%s563_s23 + $0xa8] sm:$0xff]  ;;  %v342_v25 = vld [vmem:[%s568_s26 + $0x78] sm:$0xff]  ;;  %v245_v29 = vld [vmem:[%s563_s23 + $0xb0] sm:$0xff] }
  0x1b   : > { %397 = vst [vmem:[%s595_s5 + $0x30] sm:$0xff] %v365_v56  ;;  %v370_v18 = vadd.f32 %v338_v3, %v306_v2  ;;  %v309_v19 = vadd.f32 %v573_v1, %v273_v9  ;;  %v310_v21 = vadd.f32 %v573_v1, %v274_v10  ;;  %v277_v22 = vmul.f32 %v558_v0, %v241_v11  ;;  %v246_v30 = vld [vmem:[%s563_s23 + $0xb8] sm:$0xff]  ;;  %v343_v32 = vld [vmem:[%s568_s26 + $0x80] sm:$0xff]  ;;  %v344_v37 = vld [vmem:[%s568_s26 + $0x88] sm:$0xff] }
  0x1c   : > { %398 = vst [vmem:[%s595_s5 + $0x38] sm:$0xff] %v366_v57  ;;  %v371_v24 = vadd.f32 %v339_v7, %v307_v4  ;;  %v311_v26 = vadd.f32 %v573_v1, %v275_v15  ;;  %v278_v27 = vmul.f32 %v558_v0, %v242_v12  ;;  %v279_v28 = vmul.f32 %v558_v0, %v243_v17  ;;  %v247_v35 = vld [vmem:[%s563_s23 + $0xc0] sm:$0xff]  ;;  %v248_v39 = vld [vmem:[%s563_s23 + $0xc8] sm:$0xff]  ;;  %v345_v41 = vld [vmem:[%s568_s26 + $0x90] sm:$0xff] }
  0x1d   : > { %399 = vst [vmem:[%s595_s5 + $0x40] sm:$0xff] %v367_v63  ;;  %v372_v31 = vadd.f32 %v340_v14, %v308_v8  ;;  %v312_v33 = vadd.f32 %v573_v1, %v276_v16  ;;  %v280_v34 = vmul.f32 %v558_v0, %v244_v23  ;;  %v373_v36 = vadd.f32 %v341_v20, %v309_v19  ;;  %v249_v45 = vld [vmem:[%s563_s23 + $0xd0] sm:$0xff]  ;;  %v346_v47 = vld [vmem:[%s568_s26 + $0x98] sm:$0xff]  ;;  %v347_v52 = vld [vmem:[%s568_s26 + $0xa0] sm:$0xff] }
  0x1e   : > { %400 = vst [vmem:[%s595_s5 + $0x48] sm:$0xff] %v368_v6  ;;  %v313_v38 = vadd.f32 %v573_v1, %v277_v22  ;;  %v374_v40 = vadd.f32 %v342_v25, %v310_v21  ;;  %v314_v42 = vadd.f32 %v573_v1, %v278_v27  ;;  %v281_v43 = vmul.f32 %v558_v0, %v245_v29  ;;  %v250_v50 = vld [vmem:[%s563_s23 + $0xd8] sm:$0xff]  ;;  %v251_v55 = vld [vmem:[%s563_s23 + $0xe0] sm:$0xff]  ;;  %v348_v57 = vld [vmem:[%s568_s26 + $0xa8] sm:$0xff] }
  0x1f   : > { %401 = vst [vmem:[%s595_s5 + $0x50] sm:$0xff] %v369_v13  ;;  %v282_v44 = vmul.f32 %v558_v0, %v246_v30  ;;  %v375_v46 = vadd.f32 %v343_v32, %v311_v26  ;;  %v315_v48 = vadd.f32 %v573_v1, %v279_v28  ;;  %v283_v49 = vmul.f32 %v558_v0, %v247_v35  ;;  %v252_v60 = vld [vmem:[%s563_s23 + $0xe8] sm:$0xff]  ;;  %v349_v62 = vld [vmem:[%s568_s26 + $0xb0] sm:$0xff]  ;;  %v350_v5 = vld [vmem:[%s568_s26 + $0xb8] sm:$0xff] }
  0x20   : > { %402 = vst [vmem:[%s595_s5 + $0x58] sm:$0xff] %v370_v18  ;;  %v376_v51 = vadd.f32 %v344_v37, %v312_v33  ;;  %v316_v53 = vadd.f32 %v573_v1, %v280_v34  ;;  %v284_v54 = vmul.f32 %v558_v0, %v248_v39  ;;  %v377_v56 = vadd.f32 %v345_v41, %v313_v38  ;;  %v253_v3 = vld [vmem:[%s563_s23 + $0xf0] sm:$0xff]  ;;  %v254_v8 = vld [vmem:[%s563_s23 + $0xf8] sm:$0xff]  ;;  %v351_v10 = vld [vmem:[%s568_s26 + $0xc0] sm:$0xff] }
  0x21   : > { %403 = vst [vmem:[%s595_s5 + $0x60] sm:$0xff] %v371_v24  ;;  %v317_v58 = vadd.f32 %v573_v1, %v281_v43  ;;  %v285_v59 = vmul.f32 %v558_v0, %v249_v45  ;;  %v378_v61 = vadd.f32 %v346_v47, %v314_v42  ;;  %v318_v63 = vadd.f32 %v573_v1, %v282_v44  ;;  %v352_v14 = vld [vmem:[%s568_s26 + $0xc8] sm:$0xff]  ;;  %v353_v18 = vld [vmem:[%s568_s26 + $0xd0] sm:$0xff]  ;;  %v354_v22 = vld [vmem:[%s568_s26 + $0xd8] sm:$0xff] }
  0x22   : > { %404 = vst [vmem:[%s595_s5 + $0x68] sm:$0xff] %v372_v31  ;;  %v286_v2 = vmul.f32 %v558_v0, %v250_v50  ;;  %v379_v4 = vadd.f32 %v347_v52, %v315_v48  ;;  %v319_v6 = vadd.f32 %v573_v1, %v283_v49  ;;  %v287_v7 = vmul.f32 %v558_v0, %v251_v55  ;;  %v355_v25 = vld [vmem:[%s568_s26 + $0xe0] sm:$0xff]  ;;  %v356_v28 = vld [vmem:[%s568_s26 + $0xe8] sm:$0xff]  ;;  %v357_v30 = vld [vmem:[%s568_s26 + $0xf0] sm:$0xff] }
  0x23   : > { %405 = vst [vmem:[%s595_s5 + $0x70] sm:$0xff] %v373_v36  ;;  %v380_v9 = vadd.f32 %v348_v57, %v316_v53  ;;  %v320_v11 = vadd.f32 %v573_v1, %v284_v54  ;;  %v288_v12 = vmul.f32 %v558_v0, %v252_v60  ;;  %v381_v13 = vadd.f32 %v349_v62, %v317_v58  ;;  %v358_v33 = vld [vmem:[%s568_s26 + $0xf8] sm:$0xff] }
  0x24   : > { %406 = vst [vmem:[%s595_s5 + $0x78] sm:$0xff] %v374_v40  ;;  %v321_v15 = vadd.f32 %v573_v1, %v285_v59  ;;  %v289_v16 = vmul.f32 %v558_v0, %v253_v3  ;;  %v382_v17 = vadd.f32 %v350_v5, %v318_v63  ;;  %v322_v19 = vadd.f32 %v573_v1, %v286_v2 }
  0x25   : > { %407 = vst [vmem:[%s595_s5 + $0x80] sm:$0xff] %v375_v46  ;;  %v290_v20 = vmul.f32 %v558_v0, %v254_v8  ;;  %v383_v21 = vadd.f32 %v351_v10, %v319_v6  ;;  %v323_v23 = vadd.f32 %v573_v1, %v287_v7  ;;  %v384_v24 = vadd.f32 %v352_v14, %v320_v11 }
  0x26   : > { %408 = vst [vmem:[%s595_s5 + $0x88] sm:$0xff] %v376_v51  ;;  %v324_v26 = vadd.f32 %v573_v1, %v288_v12  ;;  %v385_v27 = vadd.f32 %v353_v18, %v321_v15  ;;  %v325_v0 = vadd.f32 %v573_v1, %v289_v16  ;;  %v386_v29 = vadd.f32 %v354_v22, %v322_v19 }
  0x27   : > { %409 = vst [vmem:[%s595_s5 + $0x90] sm:$0xff] %v377_v56  ;;  %v326_v31 = vadd.f32 %v573_v1, %v290_v20  ;;  %v387_v32 = vadd.f32 %v355_v25, %v323_v23 }
  0x28   : > { %410 = vst [vmem:[%s595_s5 + $0x98] sm:$0xff] %v378_v61  ;;  %v388_v34 = vadd.f32 %v356_v28, %v324_v26  ;;  %v389_v35 = vadd.f32 %v357_v30, %v325_v0 }
  0x29   : > { %411 = vst [vmem:[%s595_s5 + $0xa0] sm:$0xff] %v379_v4  ;;  %v390_v36 = vadd.f32 %v358_v33, %v326_v31 }
  0x2a   : > { %412 = vst [vmem:[%s595_s5 + $0xa8] sm:$0xff] %v380_v9 }
  0x2b   : > { %413 = vst [vmem:[%s595_s5 + $0xb0] sm:$0xff] %v381_v13 }
  0x2c   : > { %414 = vst [vmem:[%s595_s5 + $0xb8] sm:$0xff] %v382_v17 }
  0x2d   : > { %415 = vst [vmem:[%s595_s5 + $0xc0] sm:$0xff] %v383_v21 }
  0x2e   : > { %416 = vst [vmem:[%s595_s5 + $0xc8] sm:$0xff] %v384_v24 }
  0x2f   : > { %417 = vst [vmem:[%s595_s5 + $0xd0] sm:$0xff] %v385_v27 }
  0x30   : > { %418 = vst [vmem:[%s595_s5 + $0xd8] sm:$0xff] %v386_v29 }
  0x31   : > { %419 = vst [vmem:[%s595_s5 + $0xe0] sm:$0xff] %v387_v32 }
  0x32   : > { %420 = vst [vmem:[%s595_s5 + $0xe8] sm:$0xff] %v388_v34 }
  0x33   : > { %421 = vst [vmem:[%s595_s5 + $0xf0] sm:$0xff] %v389_v35 }
  0x34   : > { %422 = vst [vmem:[%s595_s5 + $0xf8] sm:$0xff] %v390_v36 }
  0x35 PF: > { %s14_s15 = sadd.s32 1, %s520_s15  }
  0x36   : > { %p11_p4 = scmp.ge.s32.totalorder %s14_s15, 4  }
  0x38   :  { %13 = sbr.rel (!%p11_p4) target bundleno = 1 (0x1), region = 69 }

// kernel: inverted_residual_head.5
= control target key start
LH: loop header
LB: loop body
LE: loop exit
PB: predicated region body
PF: predicated region fallthrough
CT: control target
= control target key end

     0   :  { %s1922_s9 = smov 0   ;;  %s3560_s0 = inlined_call_operand.vmem [shape: f32[2,18,18,128], index: 0, kind: input, shape index: {}]   ;;  %s3561_s1 = inlined_call_operand.vmem [shape: f32[9,128], index: 1, kind: input, shape index: {}]   ;;  %s3562_s2 = inlined_call_operand.vmem [shape: f32[2,16,16,128], index: 2, kind: output, shape index: {}]  }
   0x1 LB: > { %s1684_s10 = sadd.s32 4294967295, %s1905_s9   ;;  %p1688_p0 = scmp.ge.s32.totalorder %s1905_s9, 1  ;;  %s1905_s9 = sphi %s1922_s9, %s12_s9  }
   0x2   : > { %p112_p1 = scmp.lt.s32.totalorder %s1905_s9, 3 }
   0x4   : > { %p113_p2 = pnand %p1688_p0, %p112_p1 }
   0x6   : > { %116 = sbr.rel (%p113_p2) target bundleno = 205 (0xcd), region = 28 }
   0xb   : > { %p134_p3 = scmp.lt.s32.totalorder %s1684_s10, 1  ;;  %v1936_v0 = vld [vmem:[%s3561_s1] sm:$0xff] }
   0xc   : > { %v1944_v1 = vperm.slane %v1936_v0, 0  ;;  %v1985_v16 = vperm.slane %v1936_v0, 1  ;;  %v2009_v23 = vperm.slane %v1936_v0, 2 }
   0xd   : > { %s3822_s10 = smov (!%p134_p3, %s1684_s10), 1 }
   0xe   : > { %s1887_s11 = smul.u32 432, %s3822_s10  ;;  %s1886_s21 = sshll.u32 %s3822_s10, 8 }
   0xf   : > { %s3401_s24 = scalar_lea.vmem %s3562_s2, %s1886_s21 }
  0x10   : > { %s1941_s16 = scalar_lea.vmem %s3560_s0, %s1887_s11 }
  0x11   : > { %v210_v2 = vld [vmem:[%s1941_s16] sm:$0xff]  ;;  %v211_v3 = vld [vmem:[%s1941_s16 + $0x8] sm:$0xff]  ;;  %v1949_v4 = vld [vmem:[%s1941_s16 + $0x18] sm:$0xff] }
  0x12   : > { %v1952_v5 = vld [vmem:[%s1941_s16 + $0x20] sm:$0xff]  ;;  %v1955_v6 = vld [vmem:[%s1941_s16 + $0x30] sm:$0xff]  ;;  %v1958_v7 = vld [vmem:[%s1941_s16 + $0x38] sm:$0xff]  ;;  %v1961_v8 = vmul.f32 %v1944_v1, %v210_v2  ;;  %v1973_v12 = vmul.f32 %v1944_v1, %v211_v3  ;;  %v1989_v17 = vmul.f32 %v1944_v1, %v1949_v4 }
  0x13   : > { %v1964_v9 = vld [vmem:[%s1941_s16 + $0x48] sm:$0xff]  ;;  %v1967_v10 = vld [vmem:[%s1941_s16 + $0x50] sm:$0xff]  ;;  %v1970_v11 = vld [vmem:[%s1941_s16 + $0x60] sm:$0xff]  ;;  %v1993_v18 = vmul.f32 %v1944_v1, %v1952_v5  ;;  %v1997_v19 = vmul.f32 %v1944_v1, %v1955_v6  ;;  %v2013_v24 = vmul.f32 %v1944_v1, %v1958_v7 }
  0x14   : > { %v1976_v13 = vld [vmem:[%s1941_s16 + $0x68] sm:$0xff]  ;;  %v1979_v14 = vld [vmem:[%s1941_s16 + $0x78] sm:$0xff]  ;;  %v1982_v15 = vld [vmem:[%s1941_s16 + $0x80] sm:$0xff]  ;;  %v2017_v25 = vmul.f32 %v1944_v1, %v1964_v9  ;;  %v2021_v26 = vmul.f32 %v1944_v1, %v1967_v10  ;;  %v2025_v27 = vmul.f32 %v1944_v1, %v1970_v11 }
  0x15   : > { %3649 = vst [vmem:[#allocation2_spill] sm:$0xff] %v1976_v13  ;;  %v2000_v20 = vld [vmem:[%s1941_s16 + $0x90] sm:$0xff]  ;;  %v2003_v21 = vld [vmem:[%s1941_s16 + $0x98] sm:$0xff]  ;;  %v2006_v22 = vld [vmem:[%s1941_s16 + $0xa8] sm:$0xff]  ;;  %v2032_v29 = vmul.f32 %v1944_v1, %v1976_v13  ;;  %v2036_v30 = vmul.f32 %v1944_v1, %v1979_v14  ;;  %v2040_v31 = vmul.f32 %v1944_v1, %v1982_v15 }
  0x16   : > { %3650 = vst [vmem:[#allocation3_spill] sm:$0xff] %v1979_v14  ;;  %v2028_v28 = vld [vmem:[%s1941_s16 + $0xb0] sm:$0xff]  ;;  %v2044_v32 = vmul.f32 %v1944_v1, %v2000_v20  ;;  %v2048_v33 = vmul.f32 %v1944_v1, %v2003_v21  ;;  %v2052_v34 = vmul.f32 %v1944_v1, %v2006_v22  ;;  %v2055_v35 = vld [vmem:[%s1941_s16 + $0xc0] sm:$0xff]  ;;  %v2062_v37 = vld [vmem:[%s1941_s16 + $0xc8] sm:$0xff] }
  0x17   : > { %3651 = vst [vmem:[#allocation4_spill] sm:$0xff] %v1982_v15  ;;  %v2059_v36 = vmul.f32 %v1944_v1, %v2028_v28  ;;  %v2065_v38 = vld [vmem:[%s1941_s16 + $0xd8] sm:$0xff]  ;;  %v2068_v39 = vld [vmem:[%s1941_s16 + $0xe0] sm:$0xff]  ;;  %v2071_v40 = vld [vmem:[%s1941_s16 + $0xf0] sm:$0xff]  ;;  %v2078_v42 = vmul.f32 %v1944_v1, %v2055_v35  ;;  %v2091_v46 = vmul.f32 %v1944_v1, %v2062_v37 }
  0x18   : > { %3652 = vst [vmem:[#allocation5_spill] sm:$0xff] %v2000_v20  ;;  %v2074_v41 = vld [vmem:[%s1941_s16 + $0xf8] sm:$0xff]  ;;  %v2081_v43 = vld [vmem:[%s1941_s16 + $0x108] sm:$0xff]  ;;  %v2084_v44 = vld [vmem:[%s1941_s16 + $0x110] sm:$0xff]  ;;  %v2104_v50 = vmul.f32 %v1944_v1, %v2065_v38  ;;  %v2108_v51 = vmul.f32 %v1944_v1, %v2068_v39  ;;  %v2112_v52 = vmul.f32 %v1944_v1, %v2071_v40 }
  0x19   : > { %3653 = vst [vmem:[#allocation6_spill] sm:$0xff] %v2003_v21  ;;  %v2087_v45 = vld [vmem:[%s1941_s16 + $0x120] sm:$0xff]  ;;  %v2094_v47 = vld [vmem:[%s1941_s16 + $0x128] sm:$0xff]  ;;  %v2097_v48 = vld [vmem:[%s1941_s16 + $0x138] sm:$0xff]  ;;  %v2125_v56 = vmul.f32 %v1944_v1, %v2074_v41  ;;  %v2129_v57 = vmul.f32 %v1944_v1, %v2081_v43  ;;  %v2133_v58 = vmul.f32 %v1944_v1, %v2084_v44 }
  0x1a   : > { %3654 = vst [vmem:[#allocation7_spill] sm:$0xff] %v2006_v22  ;;  %v2100_v49 = vld [vmem:[%s1941_s16 + $0x140] sm:$0xff]  ;;  %v2115_v53 = vld [vmem:[%s1941_s16 + $0x150] sm:$0xff]  ;;  %v2118_v54 = vld [vmem:[%s1941_s16 + $0x158] sm:$0xff]  ;;  %v2137_v59 = vmul.f32 %v1944_v1, %v2087_v45  ;;  %v2144_v61 = vmul.f32 %v1944_v1, %v2094_v47  ;;  %v2148_v62 = vmul.f32 %v1944_v1, %v2097_v48 }
  0x1b   : > { %3655 = vst [vmem:[#allocation8_spill] sm:$0xff] %v2028_v28  ;;  %v2121_v55 = vld [vmem:[%s1941_s16 + $0x168] sm:$0xff]  ;;  %v2140_v60 = vld [vmem:[%s1941_s16 + $0x170] sm:$0xff]  ;;  %v2152_v63 = vmul.f32 %v1944_v1, %v2100_v49  ;;  %v2156_v2 = vmul.f32 %v1944_v1, %v2115_v53  ;;  %v2160_v3 = vmul.f32 %v1944_v1, %v2118_v54  ;;  %v2214_v21 = vld [vmem:[%s1941_s16 + $0x99] sm:$0xff] }
  0x1c   : > { %3656 = vst [vmem:[#allocation9_spill] sm:$0xff] %v2055_v35  ;;  %v2211_v22 = vld [vmem:[%s1941_s16 + $0x91] sm:$0xff] }
  0x1d   : > { %3657 = vst [vmem:[#allocation10_spill] sm:$0xff] %v2062_v37  ;;  %v2202_v37 = vld [vmem:[%s1941_s16 + $0x81] sm:$0xff] }
  0x1e   : > { %3658 = vst [vmem:[#allocation11_spill] sm:$0xff] %v2065_v38  ;;  %v2199_v38 = vld [vmem:[%s1941_s16 + $0x79] sm:$0xff] }
  0x1f   : > { %3659 = vst [vmem:[#allocation12_spill] sm:$0xff] %v2068_v39  ;;  %v2196_v39 = vld [vmem:[%s1941_s16 + $0x69] sm:$0xff] }
  0x20   : > { %3660 = vst [vmem:[#allocation13_spill] sm:$0xff] %v2071_v40  ;;  %v2189_v40 = vld [vmem:[%s1941_s16 + $0x51] sm:$0xff]  ;;  %v413_v13 = vmul.f32 %v1985_v16, %v2196_v39 }
  0x21   : > { %3661 = vst [vmem:[#allocation14_spill] sm:$0xff] %v2074_v41  ;;  %v2186_v41 = vld [vmem:[%s1941_s16 + $0x49] sm:$0xff] }
  0x22   : > { %3662 = vst [vmem:[#allocation15_spill] sm:$0xff] %v2081_v43  ;;  %v2182_v43 = vld [vmem:[%s1941_s16 + $0x39] sm:$0xff]  ;;  %v410_v15 = vmul.f32 %v1985_v16, %v2186_v41 }
  0x23   : > { %3663 = vst [vmem:[#allocation16_spill] sm:$0xff] %v2084_v44  ;;  %v2173_v44 = vld [vmem:[%s1941_s16 + $0x19] sm:$0xff]  ;;  %v409_v20 = vmul.f32 %v1985_v16, %v2182_v43 }
  0x24   : > { %3664 = vst [vmem:[#allocation17_spill] sm:$0xff] %v2087_v45  ;;  %v372_v45 = vld [vmem:[%s1941_s16 + $0x9] sm:$0xff]  ;;  %v406_v35 = vmul.f32 %v1985_v16, %v2173_v44 }
  0x25   : > { %3665 = vst [vmem:[#allocation18_spill] sm:$0xff] %v2094_v47  ;;  %v2164_v47 = vmul.f32 %v1944_v1, %v2121_v55 }
  0x26   : > { %3666 = vst [vmem:[#allocation19_spill] sm:$0xff] %v2097_v48  ;;  %v371_v48 = vld [vmem:[%s1941_s16 + $0x1] sm:$0xff] }
  0x27   : > { %3667 = vst [vmem:[#allocation20_spill] sm:$0xff] %v2100_v49  ;;  %v2169_v49 = vmul.f32 %v1944_v1, %v2140_v60  ;;  %v2192_v1 = vld [vmem:[%s1941_s16 + $0x61] sm:$0xff] }
  0x28   : > { %3668 = vst [vmem:[#allocation21_spill] sm:$0xff] %v2115_v53  ;;  %v2176_v53 = vld [vmem:[%s1941_s16 + $0x21] sm:$0xff] }
  0x29   : > { %3669 = vst [vmem:[#allocation22_spill] sm:$0xff] %v2118_v54  ;;  %v2179_v54 = vld [vmem:[%s1941_s16 + $0x31] sm:$0xff] }
  0x2a   : > { %3670 = vst [vmem:[#allocation23_spill] sm:$0xff] %v2121_v55  ;;  %v404_v55 = vmul.f32 %v1985_v16, %v371_v48  ;;  %v407_v48 = vmul.f32 %v1985_v16, %v2176_v53  ;;  %v408_v28 = vmul.f32 %v1985_v16, %v2179_v54 }
  0x2b   : > { %3671 = vst [vmem:[#allocation24_spill] sm:$0xff] %v2140_v60  ;;  %v405_v60 = vmul.f32 %v1985_v16, %v372_v45  ;;  %v2217_v45 = vld [vmem:[%s1941_s16 + $0xa9] sm:$0xff] }
  0x2c   : > { %3672 = vst [vmem:[#allocation25_spill] sm:$0xff] %v2173_v44  ;;  %v411_v44 = vmul.f32 %v1985_v16, %v2189_v40  ;;  %v2231_v14 = vadd.f32 %v404_v55, %v1961_v8  ;;  %v417_v8 = vmul.f32 %v1985_v16, %v2214_v21  ;;  %v418_v55 = vmul.f32 %v1985_v16, %v2217_v45 }
  0x2d   : > { %3673 = vst [vmem:[#allocation26_spill] sm:$0xff] %v2176_v53  ;;  %v2228_v53 = vld [vmem:[%s1941_s16 + $0xb1] sm:$0xff] }
  0x2e   : > { %3674 = vst [vmem:[#allocation27_spill] sm:$0xff] %v2179_v54  ;;  %v412_v54 = vmul.f32 %v1985_v16, %v2192_v1 }
  0x2f   : > { %3675 = vst [vmem:[#allocation28_spill] sm:$0xff] %v2182_v43  ;;  %v414_v43 = vmul.f32 %v1985_v16, %v2199_v38 }
  0x30   : > { %3676 = vst [vmem:[#allocation29_spill] sm:$0xff] %v2186_v41  ;;  %v415_v41 = vmul.f32 %v1985_v16, %v2202_v37 }
  0x31   : > { %3677 = vst [vmem:[#allocation30_spill] sm:$0xff] %v2189_v40  ;;  %v2240_v40 = vadd.f32 %v405_v60, %v1973_v12  ;;  %v2258_v12 = vadd.f32 %v408_v28, %v1997_v19  ;;  %v419_v60 = vmul.f32 %v1985_v16, %v2228_v53  ;;  %v2278_v19 = vadd.f32 %v412_v54, %v2025_v27  ;;  %v2281_v28 = vld [vmem:[%s1941_s16 + $0xe1] sm:$0xff]  ;;  %v2304_v27 = vld [vmem:[%s1941_s16 + $0x111] sm:$0xff] }
  0x32   : > { %3678 = vst [vmem:[#allocation31_spill] sm:$0xff] %v2192_v1  ;;  %v416_v1 = vmul.f32 %v1985_v16, %v2211_v22  ;;  %v2327_v54 = vld [vmem:[%s1941_s16 + $0x141] sm:$0xff] }
  0x33   : > { %3679 = vst [vmem:[#allocation32_spill] sm:$0xff] %v2196_v39  ;;  %v2249_v39 = vld [vmem:[%s1941_s16 + $0xc1] sm:$0xff] }
  0x34   : > { %3680 = vst [vmem:[#allocation33_spill] sm:$0xff] %v2199_v38  ;;  %v2252_v38 = vadd.f32 %v406_v35, %v1989_v17  ;;  %v2272_v17 = vadd.f32 %v410_v15, %v2017_v25  ;;  %v2284_v35 = vld [vmem:[%s1941_s16 + $0xf1] sm:$0xff]  ;;  %v2293_v15 = vadd.f32 %v414_v43, %v2036_v30  ;;  %v420_v25 = vmul.f32 %v1985_v16, %v2249_v39  ;;  %v2324_v43 = vld [vmem:[%s1941_s16 + $0x139] sm:$0xff] }
  0x35   : > { %3681 = vst [vmem:[#allocation34_spill] sm:$0xff] %v2202_v37  ;;  %v2255_v37 = vadd.f32 %v407_v48, %v1993_v18  ;;  %v2275_v18 = vadd.f32 %v411_v44, %v2021_v26  ;;  %v2287_v48 = vld [vmem:[%s1941_s16 + $0xf9] sm:$0xff]  ;;  %v2301_v26 = vld [vmem:[%s1941_s16 + $0x109] sm:$0xff]  ;;  %v2307_v44 = vld [vmem:[%s1941_s16 + $0x121] sm:$0xff]  ;;  %v2316_v30 = vadd.f32 %v418_v55, %v2052_v34  ;;  %v424_v34 = vmul.f32 %v1985_v16, %v2284_v35 }
  0x36   : > { %3682 = vst [vmem:[#allocation35_spill] sm:$0xff] %v2211_v22  ;;  %v2269_v22 = vadd.f32 %v409_v20, %v2013_v24  ;;  %v2290_v20 = vadd.f32 %v413_v13, %v2032_v29  ;;  %v2296_v24 = vadd.f32 %v415_v41, %v2040_v31  ;;  %v2310_v13 = vadd.f32 %v416_v1, %v2044_v32  ;;  %v2321_v41 = vld [vmem:[%s1941_s16 + $0x129] sm:$0xff]  ;;  %v2339_v1 = vld [vmem:[%s1941_s16 + $0x151] sm:$0xff] }
  0x37   : > { %3683 = vst [vmem:[#allocation36_spill] sm:$0xff] %v2214_v21  ;;  %v2263_v21 = vld [vmem:[%s1941_s16 + $0xc9] sm:$0xff]  ;;  %v2313_v29 = vadd.f32 %v417_v8, %v2048_v33  ;;  %v423_v33 = vmul.f32 %v1985_v16, %v2281_v28  ;;  %v2342_v8 = vld [vmem:[%s1941_s16 + $0x159] sm:$0xff] }
  0x38   : > { %3684 = vst [vmem:[#allocation37_spill] sm:$0xff] %v2217_v45  ;;  %v2266_v45 = vld [vmem:[%s1941_s16 + $0xd9] sm:$0xff]  ;;  %v421_v31 = vmul.f32 %v1985_v16, %v2263_v21  ;;  %v2345_v55 = vld [vmem:[%s1941_s16 + $0x169] sm:$0xff] }
  0x39   : > { %3685 = vst [vmem:[#allocation38_spill] sm:$0xff] %v2228_v53  ;;  %v422_v32 = vmul.f32 %v1985_v16, %v2266_v45  ;;  %v429_v53 = vmul.f32 %v1985_v16, %v2321_v41 }
  0x3a   : > { %3686 = vst [vmem:[#allocation39_spill] sm:$0xff] %v2249_v39  ;;  %v2330_v39 = vadd.f32 %v419_v60, %v2059_v36  ;;  %v425_v36 = vmul.f32 %v1985_v16, %v2287_v48  ;;  %v426_v60 = vmul.f32 %v1985_v16, %v2301_v26 }
  0x3b   : > { %3687 = vst [vmem:[#allocation40_spill] sm:$0xff] %v2263_v21  ;;  %v2359_v21 = vadd.f32 %v420_v25, %v2078_v42  ;;  %v433_v42 = vmul.f32 %v1985_v16, %v2342_v8  ;;  %v434_v25 = vmul.f32 %v1985_v16, %v2345_v55 }
  0x3c   : > { %3688 = vst [vmem:[#allocation41_spill] sm:$0xff] %v2266_v45  ;;  %v427_v45 = vmul.f32 %v1985_v16, %v2304_v27 }
  0x3d   : > { %3689 = vst [vmem:[#allocation42_spill] sm:$0xff] %v2281_v28  ;;  %v2356_v28 = vld [vmem:[%s1941_s16 + $0x171] sm:$0xff] }
  0x3e   : > { %3690 = vst [vmem:[#allocation43_spill] sm:$0xff] %v2284_v35  ;;  %v428_v35 = vmul.f32 %v1985_v16, %v2307_v44 }
  0x3f   : > { %3691 = vst [vmem:[#allocation44_spill] sm:$0xff] %v2287_v48  ;;  %v430_v48 = vmul.f32 %v1985_v16, %v2324_v43 }
  0x40   : > { %3692 = vst [vmem:[#allocation45_spill] sm:$0xff] %v2301_v26  ;;  %v431_v26 = vmul.f32 %v1985_v16, %v2327_v54 }
  0x41   : > { %3693 = vst [vmem:[#allocation46_spill] sm:$0xff] %v2304_v27  ;;  %v2368_v27 = vadd.f32 %v421_v31, %v2091_v46  ;;  %v2384_v46 = vadd.f32 %v424_v34, %v2112_v52  ;;  %v435_v31 = vmul.f32 %v1985_v16, %v2356_v28  ;;  %v2402_v52 = vadd.f32 %v428_v35, %v2137_v59  ;;  %v2427_v35 = vld [vmem:[%s1941_s16 + $0x52] sm:$0xff]  ;;  %v2430_v34 = vld [vmem:[%s1941_s16 + $0x62] sm:$0xff] }
  0x42   : > { %3694 = vst [vmem:[#allocation47_spill] sm:$0xff] %v2307_v44  ;;  %v432_v44 = vmul.f32 %v1985_v16, %v2339_v1  ;;  %v2408_v16 = vld [vmem:[%s1941_s16 + $0x32] sm:$0xff] }
  0x43   : > { %3695 = vst [vmem:[#allocation48_spill] sm:$0xff] %v2321_v41  ;;  %v532_v41 = vld [vmem:[%s1941_s16 + $0x2] sm:$0xff] }
  0x44   : > { %3696 = vst [vmem:[#allocation49_spill] sm:$0xff] %v2324_v43  ;;  %v2378_v43 = vadd.f32 %v422_v32, %v2104_v50  ;;  %v2396_v50 = vadd.f32 %v426_v60, %v2129_v57  ;;  %v2405_v32 = vld [vmem:[%s1941_s16 + $0x22] sm:$0xff]  ;;  %v2417_v57 = vadd.f32 %v430_v48, %v2148_v62  ;;  %v565_v59 = vmul.f32 %v2009_v23, %v532_v41  ;;  %v2443_v48 = vld [vmem:[%s1941_s16 + $0x6a] sm:$0xff] }
  0x45   : > { %3697 = vst [vmem:[#allocation50_spill] sm:$0xff] %v2327_v54  ;;  %v2381_v54 = vadd.f32 %v423_v33, %v2108_v51  ;;  %v2399_v51 = vadd.f32 %v427_v45, %v2133_v58  ;;  %v2411_v33 = vld [vmem:[%s1941_s16 + $0x3a] sm:$0xff]  ;;  %v2420_v58 = vadd.f32 %v431_v26, %v2152_v63  ;;  %v2424_v45 = vld [vmem:[%s1941_s16 + $0x4a] sm:$0xff]  ;;  %v2439_v62 = vadd.f32 %v434_v25, %v2164_v47  ;;  %v2449_v41 = vld [vmem:[%s1941_s16 + $0x82] sm:$0xff] }
  0x46   : > { %3698 = vst [vmem:[#allocation51_spill] sm:$0xff] %v2339_v1  ;;  %v2390_v1 = vld [vmem:[%s1941_s16 + $0x1a] sm:$0xff]  ;;  %v569_v47 = vmul.f32 %v2009_v23, %v2408_v16  ;;  %v2467_v60 = vld [vmem:[%s1941_s16 + $0xaa] sm:$0xff]  ;;  %v572_v25 = vmul.f32 %v2009_v23, %v2427_v35 }
  0x47   : > { %3699 = vst [vmem:[#allocation52_spill] sm:$0xff] %v2342_v8  ;;  %v533_v8 = vld [vmem:[%s1941_s16 + $0xa] sm:$0xff]  ;;  %v2446_v26 = vld [vmem:[%s1941_s16 + $0x7a] sm:$0xff] }
  0x48   : > { %3700 = vst [vmem:[#allocation53_spill] sm:$0xff] %v2345_v55  ;;  %v2393_v55 = vadd.f32 %v425_v36, %v2125_v56  ;;  %v2414_v56 = vadd.f32 %v429_v53, %v2144_v61  ;;  %v2433_v53 = vadd.f32 %v432_v44, %v2156_v2  ;;  %v2436_v61 = vadd.f32 %v433_v42, %v2160_v3  ;;  %v2461_v44 = vld [vmem:[%s1941_s16 + $0x92] sm:$0xff] }
  0x49   : > { %3701 = vst [vmem:[#allocation54_spill] sm:$0xff] %v2356_v28  ;;  %v566_v63 = vmul.f32 %v2009_v23, %v533_v8  ;;  %v2452_v36 = vadd.f32 %v435_v31, %v2169_v49  ;;  %v567_v2 = vmul.f32 %v2009_v23, %v2390_v1  ;;  %v568_v3 = vmul.f32 %v2009_v23, %v2405_v32  ;;  %v2464_v8 = vld [vmem:[%s1941_s16 + $0x9a] sm:$0xff] }
  0x4a   : > { %3702 = vst [vmem:[#allocation55_spill] sm:$0xff] %v2390_v1  ;;  %v570_v49 = vmul.f32 %v2009_v23, %v2411_v33  ;;  %v571_v42 = vmul.f32 %v2009_v23, %v2424_v45  ;;  %v573_v31 = vmul.f32 %v2009_v23, %v2430_v34  ;;  %v574_v1 = vmul.f32 %v2009_v23, %v2443_v48 }
  0x4b   : > { %3703 = vst [vmem:[#allocation56_spill] sm:$0xff] %v2405_v32  ;;  %v2481_v32 = vadd.f32 %v565_v59, %v2231_v14  ;;  %v578_v14 = vmul.f32 %v2009_v23, %v2464_v8  ;;  %v579_v59 = vmul.f32 %v2009_v23, %v2467_v60 }
  0x4c   : > { %3704 = vst [vmem:[#allocation57_spill] sm:$0xff] %v2408_v16  ;;  %v2478_v16 = vld [vmem:[%s1941_s16 + $0xb2] sm:$0xff] }
  0x4d   : > { %3705 = vst [vmem:[#allocation58_spill] sm:$0xff] %v2411_v33  ;;  %v575_v33 = vmul.f32 %v2009_v23, %v2446_v26 }
  0x4e   : > { %3706 = vst [vmem:[#allocation59_spill] sm:$0xff] %v2424_v45  ;;  %v576_v45 = vmul.f32 %v2009_v23, %v2449_v41 }
  0x4f   : > { %3707 = vst [vmem:[#allocation60_spill] sm:$0xff] %v2427_v35  ;;  %v2490_v35 = vadd.f32 %v566_v63, %v2240_v40  ;;  %v2508_v40 = vadd.f32 %v569_v47, %v2258_v12  ;;  %v580_v63 = vmul.f32 %v2009_v23, %v2478_v16  ;;  %v2528_v12 = vadd.f32 %v573_v31, %v2278_v19  ;;  %v2537_v47 = vld [vmem:[%s1941_s16 + $0xfa] sm:$0xff]  ;;  %v2577_v31 = vld [vmem:[%s1941_s16 + $0x142] sm:$0xff] }
  0x50   : > { %3708 = vst [vmem:[#allocation61_spill] sm:$0xff] %v2430_v34  ;;  %v577_v34 = vmul.f32 %v2009_v23, %v2461_v44 }
  0x51   : > { %3709 = vst [vmem:[#allocation62_spill] sm:$0xff] %v2443_v48  ;;  %v2499_v48 = vld [vmem:[%s1941_s16 + $0xc2] sm:$0xff] }
  0x52   : > { %3710 = vst [vmem:[#allocation63_spill] sm:$0xff] %v2446_v26  ;;  %v2502_v26 = vadd.f32 %v567_v2, %v2252_v38  ;;  %v2522_v38 = vadd.f32 %v571_v42, %v2272_v17  ;;  %v2531_v2 = vld [vmem:[%s1941_s16 + $0xe2] sm:$0xff]  ;;  %v2543_v17 = vadd.f32 %v575_v33, %v2293_v15  ;;  %v581_v19 = vmul.f32 %v2009_v23, %v2499_v48  ;;  %v2554_v42 = vld [vmem:[%s1941_s16 + $0x112] sm:$0xff]  ;;  %v2571_v33 = vld [vmem:[%s1941_s16 + $0x12a] sm:$0xff] }
  0x53   : > { %3711 = vst [vmem:[#allocation64_spill] sm:$0xff] %v2449_v41  ;;  %v2505_v41 = vadd.f32 %v568_v3, %v2255_v37  ;;  %v2525_v37 = vadd.f32 %v572_v25, %v2275_v18  ;;  %v2534_v3 = vld [vmem:[%s1941_s16 + $0xf2] sm:$0xff]  ;;  %v2546_v18 = vadd.f32 %v576_v45, %v2296_v24  ;;  %v2557_v25 = vld [vmem:[%s1941_s16 + $0x122] sm:$0xff]  ;;  %v2563_v15 = vadd.f32 %v578_v14, %v2313_v29  ;;  %v2574_v45 = vld [vmem:[%s1941_s16 + $0x13a] sm:$0xff] }
  0x54   : > { %3712 = vst [vmem:[#allocation65_spill] sm:$0xff] %v2461_v44  ;;  %v2519_v44 = vadd.f32 %v570_v49, %v2269_v22  ;;  %v2540_v22 = vadd.f32 %v574_v1, %v2290_v20  ;;  %v2551_v49 = vld [vmem:[%s1941_s16 + $0x10a] sm:$0xff]  ;;  %v2560_v20 = vadd.f32 %v577_v34, %v2310_v13  ;;  %v2566_v24 = vadd.f32 %v579_v59, %v2316_v30  ;;  %v2589_v34 = vld [vmem:[%s1941_s16 + $0x152] sm:$0xff]  ;;  %v2592_v14 = vld [vmem:[%s1941_s16 + $0x15a] sm:$0xff] }
  0x55   : > { %3713 = vst [vmem:[#allocation66_spill] sm:$0xff] %v2464_v8  ;;  %v2513_v8 = vld [vmem:[%s1941_s16 + $0xca] sm:$0xff]  ;;  %v584_v29 = vmul.f32 %v2009_v23, %v2531_v2  ;;  %v585_v30 = vmul.f32 %v2009_v23, %v2534_v3 }
  0x56   : > { %3714 = vst [vmem:[#allocation67_spill] sm:$0xff] %v2467_v60  ;;  %v2516_v60 = vld [vmem:[%s1941_s16 + $0xda] sm:$0xff]  ;;  %v582_v1 = vmul.f32 %v2009_v23, %v2513_v8  ;;  %v2595_v59 = vld [vmem:[%s1941_s16 + $0x16a] sm:$0xff] }
  0x57   : > { %3715 = vst [vmem:[#allocation68_spill] sm:$0xff] %v2478_v16  ;;  %v583_v13 = vmul.f32 %v2009_v23, %v2516_v60  ;;  %v591_v16 = vmul.f32 %v2009_v23, %v2574_v45  ;;  %v2633_v28 = vadd.f32 %v584_v29, %v2381_v54 }
  0x58   : > { %3716 = vst [vmem:[#allocation69_spill] sm:$0xff] %v2499_v48  ;;  %v2580_v48 = vadd.f32 %v580_v63, %v2330_v39  ;;  %v586_v39 = vmul.f32 %v2009_v23, %v2537_v47  ;;  %v587_v63 = vmul.f32 %v2009_v23, %v2551_v49 }
  0x59   : > { %3717 = vst [vmem:[#allocation70_spill] sm:$0xff] %v2513_v8  ;;  %v590_v8 = vmul.f32 %v2009_v23, %v2571_v33  ;;  %v2654_v54 = vadd.f32 %v591_v16, %v2417_v57 }
  0x5a   : > { %3718 = vst [vmem:[#allocation71_spill] sm:$0xff] %v2516_v60  ;;  %v588_v60 = vmul.f32 %v2009_v23, %v2554_v42 }
  0x5b   : > { %3719 = vst [vmem:[#allocation72_spill] sm:$0xff] %v2531_v2  ;;  %v589_v2 = vmul.f32 %v2009_v23, %v2557_v25 }
  0x5c   : > { %3720 = vst [vmem:[#allocation73_spill] sm:$0xff] %v2534_v3  ;;  %v2606_v3 = vadd.f32 %v581_v19, %v2359_v21  ;;  %v595_v21 = vmul.f32 %v2009_v23, %v2595_v59  ;;  %v2624_v19 = vld [vmem:[%s1941_s16 + $0x172] sm:$0xff] }
  0x5d   : > { %3721 = vst [vmem:[#allocation74_spill] sm:$0xff] %v2537_v47  ;;  %v2613_v47 = vperm.slane %v1936_v0, 3 }
  0x5e   : > { %3722 = vst [vmem:[#allocation75_spill] sm:$0xff] %v2551_v49  ;;  %v592_v49 = vmul.f32 %v2009_v23, %v2577_v31 }
  0x5f   : > { %3723 = vst [vmem:[#allocation76_spill] sm:$0xff] %v2554_v42  ;;  %v593_v42 = vmul.f32 %v2009_v23, %v2589_v34  ;;  %v728_v16 = vmul.f32 %v2613_v47, %v1952_v5  ;;  %v731_v57 = vmul.f32 %v2613_v47, %v1964_v9  ;;  %v2687_v5 = vperm.slane %v1936_v0, 4 }
  0x60   : > { %3724 = vst [vmem:[#allocation77_spill] sm:$0xff] %v2557_v25  ;;  %v594_v25 = vmul.f32 %v2009_v23, %v2592_v14 }
  0x61   : > { %3725 = vst [vmem:[#allocation78_spill] sm:$0xff] %v2571_v33  ;;  %v2627_v33 = vadd.f32 %v582_v1, %v2368_v27  ;;  %v2648_v27 = vadd.f32 %v589_v2, %v2402_v52  ;;  %v3734_v2 = vld [vmem:[#allocation5_spill] sm:$0xff] }
  0x62   : > { %3726 = vst [vmem:[#allocation79_spill] sm:$0xff] %v2574_v45  ;;  %v2630_v45 = vadd.f32 %v583_v13, %v2378_v43  ;;  %v2651_v43 = vadd.f32 %v590_v8, %v2414_v56  ;;  %v2667_v52 = vadd.f32 %v594_v25, %v2436_v61  ;;  %v2670_v56 = vadd.f32 %v595_v21, %v2439_v62  ;;  %v3731_v61 = vld [vmem:[#allocation2_spill] sm:$0xff]  ;;  %v3732_v8 = vld [vmem:[#allocation3_spill] sm:$0xff] }
  0x63   : > { %3727 = vst [vmem:[#allocation80_spill] sm:$0xff] %v2577_v31  ;;  %v2636_v31 = vadd.f32 %v585_v30, %v2384_v46  ;;  %v596_v46 = vmul.f32 %v2009_v23, %v2624_v19  ;;  %v729_v23 = vmul.f32 %v2613_v47, %v1955_v6  ;;  %v734_v62 = vmul.f32 %v2613_v47, %v3731_v61 }
  0x64   : > { %3728 = vst [vmem:[#allocation81_spill] sm:$0xff] %v2589_v34  ;;  %v2639_v34 = vadd.f32 %v586_v39, %v2393_v55  ;;  %v727_v55 = vmul.f32 %v2613_v47, %v1949_v4  ;;  %v730_v4 = vmul.f32 %v2613_v47, %v1958_v7  ;;  %v735_v9 = vmul.f32 %v2613_v47, %v3732_v8  ;;  %v3744_v8 = vld [vmem:[#allocation15_spill] sm:$0xff] }
  0x65   : > { %3729 = vst [vmem:[#allocation82_spill] sm:$0xff] %v2592_v14  ;;  %v2642_v14 = vadd.f32 %v587_v63, %v2396_v50  ;;  %v2661_v50 = vadd.f32 %v592_v49, %v2420_v58  ;;  %v732_v58 = vmul.f32 %v2613_v47, %v1967_v10  ;;  %v2690_v6 = vadd.f32 %v596_v46, %v2452_v36  ;;  %v3736_v36 = vld [vmem:[#allocation7_spill] sm:$0xff] }
  0x66   : > { %3730 = vst [vmem:[#allocation83_spill] sm:$0xff] %v2595_v59  ;;  %v2645_v59 = vadd.f32 %v588_v60, %v2399_v51  ;;  %v2664_v51 = vadd.f32 %v593_v42, %v2433_v53  ;;  %v733_v53 = vmul.f32 %v2613_v47, %v1970_v11  ;;  %v2693_v7 = vadd.f32 %v727_v55, %v2481_v32  ;;  %v3733_v60 = vld [vmem:[#allocation4_spill] sm:$0xff]  ;;  %v3735_v42 = vld [vmem:[#allocation6_spill] sm:$0xff] }
  0x67   : > { %v2698_v10 = vperm.slane %v1936_v0, 5  ;;  %v736_v11 = vmul.f32 %v2613_v47, %v3733_v60  ;;  %v737_v49 = vmul.f32 %v2613_v47, %v3734_v2  ;;  %v738_v25 = vmul.f32 %v2613_v47, %v3735_v42  ;;  %v3746_v60 = vld [vmem:[#allocation17_spill] sm:$0xff]  ;;  %v3747_v2 = vld [vmem:[#allocation18_spill] sm:$0xff] }
  0x68   : > { %v739_v1 = vmul.f32 %v2613_v47, %v3736_v36  ;;  %v2709_v32 = vadd.f32 %v728_v16, %v2490_v35  ;;  %v2712_v13 = vadd.f32 %v729_v23, %v2502_v26  ;;  %v2715_v29 = vadd.f32 %v730_v4, %v2505_v41  ;;  %v3737_v35 = vld [vmem:[#allocation8_spill] sm:$0xff]  ;;  %v3738_v41 = vld [vmem:[#allocation9_spill] sm:$0xff] }
  0x69   : > { %v2718_v30 = vadd.f32 %v731_v57, %v2508_v40  ;;  %v2721_v39 = vadd.f32 %v732_v58, %v2519_v44  ;;  %v2724_v63 = vadd.f32 %v733_v53, %v2522_v38  ;;  %v2727_v21 = vadd.f32 %v734_v62, %v2525_v37  ;;  %v3739_v40 = vld [vmem:[#allocation10_spill] sm:$0xff]  ;;  %v3740_v44 = vld [vmem:[#allocation11_spill] sm:$0xff]  ;;  %v3741_v57 = vld [vmem:[#allocation12_spill] sm:$0xff] }
  0x6a   : > { %v740_v46 = vmul.f32 %v2613_v47, %v3737_v35  ;;  %v2732_v26 = vadd.f32 %v735_v9, %v2528_v12  ;;  %v741_v55 = vmul.f32 %v2613_v47, %v3738_v41  ;;  %v742_v16 = vmul.f32 %v2613_v47, %v3739_v40  ;;  %v3742_v53 = vld [vmem:[#allocation13_spill] sm:$0xff]  ;;  %v3743_v62 = vld [vmem:[#allocation14_spill] sm:$0xff]  ;;  %v3745_v9 = vld [vmem:[#allocation16_spill] sm:$0xff] }
  0x6b   : > { %v743_v23 = vmul.f32 %v2613_v47, %v3740_v44  ;;  %v2741_v38 = vadd.f32 %v736_v11, %v2540_v22  ;;  %v2744_v37 = vadd.f32 %v737_v49, %v2543_v17  ;;  %v2747_v4 = vadd.f32 %v738_v25, %v2546_v18  ;;  %v3749_v35 = vld [vmem:[#allocation20_spill] sm:$0xff]  ;;  %v3750_v41 = vld [vmem:[#allocation21_spill] sm:$0xff]  ;;  %v3751_v44 = vld [vmem:[#allocation22_spill] sm:$0xff] }
  0x6c   : > { %v2750_v12 = vadd.f32 %v739_v1, %v2560_v20  ;;  %v744_v58 = vmul.f32 %v2613_v47, %v3741_v57  ;;  %v745_v61 = vmul.f32 %v2613_v47, %v3742_v53  ;;  %v746_v22 = vmul.f32 %v2613_v47, %v3743_v62 }
  0x6d   : > { %v747_v17 = vmul.f32 %v2613_v47, %v3744_v8  ;;  %v2761_v18 = vadd.f32 %v740_v46, %v2563_v15  ;;  %v748_v20 = vmul.f32 %v2613_v47, %v3745_v9  ;;  %v749_v11 = vmul.f32 %v2613_v47, %v3746_v60  ;;  %v3748_v15 = vld [vmem:[#allocation19_spill] sm:$0xff] }
  0x6e   : > { %v750_v49 = vmul.f32 %v2613_v47, %v3747_v2  ;;  %v2770_v42 = vadd.f32 %v741_v55, %v2566_v24  ;;  %v2773_v25 = vadd.f32 %v742_v16, %v2580_v48  ;;  %v2776_v36 = vadd.f32 %v743_v23, %v2606_v3  ;;  %v3752_v24 = vld [vmem:[#allocation23_spill] sm:$0xff]  ;;  %v2789_v48 = vld [vmem:[%s1941_s16 + $0x180] sm:$0xff]  ;;  %v3757_v2 = vld [vmem:[#allocation28_spill] sm:$0xff] }
  0x6f   : > { %v751_v1 = vmul.f32 %v2613_v47, %v3748_v15  ;;  %v752_v46 = vmul.f32 %v2613_v47, %v3749_v35  ;;  %v753_v40 = vmul.f32 %v2613_v47, %v3750_v41  ;;  %v754_v57 = vmul.f32 %v2613_v47, %v3751_v44  ;;  %v2792_v16 = vld [vmem:[%s1941_s16 + $0x188] sm:$0xff] }
  0x70   : > { %v755_v55 = vmul.f32 %v2613_v47, %v3752_v24  ;;  %v2795_v3 = vadd.f32 %v744_v58, %v2627_v33  ;;  %v2798_v23 = vadd.f32 %v745_v61, %v2630_v45  ;;  %v2801_v53 = vadd.f32 %v746_v22, %v2633_v28  ;;  %v3753_v33 = vld [vmem:[#allocation24_spill] sm:$0xff] }
  0x71   : > { %v2804_v62 = vadd.f32 %v747_v17, %v2636_v31  ;;  %v2807_v8 = vadd.f32 %v748_v20, %v2639_v34  ;;  %v2810_v9 = vadd.f32 %v749_v11, %v2642_v14  ;;  %v2813_v60 = vadd.f32 %v750_v49, %v2645_v59  ;;  %v3754_v34 = vld [vmem:[#allocation25_spill] sm:$0xff]  ;;  %v3755_v17 = vld [vmem:[#allocation26_spill] sm:$0xff]  ;;  %v3756_v11 = vld [vmem:[#allocation27_spill] sm:$0xff] }
  0x72   : > { %v756_v58 = vmul.f32 %v2613_v47, %v3753_v33  ;;  %v2818_v45 = vadd.f32 %v751_v1, %v2648_v27  ;;  %v757_v28 = vmul.f32 %v2789_v48, %v2613_v47  ;;  %v758_v31 = vmul.f32 %v2792_v16, %v2613_v47 }
  0x73   : > { %v888_v61 = vmul.f32 %v2687_v5, %v3754_v34  ;;  %v2827_v14 = vadd.f32 %v752_v46, %v2651_v43  ;;  %v2830_v59 = vadd.f32 %v753_v40, %v2654_v54  ;;  %v2833_v22 = vadd.f32 %v754_v57, %v2661_v50  ;;  %v3758_v43 = vld [vmem:[#allocation29_spill] sm:$0xff]  ;;  %v3759_v50 = vld [vmem:[#allocation30_spill] sm:$0xff]  ;;  %v3761_v46 = vld [vmem:[#allocation32_spill] sm:$0xff] }
  0x74   : > { %v2836_v27 = vadd.f32 %v755_v55, %v2664_v51  ;;  %v889_v20 = vmul.f32 %v2687_v5, %v3755_v17  ;;  %v890_v47 = vmul.f32 %v2687_v5, %v3756_v11  ;;  %v891_v49 = vmul.f32 %v2687_v5, %v3757_v2  ;;  %v3760_v51 = vld [vmem:[#allocation31_spill] sm:$0xff]  ;;  %v3763_v55 = vld [vmem:[#allocation34_spill] sm:$0xff]  ;;  %v3765_v17 = vld [vmem:[#allocation36_spill] sm:$0xff] }
  0x75   : > { %v892_v15 = vmul.f32 %v2687_v5, %v3758_v43  ;;  %v2847_v54 = vadd.f32 %v756_v58, %v2667_v52  ;;  %v893_v1 = vmul.f32 %v2687_v5, %v3759_v50  ;;  %v894_v35 = vmul.f32 %v2687_v5, %v3760_v51  ;;  %v3762_v52 = vld [vmem:[#allocation33_spill] sm:$0xff]  ;;  %v3764_v58 = vld [vmem:[#allocation35_spill] sm:$0xff]  ;;  %v3771_v51 = vld [vmem:[#allocation42_spill] sm:$0xff] }
  0x76   : > { %v895_v41 = vmul.f32 %v2687_v5, %v3761_v46  ;;  %v2856_v40 = vadd.f32 %v757_v28, %v2670_v56  ;;  %v2859_v44 = vadd.f32 %v758_v31, %v2690_v6  ;;  %v2862_v57 = vadd.f32 %v888_v61, %v2693_v7  ;;  %v3766_v56 = vld [vmem:[#allocation37_spill] sm:$0xff]  ;;  %v3772_v46 = vld [vmem:[#allocation43_spill] sm:$0xff] }
  0x77   : > { %v896_v24 = vmul.f32 %v2687_v5, %v3762_v52  ;;  %v897_v33 = vmul.f32 %v2687_v5, %v3763_v55  ;;  %v898_v34 = vmul.f32 %v2687_v5, %v3764_v58  ;;  %v899_v11 = vmul.f32 %v2687_v5, %v3765_v17  ;;  %v3773_v52 = vld [vmem:[#allocation44_spill] sm:$0xff]  ;;  %v3775_v55 = vld [vmem:[#allocation46_spill] sm:$0xff] }
  0x78   : > { %v900_v28 = vmul.f32 %v2687_v5, %v3766_v56  ;;  %v2875_v6 = vadd.f32 %v889_v20, %v2709_v32  ;;  %v2878_v7 = vadd.f32 %v890_v47, %v2712_v13  ;;  %v2881_v31 = vadd.f32 %v891_v49, %v2715_v29  ;;  %v3767_v32 = vld [vmem:[#allocation38_spill] sm:$0xff]  ;;  %v3768_v29 = vld [vmem:[#allocation39_spill] sm:$0xff] }
  0x79   : > { %v2884_v61 = vadd.f32 %v892_v15, %v2718_v30  ;;  %v2887_v2 = vadd.f32 %v893_v1, %v2721_v39  ;;  %v2890_v43 = vadd.f32 %v894_v35, %v2724_v63  ;;  %v2893_v50 = vadd.f32 %v895_v41, %v2727_v21  ;;  %v3769_v30 = vld [vmem:[#allocation40_spill] sm:$0xff]  ;;  %v3770_v39 = vld [vmem:[#allocation41_spill] sm:$0xff] }
  0x7a   : > { %v901_v20 = vmul.f32 %v2687_v5, %v3767_v32  ;;  %v2898_v13 = vadd.f32 %v896_v24, %v2732_v26  ;;  %v902_v47 = vmul.f32 %v2687_v5, %v3768_v29  ;;  %v903_v49 = vmul.f32 %v2687_v5, %v3769_v30  ;;  %v3774_v24 = vld [vmem:[#allocation45_spill] sm:$0xff]  ;;  %v3780_v30 = vld [vmem:[#allocation51_spill] sm:$0xff] }
  0x7b   : > { %v904_v15 = vmul.f32 %v2687_v5, %v3770_v39  ;;  %v2907_v63 = vadd.f32 %v897_v33, %v2741_v38  ;;  %v2910_v21 = vadd.f32 %v898_v34, %v2744_v37  ;;  %v2913_v1 = vadd.f32 %v899_v11, %v2747_v4  ;;  %v3776_v33 = vld [vmem:[#allocation47_spill] sm:$0xff]  ;;  %v3777_v34 = vld [vmem:[#allocation48_spill] sm:$0xff] }
  0x7c   : > { %v2916_v26 = vadd.f32 %v900_v28, %v2750_v12  ;;  %v905_v35 = vmul.f32 %v2687_v5, %v3771_v51  ;;  %v906_v41 = vmul.f32 %v2687_v5, %v3772_v46  ;;  %v907_v38 = vmul.f32 %v2687_v5, %v3773_v52  ;;  %v3781_v51 = vld [vmem:[#allocation52_spill] sm:$0xff] }
  0x7d   : > { %v908_v37 = vmul.f32 %v2687_v5, %v3774_v24  ;;  %v2927_v4 = vadd.f32 %v901_v20, %v2761_v18  ;;  %v909_v12 = vmul.f32 %v2687_v5, %v3775_v55  ;;  %v910_v58 = vmul.f32 %v2687_v5, %v3776_v33  ;;  %v3778_v18 = vld [vmem:[#allocation49_spill] sm:$0xff]  ;;  %v3779_v20 = vld [vmem:[#allocation50_spill] sm:$0xff] }
  0x7e   : > { %v911_v17 = vmul.f32 %v2687_v5, %v3777_v34  ;;  %v2936_v11 = vadd.f32 %v902_v47, %v2770_v42  ;;  %v2939_v56 = vadd.f32 %v903_v49, %v2773_v25  ;;  %v2942_v28 = vadd.f32 %v904_v15, %v2776_v36  ;;  %v3782_v42 = vld [vmem:[#allocation53_spill] sm:$0xff]  ;;  %v2955_v25 = vld [vmem:[%s1941_s16 + $0x181] sm:$0xff]  ;;  %v2958_v49 = vld [vmem:[%s1941_s16 + $0x189] sm:$0xff] }
  0x7f   : > { %v912_v32 = vmul.f32 %v2687_v5, %v3778_v18  ;;  %v913_v29 = vmul.f32 %v2687_v5, %v3779_v20  ;;  %v914_v39 = vmul.f32 %v2687_v5, %v3780_v30  ;;  %v915_v46 = vmul.f32 %v2687_v5, %v3781_v51  ;;  %3783 = vst [vmem:[#allocation2_spill] sm:$0xff] %v2955_v25  ;;  %v3793_v30 = vld [vmem:[#allocation62_spill] sm:$0xff] }
  0x80   : > { %v916_v47 = vmul.f32 %v2687_v5, %v3782_v42  ;;  %3784 = vst [vmem:[#allocation3_spill] sm:$0xff] %v2958_v49  ;;  %v2961_v36 = vadd.f32 %v905_v35, %v2795_v3  ;;  %v2964_v15 = vadd.f32 %v906_v41, %v2798_v23  ;;  %v2967_v52 = vadd.f32 %v907_v38, %v2801_v53  ;;  %v3785_v3 = vld [vmem:[#allocation54_spill] sm:$0xff] }
  0x81   : > { %v2970_v24 = vadd.f32 %v908_v37, %v2804_v62  ;;  %v2973_v55 = vadd.f32 %v909_v12, %v2807_v8  ;;  %v2976_v33 = vadd.f32 %v910_v58, %v2810_v9  ;;  %v2979_v34 = vadd.f32 %v911_v17, %v2813_v60  ;;  %v3786_v8 = vld [vmem:[#allocation55_spill] sm:$0xff]  ;;  %v3787_v37 = vld [vmem:[#allocation56_spill] sm:$0xff]  ;;  %v3788_v58 = vld [vmem:[#allocation57_spill] sm:$0xff] }
  0x82   : > { %v917_v35 = vmul.f32 %v2687_v5, %v3785_v3  ;;  %v2984_v23 = vadd.f32 %v912_v32, %v2818_v45  ;;  %v918_v53 = vmul.f32 %v2955_v25, %v2687_v5  ;;  %v919_v62 = vmul.f32 %v2958_v49, %v2687_v5  ;;  %v3789_v17 = vld [vmem:[#allocation58_spill] sm:$0xff]  ;;  %v3795_v3 = vld [vmem:[#allocation64_spill] sm:$0xff]  ;;  %v1810_v25 = vld [vmem:[%s1941_s16 + $0x138] sm:$0xff] }
  0x83   : > { %v1049_v41 = vmul.f32 %v2698_v10, %v3786_v8  ;;  %v2993_v9 = vadd.f32 %v913_v29, %v2827_v14  ;;  %v2996_v60 = vadd.f32 %v914_v39, %v2830_v59  ;;  %v2999_v38 = vadd.f32 %v915_v46, %v2833_v22  ;;  %v3790_v14 = vld [vmem:[#allocation59_spill] sm:$0xff]  ;;  %v3791_v22 = vld [vmem:[#allocation60_spill] sm:$0xff]  ;;  %v3796_v8 = vld [vmem:[#allocation65_spill] sm:$0xff] }
  0x84   : > { %v3002_v45 = vadd.f32 %v916_v47, %v2836_v27  ;;  %v1050_v12 = vmul.f32 %v2698_v10, %v3787_v37  ;;  %v1051_v5 = vmul.f32 %v2698_v10, %v3788_v58  ;;  %v1052_v18 = vmul.f32 %v2698_v10, %v3789_v17  ;;  %v3792_v27 = vld [vmem:[#allocation61_spill] sm:$0xff]  ;;  %v3797_v58 = vld [vmem:[#allocation66_spill] sm:$0xff] }
  0x85   : > { %v1053_v32 = vmul.f32 %v2698_v10, %v3790_v14  ;;  %v3013_v59 = vadd.f32 %v917_v35, %v2847_v54  ;;  %v1054_v20 = vmul.f32 %v2698_v10, %v3791_v22  ;;  %v1055_v29 = vmul.f32 %v2698_v10, %v3792_v27  ;;  %v3794_v54 = vld [vmem:[#allocation63_spill] sm:$0xff] }
  0x86   : > { %v1056_v39 = vmul.f32 %v2698_v10, %v3793_v30  ;;  %v3022_v51 = vadd.f32 %v918_v53, %v2856_v40  ;;  %v3025_v46 = vadd.f32 %v919_v62, %v2859_v44  ;;  %v3028_v42 = vadd.f32 %v1049_v41, %v2862_v57  ;;  %v3798_v40 = vld [vmem:[#allocation67_spill] sm:$0xff] }
  0x87   : > { %v1057_v47 = vmul.f32 %v2698_v10, %v3794_v54  ;;  %v1058_v35 = vmul.f32 %v2698_v10, %v3795_v3  ;;  %v1059_v37 = vmul.f32 %v2698_v10, %v3796_v8  ;;  %v1060_v17 = vmul.f32 %v2698_v10, %v3797_v58  ;;  %v3806_v3 = vld [vmem:[#allocation75_spill] sm:$0xff]  ;;  %v3808_v8 = vld [vmem:[#allocation77_spill] sm:$0xff]  ;;  %v3809_v58 = vld [vmem:[#allocation78_spill] sm:$0xff] }
  0x88   : > { %v1061_v53 = vmul.f32 %v2698_v10, %v3798_v40  ;;  %v3041_v44 = vadd.f32 %v1050_v12, %v2875_v6  ;;  %v3044_v57 = vadd.f32 %v1051_v5, %v2878_v7  ;;  %v3047_v62 = vadd.f32 %v1052_v18, %v2881_v31  ;;  %v3799_v6 = vld [vmem:[#allocation68_spill] sm:$0xff]  ;;  %v3800_v31 = vld [vmem:[#allocation69_spill] sm:$0xff] }
  0x89   : > { %v3050_v41 = vadd.f32 %v1053_v32, %v2884_v61  ;;  %v3053_v14 = vadd.f32 %v1054_v20, %v2887_v2  ;;  %v3056_v22 = vadd.f32 %v1055_v29, %v2890_v43  ;;  %v3059_v27 = vadd.f32 %v1056_v39, %v2893_v50  ;;  %v3801_v61 = vld [vmem:[#allocation70_spill] sm:$0xff]  ;;  %v3802_v2 = vld [vmem:[#allocation71_spill] sm:$0xff]  ;;  %v3803_v29 = vld [vmem:[#allocation72_spill] sm:$0xff] }
  0x8a   : > { %v1062_v12 = vmul.f32 %v2698_v10, %v3799_v6  ;;  %v3064_v7 = vadd.f32 %v1057_v47, %v2898_v13  ;;  %v1063_v5 = vmul.f32 %v2698_v10, %v3800_v31  ;;  %v1064_v18 = vmul.f32 %v2698_v10, %v3801_v61  ;;  %v3804_v39 = vld [vmem:[#allocation73_spill] sm:$0xff]  ;;  %v3805_v47 = vld [vmem:[#allocation74_spill] sm:$0xff]  ;;  %v3810_v6 = vld [vmem:[#allocation79_spill] sm:$0xff] }
  0x8b   : > { %v1065_v32 = vmul.f32 %v2698_v10, %v3802_v2  ;;  %v3073_v43 = vadd.f32 %v1058_v35, %v2907_v63  ;;  %v3076_v50 = vadd.f32 %v1059_v37, %v2910_v21  ;;  %v3079_v20 = vadd.f32 %v1060_v17, %v2913_v1  ;;  %v3807_v35 = vld [vmem:[#allocation76_spill] sm:$0xff]  ;;  %v3812_v2 = vld [vmem:[#allocation81_spill] sm:$0xff] }
  0x8c   : > { %v3082_v13 = vadd.f32 %v1061_v53, %v2916_v26  ;;  %v1066_v30 = vmul.f32 %v2698_v10, %v3803_v29  ;;  %v1067_v54 = vmul.f32 %v2698_v10, %v3804_v39  ;;  %v1068_v63 = vmul.f32 %v2698_v10, %v3805_v47  ;;  %v3811_v31 = vld [vmem:[#allocation80_spill] sm:$0xff]  ;;  %v3813_v39 = vld [vmem:[#allocation82_spill] sm:$0xff] }
  0x8d   : > { %v1069_v21 = vmul.f32 %v2698_v10, %v3806_v3  ;;  %v3093_v1 = vadd.f32 %v1062_v12, %v2927_v4  ;;  %v1070_v26 = vmul.f32 %v2698_v10, %v3807_v35  ;;  %v1071_v37 = vmul.f32 %v2698_v10, %v3808_v8  ;;  %v1788_v35 = vld [vmem:[%s1941_s16 + $0x30] sm:$0xff]  ;;  %v1789_v8 = vld [vmem:[%s1941_s16 + $0x38] sm:$0xff] }
  0x8e   : > { %v1072_v17 = vmul.f32 %v2698_v10, %v3809_v58  ;;  %v3102_v40 = vadd.f32 %v1063_v5, %v2936_v11  ;;  %v3105_v53 = vadd.f32 %v1064_v18, %v2939_v56  ;;  %v3108_v4 = vadd.f32 %v1065_v32, %v2942_v28  ;;  %v3119_v56 = vld [vmem:[%s1941_s16 + $0x182] sm:$0xff]  ;;  %v3122_v5 = vld [vmem:[%s1941_s16 + $0x18a] sm:$0xff] }
  0x8f   : > { %v1073_v12 = vmul.f32 %v2698_v10, %v3810_v6  ;;  %v1074_v61 = vmul.f32 %v2698_v10, %v3811_v31  ;;  %v1075_v29 = vmul.f32 %v2698_v10, %v3812_v2  ;;  %v1076_v11 = vmul.f32 %v2698_v10, %v3813_v39  ;;  %3814 = vst [vmem:[#allocation4_spill] sm:$0xff] %v3119_v56  ;;  %v1792_v58 = vld [vmem:[%s1941_s16 + $0x60] sm:$0xff]  ;;  %v1854_v2 = vld [vmem:[%s1941_s16 + $0x4a] sm:$0xff] }
  0x90   : > { %3815 = vst [vmem:[#allocation5_spill] sm:$0xff] %v3122_v5  ;;  %v3125_v28 = vperm.slane %v1936_v0, 6  ;;  %v3128_v18 = vadd.f32 %v1066_v30, %v2961_v36  ;;  %v3131_v32 = vadd.f32 %v1067_v54, %v2964_v15  ;;  %v3134_v47 = vadd.f32 %v1068_v63, %v2967_v52  ;;  %v3816_v30 = vld [vmem:[#allocation83_spill] sm:$0xff]  ;;  %v1791_v63 = vld [vmem:[%s1941_s16 + $0x50] sm:$0xff] }
  0x91   : > { %v3137_v3 = vadd.f32 %v1069_v21, %v2970_v24  ;;  %v3142_v0 = vadd.f32 %v1070_v26, %v2973_v55  ;;  %v3145_v36 = vadd.f32 %v1071_v37, %v2976_v33  ;;  %v3148_v15 = vadd.f32 %v1072_v17, %v2979_v34  ;;  %v1790_v54 = vld [vmem:[%s1941_s16 + $0x48] sm:$0xff]  ;;  %v1794_v26 = vld [vmem:[%s1941_s16 + $0x78] sm:$0xff]  ;;  %v1795_v37 = vld [vmem:[%s1941_s16 + $0x80] sm:$0xff] }
  0x92   : > { %v1077_v52 = vmul.f32 %v2698_v10, %v3816_v30  ;;  %v3156_v24 = vadd.f32 %v1073_v12, %v2984_v23  ;;  %v1078_v55 = vmul.f32 %v2698_v10, %v2624_v19  ;;  %v1079_v33 = vmul.f32 %v3119_v56, %v2698_v10  ;;  %v1793_v21 = vld [vmem:[%s1941_s16 + $0x68] sm:$0xff]  ;;  %v1805_v56 = vld [vmem:[%s1941_s16 + $0xf8] sm:$0xff] }
  0x93   : > { %v1080_v34 = vmul.f32 %v3122_v5, %v2698_v10  ;;  %v3168_v17 = vadd.f32 %v1074_v61, %v2993_v9  ;;  %v3171_v23 = vadd.f32 %v1075_v29, %v2996_v60  ;;  %v3174_v19 = vadd.f32 %v1076_v11, %v2999_v38  ;;  %v3180_v12 = vld [vmem:[%s3561_s1 + $0x8] ss:$0 sm:$0xff]  ;;  %v1852_v38 = vld [vmem:[%s1941_s16 + $0x32] sm:$0xff]  ;;  %v1853_v61 = vld [vmem:[%s1941_s16 + $0x3a] sm:$0xff] }
  0x94   : > { %v1211_v6 = vmul.f32 %v1788_v35, %v3125_v28  ;;  %v1212_v10 = vmul.f32 %v1789_v8, %v3125_v28  ;;  %v1213_v9 = vmul.f32 %v1790_v54, %v3125_v28  ;;  %v1214_v60 = vmul.f32 %v1791_v63, %v3125_v28  ;;  %v1796_v8 = vld [vmem:[%s1941_s16 + $0x90] sm:$0xff]  ;;  %v1803_v5 = vld [vmem:[%s1941_s16 + $0xe0] sm:$0xff] }
  0x95   : > { %v1215_v31 = vmul.f32 %v1792_v58, %v3125_v28  ;;  %v3190_v29 = vadd.f32 %v1077_v52, %v3002_v45  ;;  %v1216_v39 = vmul.f32 %v1793_v21, %v3125_v28  ;;  %v1217_v11 = vmul.f32 %v1794_v26, %v3125_v28  ;;  %v1797_v58 = vld [vmem:[%s1941_s16 + $0x98] sm:$0xff]  ;;  %v1798_v45 = vld [vmem:[%s1941_s16 + $0xa8] sm:$0xff]  ;;  %v1799_v52 = vld [vmem:[%s1941_s16 + $0xb0] sm:$0xff] }
  0x96   : > { %v1218_v35 = vmul.f32 %v1795_v37, %v3125_v28  ;;  %v3197_v30 = vadd.f32 %v1078_v55, %v3013_v59  ;;  %v3200_v54 = vadd.f32 %v1079_v33, %v3022_v51  ;;  %v3203_v63 = vadd.f32 %v1080_v34, %v3025_v46  ;;  %v1898_v21 = vld [vmem:[%s3561_s1] sm:$0xff]  ;;  %v1801_v55 = vld [vmem:[%s1941_s16 + $0xc8] sm:$0xff]  ;;  %v1802_v46 = vld [vmem:[%s1941_s16 + $0xd8] sm:$0xff] }
  0x97   : > { %v3211_v26 = vperm.slane %v1898_v21, 7  ;;  %v3214_v59 = vadd.f32 %v1211_v6, %v3028_v42  ;;  %v1800_v51 = vld [vmem:[%s1941_s16 + $0xc0] sm:$0xff]  ;;  %v3220_v33 = vmul.f32 %v3180_v12, %v1852_v38  ;;  %v3223_v34 = vmul.f32 %v3180_v12, %v1853_v61  ;;  %v1804_v61 = vld [vmem:[%s1941_s16 + $0xf0] sm:$0xff] }
  0x98   : > { %v3226_v37 = vmul.f32 %v3180_v12, %v1854_v2  ;;  %v3229_v21 = vadd.f32 %v1212_v10, %v3041_v44  ;;  %v3232_v42 = vadd.f32 %v1213_v9, %v3044_v57  ;;  %v3235_v6 = vadd.f32 %v1214_v60, %v3047_v62  ;;  %v1806_v10 = vld [vmem:[%s1941_s16 + $0x108] sm:$0xff]  ;;  %v1807_v9 = vld [vmem:[%s1941_s16 + $0x110] sm:$0xff] }
  0x99   : > { %v3238_v38 = vadd.f32 %v1215_v31, %v3050_v41  ;;  %v3244_v2 = vadd.f32 %v1216_v39, %v3053_v14  ;;  %v3247_v44 = vadd.f32 %v1217_v11, %v3056_v22  ;;  %v3250_v57 = vadd.f32 %v1218_v35, %v3059_v27  ;;  %v1808_v41 = vld [vmem:[%s1941_s16 + $0x120] sm:$0xff]  ;;  %v1809_v39 = vld [vmem:[%s1941_s16 + $0x128] sm:$0xff] }
  0x9a   : > { %v1219_v62 = vmul.f32 %v1796_v8, %v3125_v28  ;;  %v1220_v60 = vmul.f32 %v1797_v58, %v3125_v28  ;;  %v1221_v31 = vmul.f32 %v1798_v45, %v3125_v28  ;;  %v1222_v49 = vmul.f32 %v1799_v52, %v3125_v28  ;;  %v1811_v22 = vld [vmem:[%s1941_s16 + $0x140] sm:$0xff] }
  0x9b   : > { %v1223_v14 = vmul.f32 %v1800_v51, %v3125_v28  ;;  %v1224_v11 = vmul.f32 %v1801_v55, %v3125_v28  ;;  %v1225_v27 = vmul.f32 %v1802_v46, %v3125_v28  ;;  %v1226_v35 = vmul.f32 %v1803_v5, %v3125_v28 }
  0x9c   : > { %v1227_v8 = vmul.f32 %v1804_v61, %v3125_v28  ;;  %v1228_v58 = vmul.f32 %v1805_v56, %v3125_v28  ;;  %v1229_v45 = vmul.f32 %v1806_v10, %v3125_v28  ;;  %v1230_v52 = vmul.f32 %v1807_v9, %v3125_v28 }
  0x9d   : > { %v1231_v51 = vmul.f32 %v1808_v41, %v3125_v28  ;;  %v3272_v55 = vadd.f32 %v1219_v62, %v3064_v7  ;;  %v1232_v46 = vmul.f32 %v1809_v39, %v3125_v28  ;;  %v1233_v5 = vmul.f32 %v1810_v25, %v3125_v28  ;;  %v1812_v62 = vld [vmem:[%s1941_s16 + $0x150] sm:$0xff]  ;;  %v1813_v41 = vld [vmem:[%s1941_s16 + $0x158] sm:$0xff] }
  0x9e   : > { %v1234_v61 = vmul.f32 %v1811_v22, %v3125_v28  ;;  %v3278_v56 = vadd.f32 %v1220_v60, %v3073_v43  ;;  %v3281_v10 = vadd.f32 %v1221_v31, %v3076_v50  ;;  %v3284_v9 = vadd.f32 %v1222_v49, %v3079_v20  ;;  %v1814_v20 = vld [vmem:[%s1941_s16 + $0x168] sm:$0xff]  ;;  %v1818_v60 = vld [vmem:[%s1941_s16 + $0x198] sm:$0xff] }
  0x9f   : > { %v3287_v7 = vadd.f32 %v1223_v14, %v3082_v13  ;;  %v3292_v25 = vadd.f32 %v1224_v11, %v3093_v1  ;;  %v3295_v43 = vadd.f32 %v1225_v27, %v3102_v40  ;;  %v3298_v50 = vadd.f32 %v1226_v35, %v3105_v53  ;;  %v1815_v13 = vld [vmem:[%s1941_s16 + $0x170] sm:$0xff]  ;;  %v1821_v14 = vld [vmem:[%s1941_s16 + $0x39] sm:$0xff] }
  0xa0   : > { %v3301_v49 = vadd.f32 %v1227_v8, %v3108_v4  ;;  %v3307_v31 = vadd.f32 %v1228_v58, %v3128_v18  ;;  %v3310_v1 = vadd.f32 %v1229_v45, %v3131_v32  ;;  %v3313_v40 = vadd.f32 %v1230_v52, %v3134_v47  ;;  %v1820_v4 = vld [vmem:[%s1941_s16 + $0x31] sm:$0xff]  ;;  %v1822_v39 = vld [vmem:[%s1941_s16 + $0x49] sm:$0xff]  ;;  %v1819_v11 = vld [vmem:[%s1941_s16 + $0x1a0] sm:$0xff] }
  0xa1   : > { %v3316_v53 = vadd.f32 %v1231_v51, %v3137_v3  ;;  %v3322_v22 = vadd.f32 %v1232_v46, %v3142_v0  ;;  %v3325_v18 = vadd.f32 %v1233_v5, %v3145_v36  ;;  %v3328_v32 = vadd.f32 %v1234_v61, %v3148_v15  ;;  %v1823_v27 = vld [vmem:[%s1941_s16 + $0x51] sm:$0xff]  ;;  %v1824_v3 = vld [vmem:[%s1941_s16 + $0x61] sm:$0xff]  ;;  %v1825_v45 = vld [vmem:[%s1941_s16 + $0x69] sm:$0xff] }
  0xa2   : > { %v1235_v47 = vmul.f32 %v1812_v62, %v3125_v28  ;;  %v1236_v35 = vmul.f32 %v1813_v41, %v3125_v28  ;;  %v1237_v8 = vmul.f32 %v1814_v20, %v3125_v28  ;;  %v1238_v58 = vmul.f32 %v1815_v13, %v3125_v28  ;;  %v1826_v36 = vld [vmem:[%s1941_s16 + $0x79] sm:$0xff]  ;;  %v1827_v52 = vld [vmem:[%s1941_s16 + $0x81] sm:$0xff] }
  0xa3   : > { %v1239_v0 = vmul.f32 %v2789_v48, %v3125_v28  ;;  %v1240_v15 = vmul.f32 %v2792_v16, %v3125_v28  ;;  %v1372_v51 = vmul.f32 %v1820_v4, %v3211_v26  ;;  %v1373_v46 = vmul.f32 %v1821_v14, %v3211_v26 }
  0xa4   : > { %v1374_v5 = vmul.f32 %v1822_v39, %v3211_v26  ;;  %v1241_v61 = vmul.f32 %v1818_v60, %v3125_v28  ;;  %v1242_v62 = vmul.f32 %v1819_v11, %v3125_v28  ;;  %v1375_v48 = vmul.f32 %v1823_v27, %v3211_v26  ;;  %v1828_v39 = vld [vmem:[%s1941_s16 + $0x91] sm:$0xff]  ;;  %v1830_v27 = vld [vmem:[%s1941_s16 + $0xa9] sm:$0xff] }
  0xa5   : > { %v1376_v41 = vmul.f32 %v1824_v3, %v3211_v26  ;;  %v3352_v16 = vadd.f32 %v1235_v47, %v3156_v24  ;;  %v1377_v20 = vmul.f32 %v1825_v45, %v3211_v26  ;;  %v1378_v13 = vmul.f32 %v1826_v36, %v3211_v26  ;;  %v1829_v47 = vld [vmem:[%s1941_s16 + $0x99] sm:$0xff]  ;;  %v1831_v3 = vld [vmem:[%s1941_s16 + $0xb1] sm:$0xff] }
  0xa6   : > { %v1379_v4 = vmul.f32 %v1827_v52, %v3211_v26  ;;  %v3358_v60 = vadd.f32 %v1236_v35, %v3168_v17  ;;  %v3361_v28 = vadd.f32 %v1237_v8, %v3171_v23  ;;  %v3364_v14 = vadd.f32 %v1238_v58, %v3174_v19  ;;  %v1856_v58 = vld [vmem:[%s1941_s16 + $0x62] sm:$0xff]  ;;  %v1858_v36 = vld [vmem:[%s1941_s16 + $0x7a] sm:$0xff] }
  0xa7   : > { %v3367_v24 = vadd.f32 %v1239_v0, %v3190_v29  ;;  %v3373_v11 = vadd.f32 %v1240_v15, %v3197_v30  ;;  %v1404_v17 = vadd.f32 %v1372_v51, %v3214_v59  ;;  %v1405_v23 = vadd.f32 %v1373_v46, %v3229_v21  ;;  %v1832_v29 = vld [vmem:[%s1941_s16 + $0xc1] sm:$0xff]  ;;  %v1855_v21 = vld [vmem:[%s1941_s16 + $0x52] sm:$0xff] }
  0xa8   : > { %v1406_v19 = vadd.f32 %v1374_v5, %v3232_v42  ;;  %v3382_v35 = vadd.f32 %v1241_v61, %v3200_v54  ;;  %v3385_v8 = vadd.f32 %v1242_v62, %v3203_v63  ;;  %v1407_v30 = vadd.f32 %v1375_v48, %v3235_v6  ;;  %v1857_v63 = vld [vmem:[%s1941_s16 + $0x6a] sm:$0xff]  ;;  %v1859_v52 = vld [vmem:[%s1941_s16 + $0x82] sm:$0xff]  ;;  %v1860_v15 = vld [vmem:[%s1941_s16 + $0x92] sm:$0xff] }
  0xa9   : > { %v1408_v59 = vadd.f32 %v1376_v41, %v3238_v38  ;;  %v1409_v42 = vadd.f32 %v1377_v20, %v3244_v2  ;;  %v1410_v0 = vadd.f32 %v1378_v13, %v3247_v44  ;;  %v1411_v45 = vadd.f32 %v1379_v4, %v3250_v57  ;;  %v1833_v57 = vld [vmem:[%s1941_s16 + $0xc9] sm:$0xff]  ;;  %v1861_v62 = vld [vmem:[%s1941_s16 + $0x9a] sm:$0xff] }
  0xaa   : > { %v1380_v54 = vmul.f32 %v1828_v39, %v3211_v26  ;;  %v1381_v6 = vmul.f32 %v1829_v47, %v3211_v26  ;;  %v1382_v38 = vmul.f32 %v1830_v27, %v3211_v26  ;;  %v1383_v2 = vmul.f32 %v1831_v3, %v3211_v26  ;;  %v1834_v48 = vld [vmem:[%s1941_s16 + $0xd9] sm:$0xff]  ;;  %v1862_v4 = vld [vmem:[%s1941_s16 + $0xaa] sm:$0xff]  ;;  %v1835_v39 = vld [vmem:[%s1941_s16 + $0xe1] sm:$0xff] }
  0xab   : > { %v1384_v44 = vmul.f32 %v1832_v29, %v3211_v26  ;;  %v1565_v51 = vadd.f32 %v3220_v33, %v1404_v17  ;;  %v1566_v46 = vadd.f32 %v3223_v34, %v1405_v23  ;;  %v1567_v5 = vadd.f32 %v3226_v37, %v1406_v19  ;;  %v1863_v23 = vld [vmem:[%s1941_s16 + $0xb2] sm:$0xff] }
  0xac   : > { %v1536_v61 = vmul.f32 %v3180_v12, %v1855_v21  ;;  %v1537_v41 = vmul.f32 %v3180_v12, %v1856_v58  ;;  %v1538_v20 = vmul.f32 %v3180_v12, %v1857_v63  ;;  %v1539_v13 = vmul.f32 %v3180_v12, %v1858_v36  ;;  %v1836_v27 = vld [vmem:[%s1941_s16 + $0xf1] sm:$0xff]  ;;  %v1864_v21 = vld [vmem:[%s1941_s16 + $0xc2] sm:$0xff] }
  0xad   : > { %v1540_v33 = vmul.f32 %v3180_v12, %v1859_v52  ;;  %v1412_v34 = vadd.f32 %v1380_v54, %v3272_v55  ;;  %v1385_v37 = vmul.f32 %v1833_v57, %v3211_v26  ;;  %1597 = vst [vmem:[%s3401_s24] sm:$0xff] %v1565_v51  ;;  %v1541_v17 = vmul.f32 %v3180_v12, %v1860_v15  ;;  %v1837_v54 = vld [vmem:[%s1941_s16 + $0xf9] sm:$0xff]  ;;  %v1865_v36 = vld [vmem:[%s1941_s16 + $0xca] sm:$0xff]  ;;  %v1867_v51 = vld [vmem:[%s1941_s16 + $0xe2] sm:$0xff] }
  0xae   : > { %v1568_v47 = vadd.f32 %v1536_v61, %v1407_v30  ;;  %v1413_v19 = vadd.f32 %v1381_v6, %v3278_v56  ;;  %1598 = vst [vmem:[%s3401_s24 + $0x8] sm:$0xff] %v1566_v46  ;;  %v1569_v3 = vadd.f32 %v1537_v41, %v1408_v59  ;;  %v1570_v29 = vadd.f32 %v1538_v20, %v1409_v42  ;;  %v1838_v52 = vld [vmem:[%s1941_s16 + $0x109] sm:$0xff]  ;;  %v1839_v15 = vld [vmem:[%s1941_s16 + $0x111] sm:$0xff] }
  0xaf   : > { %v1542_v55 = vmul.f32 %v3180_v12, %v1861_v62  ;;  %v1414_v58 = vadd.f32 %v1382_v38, %v3281_v10  ;;  %v1386_v30 = vmul.f32 %v1834_v48, %v3211_v26  ;;  %1599 = vst [vmem:[%s3401_s24 + $0x10] sm:$0xff] %v1567_v5  ;;  %v1571_v63 = vadd.f32 %v1539_v13, %v1410_v0  ;;  %v1866_v38 = vld [vmem:[%s1941_s16 + $0xda] sm:$0xff]  ;;  %v1868_v61 = vld [vmem:[%s1941_s16 + $0xf2] sm:$0xff]  ;;  %v1841_v41 = vld [vmem:[%s1941_s16 + $0x129] sm:$0xff] }
  0xb0   : > { %v1543_v56 = vmul.f32 %v3180_v12, %v1862_v4  ;;  %v1415_v59 = vadd.f32 %v1383_v2, %v3284_v9  ;;  %v1387_v42 = vmul.f32 %v1835_v39, %v3211_v26  ;;  %1600 = vst [vmem:[%s3401_s24 + $0x18] sm:$0xff] %v1568_v47  ;;  %v1572_v10 = vadd.f32 %v1540_v33, %v1411_v45  ;;  %v1840_v5 = vld [vmem:[%s1941_s16 + $0x121] sm:$0xff]  ;;  %v1870_v39 = vld [vmem:[%s1941_s16 + $0x10a] sm:$0xff] }
  0xb1   : > { %v1544_v6 = vmul.f32 %v3180_v12, %v1863_v23  ;;  %v1416_v57 = vadd.f32 %v1384_v44, %v3287_v7  ;;  %v1388_v0 = vmul.f32 %v1836_v27, %v3211_v26  ;;  %1601 = vst [vmem:[%s3401_s24 + $0x20] sm:$0xff] %v1569_v3  ;;  %v1573_v9 = vadd.f32 %v1541_v17, %v1412_v34  ;;  %v1869_v13 = vld [vmem:[%s1941_s16 + $0xfa] sm:$0xff]  ;;  %v1871_v27 = vld [vmem:[%s1941_s16 + $0x112] sm:$0xff] }
  0xb2   : > { %v1545_v2 = vmul.f32 %v3180_v12, %v1864_v21  ;;  %v1417_v46 = vadd.f32 %v1385_v37, %v3292_v25  ;;  %v1389_v45 = vmul.f32 %v1837_v54, %v3211_v26  ;;  %1602 = vst [vmem:[%s3401_s24 + $0x28] sm:$0xff] %v1570_v29  ;;  %v1574_v7 = vadd.f32 %v1542_v55, %v1413_v19  ;;  %v1842_v34 = vld [vmem:[%s1941_s16 + $0x139] sm:$0xff]  ;;  %v1843_v23 = vld [vmem:[%s1941_s16 + $0x141] sm:$0xff]  ;;  %v1844_v55 = vld [vmem:[%s1941_s16 + $0x151] sm:$0xff] }
  0xb3   : > { %v1546_v44 = vmul.f32 %v3180_v12, %v1865_v36  ;;  %v1418_v62 = vadd.f32 %v1386_v30, %v3295_v43  ;;  %v1390_v48 = vmul.f32 %v1838_v52, %v3211_v26  ;;  %1603 = vst [vmem:[%s3401_s24 + $0x30] sm:$0xff] %v1571_v63  ;;  %v1575_v25 = vadd.f32 %v1543_v56, %v1414_v58  ;;  %v1872_v58 = vld [vmem:[%s1941_s16 + $0x122] sm:$0xff]  ;;  %v1845_v63 = vld [vmem:[%s1941_s16 + $0x159] sm:$0xff]  ;;  %v1873_v36 = vld [vmem:[%s1941_s16 + $0x12a] sm:$0xff] }
  0xb4   : > { %v1547_v20 = vmul.f32 %v3180_v12, %v1866_v38  ;;  %v1419_v33 = vadd.f32 %v1387_v42, %v3298_v50  ;;  %v1391_v4 = vmul.f32 %v1839_v15, %v3211_v26  ;;  %1604 = vst [vmem:[%s3401_s24 + $0x38] sm:$0xff] %v1572_v10  ;;  %v1576_v43 = vadd.f32 %v1544_v6, %v1415_v59  ;;  %v1846_v52 = vld [vmem:[%s1941_s16 + $0x169] sm:$0xff]  ;;  %v1874_v6 = vld [vmem:[%s1941_s16 + $0x13a] sm:$0xff] }
  0xb5   : > { %v1548_v37 = vmul.f32 %v3180_v12, %v1867_v51  ;;  %v1420_v47 = vadd.f32 %v1388_v0, %v3301_v49  ;;  %v1392_v17 = vmul.f32 %v1840_v5, %v3211_v26  ;;  %1605 = vst [vmem:[%s3401_s24 + $0x40] sm:$0xff] %v1573_v9  ;;  %v1577_v50 = vadd.f32 %v1545_v2, %v1416_v57  ;;  %v1847_v0 = vld [vmem:[%s1941_s16 + $0x171] sm:$0xff]  ;;  %v1875_v9 = vld [vmem:[%s1941_s16 + $0x142] sm:$0xff] }
  0xb6   : > { %v1549_v19 = vmul.f32 %v3180_v12, %v1868_v61  ;;  %v1421_v3 = vadd.f32 %v1389_v45, %v3307_v31  ;;  %v1393_v29 = vmul.f32 %v1841_v41, %v3211_v26  ;;  %1606 = vst [vmem:[%s3401_s24 + $0x48] sm:$0xff] %v1574_v7  ;;  %v1578_v49 = vadd.f32 %v1546_v44, %v1417_v46  ;;  %v1876_v45 = vld [vmem:[%s1941_s16 + $0x152] sm:$0xff] }
  0xb7   : > { %v1550_v21 = vmul.f32 %v3180_v12, %v1869_v13  ;;  %v1422_v30 = vadd.f32 %v1390_v48, %v3310_v1  ;;  %v1394_v54 = vmul.f32 %v1842_v34, %v3211_v26  ;;  %1607 = vst [vmem:[%s3401_s24 + $0x50] sm:$0xff] %v1575_v25  ;;  %v1579_v31 = vadd.f32 %v1547_v20, %v1418_v62  ;;  %v1850_v41 = vld [vmem:[%s1941_s16 + $0x199] sm:$0xff]  ;;  %v1851_v34 = vld [vmem:[%s1941_s16 + $0x1a1] sm:$0xff] }
  0xb8   : > { %v1551_v56 = vmul.f32 %v3180_v12, %v1870_v39  ;;  %v1423_v59 = vadd.f32 %v1391_v4, %v3313_v40  ;;  %v1395_v42 = vmul.f32 %v1843_v23, %v3211_v26  ;;  %1608 = vst [vmem:[%s3401_s24 + $0x58] sm:$0xff] %v1576_v43  ;;  %v1580_v1 = vadd.f32 %v1548_v37, %v1419_v33  ;;  %v3817_v33 = vld [vmem:[#allocation2_spill] sm:$0xff]  ;;  %v1879_v37 = vld [vmem:[%s1941_s16 + $0x172] sm:$0xff] }
  0xb9   : > { %v1552_v10 = vmul.f32 %v3180_v12, %v1871_v27  ;;  %v1424_v38 = vadd.f32 %v1392_v17, %v3316_v53  ;;  %v1396_v57 = vmul.f32 %v1844_v55, %v3211_v26  ;;  %1609 = vst [vmem:[%s3401_s24 + $0x60] sm:$0xff] %v1577_v50  ;;  %v1581_v15 = vadd.f32 %v1549_v19, %v1420_v47  ;;  %v3818_v47 = vld [vmem:[#allocation3_spill] sm:$0xff] }
  0xba   : > { %v1553_v40 = vmul.f32 %v3180_v12, %v1872_v58  ;;  %v1425_v2 = vadd.f32 %v1393_v29, %v3322_v22  ;;  %v1397_v51 = vmul.f32 %v1845_v63, %v3211_v26  ;;  %1610 = vst [vmem:[%s3401_s24 + $0x68] sm:$0xff] %v1578_v49  ;;  %v1582_v46 = vadd.f32 %v1550_v21, %v1421_v3  ;;  %v1877_v22 = vld [vmem:[%s1941_s16 + $0x15a] sm:$0xff]  ;;  %v1883_v63 = vld [vmem:[%s1941_s16 + $0x1a2] sm:$0xff] }
  0xbb   : > { %v1554_v53 = vmul.f32 %v3180_v12, %v1873_v36  ;;  %v1426_v5 = vadd.f32 %v1394_v54, %v3325_v18  ;;  %v1398_v7 = vmul.f32 %v1846_v52, %v3211_v26  ;;  %1611 = vst [vmem:[%s3401_s24 + $0x70] sm:$0xff] %v1579_v31  ;;  %v1583_v44 = vadd.f32 %v1551_v56, %v1422_v30  ;;  %v1878_v18 = vld [vmem:[%s1941_s16 + $0x16a] sm:$0xff]  ;;  %v1882_v21 = vld [vmem:[%s1941_s16 + $0x19a] sm:$0xff] }
  0xbc   : > { %v1555_v61 = vmul.f32 %v3180_v12, %v1874_v6  ;;  %v1427_v62 = vadd.f32 %v1395_v42, %v3328_v32  ;;  %v1399_v48 = vmul.f32 %v1847_v0, %v3211_v26  ;;  %1612 = vst [vmem:[%s3401_s24 + $0x78] sm:$0xff] %v1580_v1  ;;  %v1584_v25 = vadd.f32 %v1552_v10, %v1423_v59  ;;  %v3819_v30 = vld [vmem:[#allocation4_spill] sm:$0xff]  ;;  %v3820_v31 = vld [vmem:[#allocation5_spill] sm:$0xff] }
  0xbd   : > { %v1556_v20 = vmul.f32 %v3180_v12, %v1875_v9  ;;  %v1428_v13 = vadd.f32 %v1396_v57, %v3352_v16  ;;  %v1400_v4 = vmul.f32 %v3817_v33, %v3211_v26  ;;  %1613 = vst [vmem:[%s3401_s24 + $0x80] sm:$0xff] %v1581_v15  ;;  %v1585_v43 = vadd.f32 %v1553_v40, %v1424_v38 }
  0xbe   : > { %v1557_v32 = vmul.f32 %v3180_v12, %v1876_v45  ;;  %v1429_v39 = vadd.f32 %v1397_v51, %v3358_v60  ;;  %v1401_v17 = vmul.f32 %v3818_v47, %v3211_v26  ;;  %1614 = vst [vmem:[%s3401_s24 + $0x88] sm:$0xff] %v1582_v46  ;;  %v1586_v23 = vadd.f32 %v1554_v53, %v1425_v2 }
  0xbf   : > { %v1558_v16 = vmul.f32 %v3180_v12, %v1877_v22  ;;  %v1430_v50 = vadd.f32 %v1398_v7, %v3361_v28  ;;  %v1402_v19 = vmul.f32 %v1850_v41, %v3211_v26  ;;  %1615 = vst [vmem:[%s3401_s24 + $0x90] sm:$0xff] %v1583_v44  ;;  %v1587_v27 = vadd.f32 %v1555_v61, %v1426_v5 }
  0xc0   : > { %v1559_v3 = vmul.f32 %v3180_v12, %v1878_v18  ;;  %v1431_v60 = vadd.f32 %v1399_v48, %v3364_v14  ;;  %v1403_v29 = vmul.f32 %v1851_v34, %v3211_v26  ;;  %1616 = vst [vmem:[%s3401_s24 + $0x98] sm:$0xff] %v1584_v25  ;;  %v1588_v55 = vadd.f32 %v1556_v20, %v1427_v62 }
  0xc1   : > { %v1560_v49 = vmul.f32 %v3180_v12, %v1879_v37  ;;  %v1432_v28 = vadd.f32 %v1400_v4, %v3367_v24  ;;  %1617 = vst [vmem:[%s3401_s24 + $0xa0] sm:$0xff] %v1585_v43  ;;  %v1589_v58 = vadd.f32 %v1557_v32, %v1428_v13  ;;  %v1561_v54 = vmul.f32 %v3180_v12, %v3819_v30 }
  0xc2   : > { %v1433_v14 = vadd.f32 %v1401_v17, %v3373_v11  ;;  %1618 = vst [vmem:[%s3401_s24 + $0xa8] sm:$0xff] %v1586_v23  ;;  %v1590_v26 = vadd.f32 %v1558_v16, %v1429_v39  ;;  %v1562_v56 = vmul.f32 %v3180_v12, %v3820_v31  ;;  %v1434_v36 = vadd.f32 %v1402_v19, %v3382_v35 }
  0xc3   : > { %1619 = vst [vmem:[%s3401_s24 + $0xb0] sm:$0xff] %v1587_v27  ;;  %v1591_v24 = vadd.f32 %v1559_v3, %v1430_v50  ;;  %v1563_v59 = vmul.f32 %v3180_v12, %v1882_v21  ;;  %v1435_v42 = vadd.f32 %v1403_v29, %v3385_v8  ;;  %v1592_v11 = vadd.f32 %v1560_v49, %v1431_v60 }
  0xc4   : > { %1620 = vst [vmem:[%s3401_s24 + $0xb8] sm:$0xff] %v1588_v55  ;;  %v1564_v52 = vmul.f32 %v3180_v12, %v1883_v63  ;;  %v1593_v1 = vadd.f32 %v1561_v54, %v1432_v28  ;;  %v1594_v10 = vadd.f32 %v1562_v56, %v1433_v14 }
  0xc5   : > { %1621 = vst [vmem:[%s3401_s24 + $0xc0] sm:$0xff] %v1589_v58  ;;  %v1595_v35 = vadd.f32 %v1563_v59, %v1434_v36 }
  0xc6   : > { %1622 = vst [vmem:[%s3401_s24 + $0xc8] sm:$0xff] %v1590_v26  ;;  %v1596_v6 = vadd.f32 %v1564_v52, %v1435_v42 }
  0xc7   : > { %1623 = vst [vmem:[%s3401_s24 + $0xd0] sm:$0xff] %v1591_v24 }
  0xc8   : > { %1624 = vst [vmem:[%s3401_s24 + $0xd8] sm:$0xff] %v1592_v11 }
  0xc9   : > { %1625 = vst [vmem:[%s3401_s24 + $0xe0] sm:$0xff] %v1593_v1 }
  0xca   : > { %1626 = vst [vmem:[%s3401_s24 + $0xe8] sm:$0xff] %v1594_v10 }
  0xcb   : > { %1627 = vst [vmem:[%s3401_s24 + $0xf0] sm:$0xff] %v1595_v35 }
  0xcc   : > { %1628 = vst [vmem:[%s3401_s24 + $0xf8] sm:$0xff] %v1596_v6 }
  0xcd PF: > { %s12_s9 = sadd.s32 1, %s1905_s9  }
  0xce   : > { %p9_p4 = scmp.ge.s32.totalorder %s12_s9, 4  }
  0xd0   :  { %11 = sbr.rel (!%p9_p4) target bundleno = 1 (0x1), region = 60 }

</bundles_post_ra>
